<compile_context>
chip_gen: v5e
topology: v5e:2x2
jax: 0.10.0
libtpu: 0.0.40
codegen_flags: <defaults>
</compile_context>

<pallas_src>
import jax
import jax.numpy as jnp
from jax import lax
from jax.experimental import pallas as pl
from jax.experimental.pallas import tpu as pltpu

# ----- model hyper-parameters (small, consistent with the module) -----
BATCH = 2
SEQ = 8
DIM = 32
HEADS = 4
DIM_HEAD = 8
INNER = HEADS * DIM_HEAD      # 32
MLP_DIM = 64
DEPTH = 2
LN_EPS = 1e-5                 # torch.nn.LayerNorm default
SCALE = DIM_HEAD ** -0.5


# ---------------------------------------------------------------------
# in-kernel helpers (traced inside the fused Pallas kernel)
# ---------------------------------------------------------------------
def _layernorm(x, g, b):
    mu = jnp.mean(x, axis=-1, keepdims=True)
    var = jnp.mean((x - mu) ** 2, axis=-1, keepdims=True)
    return (x - mu) * lax.rsqrt(var + LN_EPS) * g + b


def _gelu(x):
    # matches torch.nn.GELU() default (erf form), computed in f32
    return 0.5 * x * (1.0 + lax.erf(x * (2.0 ** -0.5)))


def _dual_qkv(x12n, w6h):
    """x12n: (2, SEQ, DIM) f32 (both streams, layer-normed)
    w6h:  (6*HEADS, DIM, DIM_HEAD) bf16, index = chunk*2H + stream*H + head
    -> q, k, v each (2*HEADS, SEQ, DIM_HEAD) f32, index = stream*H + head."""
    xs = jnp.broadcast_to(x12n.astype(jnp.bfloat16)[:, None],
                          (2, HEADS, SEQ, DIM)).reshape(2 * HEADS, SEQ, DIM)
    xb = jnp.concatenate([xs, xs, xs], axis=0)                        # (6H, S, D)
    qkv = lax.dot_general(xb, w6h, (((2,), (1,)), ((0,), (0,))),
                          preferred_element_type=jnp.float32)         # (6H, S, DH)
    return qkv[:2 * HEADS], qkv[2 * HEADS:4 * HEADS], qkv[4 * HEADS:]


def _dual_attend(q, k, v, wout2h, bout2):
    """q,k,v: (2H, SEQ, DH) f32; wout2h: (2H, DH, DIM) bf16 (index = stream*H + head);
    bout2: (2, 1, DIM) f32.  Stream+head batched attention; head concat is folded into a
    per-head output projection plus a sum over the head axis."""
    s = lax.dot_general(q.astype(jnp.bfloat16), k.astype(jnp.bfloat16),
                        (((2,), (2,)), ((0,), (0,))),
                        preferred_element_type=jnp.float32) * SCALE   # (2H, N, N)
    s = s - jnp.max(s, axis=-1, keepdims=True)
    p = jnp.exp(s)
    p = p * pl.reciprocal(jnp.sum(p, axis=-1, keepdims=True), approx=True)
    o = lax.dot_general(p.astype(jnp.bfloat16), v.astype(jnp.bfloat16),
                        (((2,), (1,)), ((0,), (0,))),
                        preferred_element_type=jnp.float32)           # (2H, N, DH)
    proj = lax.dot_general(o.astype(jnp.bfloat16), wout2h,
                           (((2,), (1,)), ((0,), (0,))),
                           preferred_element_type=jnp.float32)        # (2H, N, DIM)
    return jnp.sum(proj.reshape(2, HEADS, SEQ, DIM), axis=1) + bout2  # (2, N, DIM)


def _dual_ffn(x12, g, b, w1, b1, w2, b2):
    """x12: (2, SEQ, DIM); w1: (2, DIM, MLP) bf16; w2: (2, MLP, DIM) bf16 (stream-batched)."""
    xn = _layernorm(x12, g, b).astype(jnp.bfloat16)
    h = lax.dot_general(xn, w1, (((2,), (1,)), ((0,), (0,))),
                        preferred_element_type=jnp.float32) + b1
    h = _gelu(h).astype(jnp.bfloat16)
    return lax.dot_general(h, w2, (((2,), (1,)), ((0,), (0,))),
                           preferred_element_type=jnp.float32) + b2


# ---------------------------------------------------------------------
# fused kernel: one grid step == one batch element, both streams, all layers
# ---------------------------------------------------------------------
def cross_transformer_kernel(x1_ref, x2_ref,
                             lng_ref, lnb_ref,            # (DEPTH, 5, 1, DIM) f32
                             wqkv_ref,                    # (DEPTH, 2, 6H, DIM, DH) bf16
                             wout_ref,                    # (DEPTH, 2, 2H, DH, DIM) bf16
                             bout_ref,                    # (DEPTH, 2, 2, 1, DIM)  f32
                             w1_ref, b1_ref, w2_ref, b2_ref,
                             o1_ref, o2_ref):
    # both streams as one (2, SEQ, DIM) slab
    x12 = jnp.concatenate([x1_ref[...], x2_ref[...]], axis=0).astype(jnp.float32)

    for d in range(DEPTH):                                # unrolled at trace time
        # ---- PreNorm CrossAttention: one shared LayerNorm applied to both streams ----
        xn = _layernorm(x12, lng_ref[d, 0], lnb_ref[d, 0])
        q, k, v = _dual_qkv(xn, wqkv_ref[d, 0])
        # output stream 0 uses q2 with (k1, v1); stream 1 uses q1 with (k2, v2)
        qx = jnp.concatenate([q[HEADS:], q[:HEADS]], axis=0)
        x12 = x12 + _dual_attend(qx, k, v, wout_ref[d, 0], bout_ref[d, 0])

        # ---- PreNorm self-attention, both streams batched ----
        xn = _layernorm(x12, lng_ref[d, 1:3], lnb_ref[d, 1:3])
        q, k, v = _dual_qkv(xn, wqkv_ref[d, 1])
        x12 = x12 + _dual_attend(q, k, v, wout_ref[d, 1], bout_ref[d, 1])

        # ---- PreNorm FeedForward, both streams batched ----
        x12 = x12 + _dual_ffn(x12, lng_ref[d, 3:5], lnb_ref[d, 3:5],
                              w1_ref[d], b1_ref[d], w2_ref[d], b2_ref[d])

    o1_ref[...] = x12[0:1].astype(o1_ref.dtype)
    o2_ref[...] = x12[1:2].astype(o2_ref.dtype)


# ---------------------------------------------------------------------
# pallas_call wrapper (single fused call for the whole model)
# ---------------------------------------------------------------------
_PARAM_ORDER = ("ln_g", "ln_b", "wqkv", "wout", "bout", "w1", "b1", "w2", "b2")


@jax.jit
def cross_transformer(x1, x2, packed):
    B = x1.shape[0]
    act_spec = pl.BlockSpec((1, SEQ, DIM), lambda i: (i, 0, 0))

    def full_spec(a):
        return pl.BlockSpec(a.shape, lambda i, _nd=a.ndim: (0,) * _nd)

    params = [packed[k] for k in _PARAM_ORDER]
    return pl.pallas_call(
        cross_transformer_kernel,
        out_shape=(jax.ShapeDtypeStruct(x1.shape, x1.dtype),
                   jax.ShapeDtypeStruct(x2.shape, x2.dtype)),
        grid=(B,),
        in_specs=[act_spec, act_spec] + [full_spec(a) for a in params],
        out_specs=(act_spec, act_spec),
        compiler_params=pltpu.CompilerParams(dimension_semantics=("parallel",)),
    )(x1, x2, *params)


# ---------------------------------------------------------------------
# parameter init (deterministic, synthetic) and packing for the kernel
# ---------------------------------------------------------------------
def init_params(key):
    """Per-layer params in plain (in_features, out_features) layout (y = x @ W + b)."""
    layers = []
    for d in range(DEPTH):
        ks = iter(jax.random.split(jax.random.fold_in(key, d), 32))

        def lin(fi, fo):
            return jax.random.normal(next(ks), (fi, fo), jnp.float32) * (fi ** -0.5)

        def vec(n):
            return 0.1 * jax.random.normal(next(ks), (n,), jnp.float32)

        def ln_p():
            return dict(g=1.0 + vec(DIM), b=vec(DIM))

        cross = dict(ln=ln_p(),
                     wqkv1=lin(DIM, 3 * INNER), wqkv2=lin(DIM, 3 * INNER),
                     wout1=lin(INNER, DIM), bout1=vec(DIM),
                     wout2=lin(INNER, DIM), bout2=vec(DIM))
        attn1 = dict(ln=ln_p(), wqkv=lin(DIM, 3 * INNER), wout=lin(INNER, DIM), bout=vec(DIM))
        attn2 = dict(ln=ln_p(), wqkv=lin(DIM, 3 * INNER), wout=lin(INNER, DIM), bout=vec(DIM))
        ff1 = dict(ln=ln_p(), w1=lin(DIM, MLP_DIM), b1=vec(MLP_DIM),
                   w2=lin(MLP_DIM, DIM), b2=vec(DIM))
        ff2 = dict(ln=ln_p(), w1=lin(DIM, MLP_DIM), b1=vec(MLP_DIM),
                   w2=lin(MLP_DIM, DIM), b2=vec(DIM))
        layers.append(dict(cross=cross, attn1=attn1, attn2=attn2, ff1=ff1, ff2=ff2))
    return layers


def pack_params(layers):
    """Stack all layers' params and pre-split attention weights per (chunk, stream, head)
    so the kernel only ever indexes/reshapes leading dims (no in-kernel lane slicing)."""
    def per_head_qkv(w):   # (DIM, 3*INNER) -> (3, HEADS, DIM, DIM_HEAD)  (chunk, head)
        return w.reshape(DIM, 3, HEADS, DIM_HEAD).transpose(1, 2, 0, 3)

    def pair_qkv(w_a, w_b):  # -> (6H, DIM, DH), index = chunk*2H + stream*H + head
        return jnp.stack([per_head_qkv(w_a), per_head_qkv(w_b)],
                         axis=1).reshape(3 * 2 * HEADS, DIM, DIM_HEAD)

    def pair_out(w_a, w_b):  # (INNER, DIM)x2 -> (2H, DH, DIM), index = stream*H + head
        return jnp.stack([w_a.reshape(HEADS, DIM_HEAD, DIM),
                          w_b.reshape(HEADS, DIM_HEAD, DIM)],
                         axis=0).reshape(2 * HEADS, DIM_HEAD, DIM)

    ln_g, ln_b, wqkv, wout, bout, w1, b1, w2, b2 = ([] for _ in range(9))
    for lp in layers:
        c, a1, a2, f1, f2 = lp["cross"], lp["attn1"], lp["attn2"], lp["ff1"], lp["ff2"]
        blocks = (c, a1, a2, f1, f2)                       # LN order: cross, attn1, attn2, ff1, ff2
        ln_g.append(jnp.stack([blk["ln"]["g"] for blk in blocks])[:, None, :])
        ln_b.append(jnp.stack([blk["ln"]["b"] for blk in blocks])[:, None, :])
        wqkv.append(jnp.stack([pair_qkv(c["wqkv1"], c["wqkv2"]),
                               pair_qkv(a1["wqkv"], a2["wqkv"])]))
        wout.append(jnp.stack([pair_out(c["wout1"], c["wout2"]),
                               pair_out(a1["wout"], a2["wout"])]))
        bout.append(jnp.stack([jnp.stack([c["bout1"], c["bout2"]])[:, None, :],
                               jnp.stack([a1["bout"], a2["bout"]])[:, None, :]]))
        w1.append(jnp.stack([f1["w1"], f2["w1"]]))
        b1.append(jnp.stack([f1["b1"], f2["b1"]])[:, None, :])
        w2.append(jnp.stack([f1["w2"], f2["w2"]]))
        b2.append(jnp.stack([f1["b2"], f2["b2"]])[:, None, :])

    f32, bf16 = jnp.float32, jnp.bfloat16
    return dict(
        ln_g=jnp.stack(ln_g).astype(f32),    # (DEPTH, 5, 1, DIM)
        ln_b=jnp.stack(ln_b).astype(f32),    # (DEPTH, 5, 1, DIM)
        wqkv=jnp.stack(wqkv).astype(bf16),   # (DEPTH, 2, 6*HEADS, DIM, DIM_HEAD)
        wout=jnp.stack(wout).astype(bf16),   # (DEPTH, 2, 2*HEADS, DIM_HEAD, DIM)
        bout=jnp.stack(bout).astype(f32),    # (DEPTH, 2, 2, 1, DIM)
        w1=jnp.stack(w1).astype(bf16),       # (DEPTH, 2, DIM, MLP_DIM)
        b1=jnp.stack(b1).astype(f32),        # (DEPTH, 2, 1, MLP_DIM)
        w2=jnp.stack(w2).astype(bf16),       # (DEPTH, 2, MLP_DIM, DIM)
        b2=jnp.stack(b2).astype(f32),        # (DEPTH, 2, 1, DIM)
    )


# ---------------------------------------------------------------------
# pure-JAX reference (mirrors the kernel's mixed precision) for validation
# ---------------------------------------------------------------------
def _mm(a, w):
    return jnp.einsum("...ij,jk->...ik", a.astype(jnp.bfloat16), w.astype(jnp.bfloat16),
                      preferred_element_type=jnp.float32)


def _split_heads(t):   # (B, N, H*DH) -> (B, H, N, DH)   == 'b n (h d) -> b h n d'
    B, N, _ = t.shape
    return t.reshape(B, N, HEADS, DIM_HEAD).transpose(0, 2, 1, 3)


def _merge_heads(t):   # (B, H, N, DH) -> (B, N, H*DH)
    B, H, N, DH = t.shape
    return t.transpose(0, 2, 1, 3).reshape(B, N, H * DH)


def _ref_sdpa(q, k, v):
    s = jnp.einsum("bhid,bhjd->bhij", q.astype(jnp.bfloat16), k.astype(jnp.bfloat16),
                   preferred_element_type=jnp.float32) * SCALE
    s = s - s.max(-1, keepdims=True)
    p = jnp.exp(s)
    p = p / p.sum(-1, keepdims=True)
    return jnp.einsum("bhij,bhjd->bhid", p.astype(jnp.bfloat16), v.astype(jnp.bfloat16),
                      preferred_element_type=jnp.float32)


def _ref_ln(x, g, b):
    mu = x.mean(-1, keepdims=True)
    var = ((x - mu) ** 2).mean(-1, keepdims=True)
    return (x - mu) * jax.lax.rsqrt(var + LN_EPS) * g + b


def reference_forward(x1, x2, layers):
    x1 = x1.astype(jnp.float32)
    x2 = x2.astype(jnp.float32)
    for lp in layers:
        c = lp["cross"]
        x1n = _ref_ln(x1, c["ln"]["g"], c["ln"]["b"])
        x2n = _ref_ln(x2, c["ln"]["g"], c["ln"]["b"])
        qkv1, qkv2 = _mm(x1n, c["wqkv1"]), _mm(x2n, c["wqkv2"])
        q1, k1, v1 = [_split_heads(qkv1[..., i * INNER:(i + 1) * INNER]) for i in range(3)]
        q2, k2, v2 = [_split_heads(qkv2[..., i * INNER:(i + 1) * INNER]) for i in range(3)]
        a1 = _mm(_merge_heads(_ref_sdpa(q2, k1, v1)), c["wout1"]) + c["bout1"]
        a2 = _mm(_merge_heads(_ref_sdpa(q1, k2, v2)), c["wout2"]) + c["bout2"]
        x1 = x1 + a1
        x2 = x2 + a2

        def self_attn(x, p):
            xn = _ref_ln(x, p["ln"]["g"], p["ln"]["b"])
            qkv = _mm(xn, p["wqkv"])
            q, k, v = [_split_heads(qkv[..., i * INNER:(i + 1) * INNER]) for i in range(3)]
            return _mm(_merge_heads(_ref_sdpa(q, k, v)), p["wout"]) + p["bout"]

        def ffn(x, p):
            xn = _ref_ln(x, p["ln"]["g"], p["ln"]["b"])
            h = _gelu(_mm(xn, p["w1"]) + p["b1"])
            return _mm(h, p["w2"]) + p["b2"]

        x1 = x1 + self_attn(x1, lp["attn1"])
        x2 = x2 + self_attn(x2, lp["attn2"])
        x1 = x1 + ffn(x1, lp["ff1"])
        x2 = x2 + ffn(x2, lp["ff2"])
    return x1, x2


if __name__ == "__main__":
    key = jax.random.PRNGKey(0)
    k1, k2, kp = jax.random.split(key, 3)
    x1 = jax.random.normal(k1, (BATCH, SEQ, DIM), jnp.float32)
    x2 = jax.random.normal(k2, (BATCH, SEQ, DIM), jnp.float32)

    layers = init_params(kp)
    packed = pack_params(layers)

    y1, y2 = cross_transformer(x1, x2, packed)
    jax.block_until_ready((y1, y2))

    assert y1.shape == (BATCH, SEQ, DIM) and y2.shape == (BATCH, SEQ, DIM)
    r1, r2 = reference_forward(x1, x2, layers)
    err = max(float(jnp.max(jnp.abs(y1 - r1))), float(jnp.max(jnp.abs(y2 - r2))))
    # loose tolerance: the only deviations from the reference are pl.reciprocal(approx=True)
    # and f32 accumulation ordering; a wiring bug would produce O(1) errors.
    assert err < 1e-1, f"kernel/reference mismatch, max abs err = {err}"
    print("KERNEL_OK")
</pallas_src>

<mosaic_0001>
module attributes {stable_mosaic.version = 11 : i64} {
  func.func @cross_transformer_kernel(%arg0: i32, %arg1: memref<1x8x32xf32, #tpu.memory_space<vmem>>, %arg2: memref<1x8x32xf32, #tpu.memory_space<vmem>>, %arg3: memref<2x5x1x32xf32, #tpu.memory_space<vmem>>, %arg4: memref<2x5x1x32xf32, #tpu.memory_space<vmem>>, %arg5: memref<2x2x24x32x8xbf16, #tpu.memory_space<vmem>>, %arg6: memref<2x2x8x8x32xbf16, #tpu.memory_space<vmem>>, %arg7: memref<2x2x2x1x32xf32, #tpu.memory_space<vmem>>, %arg8: memref<2x2x32x64xbf16, #tpu.memory_space<vmem>>, %arg9: memref<2x2x1x64xf32, #tpu.memory_space<vmem>>, %arg10: memref<2x2x64x32xbf16, #tpu.memory_space<vmem>>, %arg11: memref<2x2x1x32xf32, #tpu.memory_space<vmem>>, %arg12: memref<1x8x32xf32, #tpu.memory_space<vmem>>, %arg13: memref<1x8x32xf32, #tpu.memory_space<vmem>>) attributes {dimension_semantics = [#tpu.dimension_semantics<parallel>], iteration_bounds = array<i64: 2>, scalar_prefetch = 0 : i64, scratch_operands = 0 : i64, tpu.core_type = #tpu.core_type<tc>, window_params = [{transform_indices = @transform_0, window_bounds = array<i64: 1, 8, 32>}, {transform_indices = @transform_1, window_bounds = array<i64: 1, 8, 32>}, {pipeline_mode = #tpu.pipeline_mode<synchronous>, transform_indices = @transform_2, window_bounds = array<i64: 2, 5, 1, 32>}, {pipeline_mode = #tpu.pipeline_mode<synchronous>, transform_indices = @transform_3, window_bounds = array<i64: 2, 5, 1, 32>}, {pipeline_mode = #tpu.pipeline_mode<synchronous>, transform_indices = @transform_4, window_bounds = array<i64: 2, 2, 24, 32, 8>}, {pipeline_mode = #tpu.pipeline_mode<synchronous>, transform_indices = @transform_5, window_bounds = array<i64: 2, 2, 8, 8, 32>}, {pipeline_mode = #tpu.pipeline_mode<synchronous>, transform_indices = @transform_6, window_bounds = array<i64: 2, 2, 2, 1, 32>}, {pipeline_mode = #tpu.pipeline_mode<synchronous>, transform_indices = @transform_7, window_bounds = array<i64: 2, 2, 32, 64>}, {pipeline_mode = #tpu.pipeline_mode<synchronous>, transform_indices = @transform_8, window_bounds = array<i64: 2, 2, 1, 64>}, {pipeline_mode = #tpu.pipeline_mode<synchronous>, transform_indices = @transform_9, window_bounds = array<i64: 2, 2, 64, 32>}, {pipeline_mode = #tpu.pipeline_mode<synchronous>, transform_indices = @transform_10, window_bounds = array<i64: 2, 2, 1, 32>}, {transform_indices = @transform_11, window_bounds = array<i64: 1, 8, 32>}, {transform_indices = @transform_12, window_bounds = array<i64: 1, 8, 32>}]} {
    %c0 = arith.constant 0 : index
    %c0_0 = arith.constant 0 : index
    %c0_1 = arith.constant 0 : index
    %0 = vector.load %arg1[%c0, %c0_0, %c0_1] : memref<1x8x32xf32, #tpu.memory_space<vmem>>, vector<1x8x32xf32>
    %c0_2 = arith.constant 0 : index
    %c0_3 = arith.constant 0 : index
    %c0_4 = arith.constant 0 : index
    %1 = vector.load %arg2[%c0_2, %c0_3, %c0_4] : memref<1x8x32xf32, #tpu.memory_space<vmem>>, vector<1x8x32xf32>
    %2 = tpu.concatenate %0, %1 in 0 : vector<1x8x32xf32>, vector<1x8x32xf32> -> vector<2x8x32xf32>
    %c0_5 = arith.constant 0 : index
    %c0_6 = arith.constant 0 : index
    %c0_7 = arith.constant 0 : index
    %c0_8 = arith.constant 0 : index
    %3 = vector.load %arg3[%c0_5, %c0_6, %c0_7, %c0_8] : memref<2x5x1x32xf32, #tpu.memory_space<vmem>>, vector<1x1x1x32xf32>
    %4 = vector.shape_cast %3 : vector<1x1x1x32xf32> to vector<1x32xf32>
    %c0_9 = arith.constant 0 : index
    %c0_10 = arith.constant 0 : index
    %c0_11 = arith.constant 0 : index
    %c0_12 = arith.constant 0 : index
    %5 = vector.load %arg4[%c0_9, %c0_10, %c0_11, %c0_12] : memref<2x5x1x32xf32, #tpu.memory_space<vmem>>, vector<1x1x1x32xf32>
    %6 = vector.shape_cast %5 : vector<1x1x1x32xf32> to vector<1x32xf32>
    %cst = arith.constant dense<0.000000e+00> : vector<2x8xf32>
    %7 = vector.multi_reduction <add>, %2, %cst [2] : vector<2x8x32xf32> to vector<2x8xf32>
    %8 = vector.shape_cast %7 : vector<2x8xf32> to vector<2x8x1xf32>
    %cst_13 = arith.constant 3.200000e+01 : f32
    %9 = vector.broadcast %cst_13 : f32 to vector<2x8x1xf32>
    %10 = arith.divf %8, %9 : vector<2x8x1xf32>
    %11 = vector.broadcast %10 : vector<2x8x1xf32> to vector<2x8x32xf32>
    %12 = arith.subf %2, %11 : vector<2x8x32xf32>
    %13 = arith.mulf %12, %12 : vector<2x8x32xf32>
    %cst_14 = arith.constant dense<0.000000e+00> : vector<2x8xf32>
    %14 = vector.multi_reduction <add>, %13, %cst_14 [2] : vector<2x8x32xf32> to vector<2x8xf32>
    %15 = vector.shape_cast %14 : vector<2x8xf32> to vector<2x8x1xf32>
    %cst_15 = arith.constant 3.200000e+01 : f32
    %16 = vector.broadcast %cst_15 : f32 to vector<2x8x1xf32>
    %17 = arith.divf %15, %16 : vector<2x8x1xf32>
    %18 = vector.broadcast %10 : vector<2x8x1xf32> to vector<2x8x32xf32>
    %19 = arith.subf %2, %18 : vector<2x8x32xf32>
    %cst_16 = arith.constant 9.99999974E-6 : f32
    %20 = vector.broadcast %cst_16 : f32 to vector<2x8x1xf32>
    %21 = arith.addf %17, %20 : vector<2x8x1xf32>
    %22 = math.rsqrt %21 : vector<2x8x1xf32>
    %23 = vector.broadcast %22 : vector<2x8x1xf32> to vector<2x8x32xf32>
    %24 = arith.mulf %19, %23 : vector<2x8x32xf32>
    %25 = vector.shape_cast %4 : vector<1x32xf32> to vector<1x1x32xf32>
    %26 = vector.broadcast %25 : vector<1x1x32xf32> to vector<2x8x32xf32>
    %27 = arith.mulf %24, %26 : vector<2x8x32xf32>
    %28 = vector.shape_cast %6 : vector<1x32xf32> to vector<1x1x32xf32>
    %29 = vector.broadcast %28 : vector<1x1x32xf32> to vector<2x8x32xf32>
    %30 = arith.addf %27, %29 : vector<2x8x32xf32>
    %c0_17 = arith.constant 0 : index
    %c0_18 = arith.constant 0 : index
    %c0_19 = arith.constant 0 : index
    %c0_20 = arith.constant 0 : index
    %c0_21 = arith.constant 0 : index
    %31 = vector.load %arg5[%c0_17, %c0_18, %c0_19, %c0_20, %c0_21] : memref<2x2x24x32x8xbf16, #tpu.memory_space<vmem>>, vector<1x1x24x32x8xbf16>
    %32 = vector.shape_cast %31 : vector<1x1x24x32x8xbf16> to vector<24x32x8xbf16>
    %33 = arith.truncf %30 : vector<2x8x32xf32> to vector<2x8x32xbf16>
    %34 = vector.shape_cast %33 : vector<2x8x32xbf16> to vector<2x1x8x32xbf16>
    %35 = vector.shape_cast %34 : vector<2x1x8x32xbf16> to vector<2x1x8x32xbf16>
    %36 = vector.broadcast %35 : vector<2x1x8x32xbf16> to vector<2x4x8x32xbf16>
    %37 = vector.shape_cast %36 : vector<2x4x8x32xbf16> to vector<8x8x32xbf16>
    %38 = tpu.concatenate %37, %37, %37 in 0 : vector<8x8x32xbf16>, vector<8x8x32xbf16>, vector<8x8x32xbf16> -> vector<24x8x32xbf16>
    %cst_22 = arith.constant dense<0.000000e+00> : vector<24x8x8xf32>
    %39 = tpu.matmul %38, %32, %cst_22 {dimension_numbers = #tpu.dot_dimension_numbers<[2], [1], [1], [2], [0, 0, 0, 1, 1, 2], [0], [0]>} : vector<24x8x32xbf16>, vector<24x32x8xbf16>, vector<24x8x8xf32> -> vector<24x8x8xf32>
    %40 = vector.extract_strided_slice %39 {offsets = [0, 0, 0], sizes = [8, 8, 8], strides = [1, 1, 1]} : vector<24x8x8xf32> to vector<8x8x8xf32>
    %41 = vector.extract_strided_slice %39 {offsets = [8, 0, 0], sizes = [8, 8, 8], strides = [1, 1, 1]} : vector<24x8x8xf32> to vector<8x8x8xf32>
    %42 = vector.extract_strided_slice %39 {offsets = [16, 0, 0], sizes = [8, 8, 8], strides = [1, 1, 1]} : vector<24x8x8xf32> to vector<8x8x8xf32>
    %43 = vector.extract_strided_slice %40 {offsets = [4, 0, 0], sizes = [4, 8, 8], strides = [1, 1, 1]} : vector<8x8x8xf32> to vector<4x8x8xf32>
    %44 = vector.extract_strided_slice %40 {offsets = [0, 0, 0], sizes = [4, 8, 8], strides = [1, 1, 1]} : vector<8x8x8xf32> to vector<4x8x8xf32>
    %45 = tpu.concatenate %43, %44 in 0 : vector<4x8x8xf32>, vector<4x8x8xf32> -> vector<8x8x8xf32>
    %c0_23 = arith.constant 0 : index
    %c0_24 = arith.constant 0 : index
    %c0_25 = arith.constant 0 : index
    %c0_26 = arith.constant 0 : index
    %c0_27 = arith.constant 0 : index
    %46 = vector.load %arg6[%c0_23, %c0_24, %c0_25, %c0_26, %c0_27] : memref<2x2x8x8x32xbf16, #tpu.memory_space<vmem>>, vector<1x1x8x8x32xbf16>
    %47 = vector.shape_cast %46 : vector<1x1x8x8x32xbf16> to vector<8x8x32xbf16>
    %c0_28 = arith.constant 0 : index
    %c0_29 = arith.constant 0 : index
    %c0_30 = arith.constant 0 : index
    %c0_31 = arith.constant 0 : index
    %c0_32 = arith.constant 0 : index
    %48 = vector.load %arg7[%c0_28, %c0_29, %c0_30, %c0_31, %c0_32] : memref<2x2x2x1x32xf32, #tpu.memory_space<vmem>>, vector<1x1x2x1x32xf32>
    %49 = vector.shape_cast %48 : vector<1x1x2x1x32xf32> to vector<2x1x32xf32>
    %50 = arith.truncf %45 : vector<8x8x8xf32> to vector<8x8x8xbf16>
    %51 = arith.truncf %41 : vector<8x8x8xf32> to vector<8x8x8xbf16>
    %cst_33 = arith.constant dense<0.000000e+00> : vector<8x8x8xf32>
    %52 = tpu.matmul %50, %51, %cst_33 {dimension_numbers = #tpu.dot_dimension_numbers<[2], [2], [1], [1], [0, 0, 0, 1, 1, 1], [0], [0]>} : vector<8x8x8xbf16>, vector<8x8x8xbf16>, vector<8x8x8xf32> -> vector<8x8x8xf32>
    %cst_34 = arith.constant 0.353553385 : f32
    %53 = vector.broadcast %cst_34 : f32 to vector<8x8x8xf32>
    %54 = arith.mulf %52, %53 : vector<8x8x8xf32>
    %cst_35 = arith.constant dense<0xFF800000> : vector<8x8xf32>
    %55 = vector.multi_reduction <maximumf>, %54, %cst_35 [2] : vector<8x8x8xf32> to vector<8x8xf32>
    %56 = vector.shape_cast %55 : vector<8x8xf32> to vector<8x8x1xf32>
    %57 = vector.broadcast %56 : vector<8x8x1xf32> to vector<8x8x8xf32>
    %58 = arith.subf %54, %57 : vector<8x8x8xf32>
    %59 = math.exp %58 : vector<8x8x8xf32>
    %cst_36 = arith.constant dense<0.000000e+00> : vector<8x8xf32>
    %60 = vector.multi_reduction <add>, %59, %cst_36 [2] : vector<8x8x8xf32> to vector<8x8xf32>
    %61 = vector.shape_cast %60 : vector<8x8xf32> to vector<8x8x1xf32>
    %62 = tpu.reciprocal %61 {approx = true} : vector<8x8x1xf32> -> vector<8x8x1xf32>
    %63 = vector.broadcast %62 : vector<8x8x1xf32> to vector<8x8x8xf32>
    %64 = arith.mulf %59, %63 : vector<8x8x8xf32>
    %65 = arith.truncf %64 : vector<8x8x8xf32> to vector<8x8x8xbf16>
    %66 = arith.truncf %42 : vector<8x8x8xf32> to vector<8x8x8xbf16>
    %cst_37 = arith.constant dense<0.000000e+00> : vector<8x8x8xf32>
    %67 = tpu.matmul %65, %66, %cst_37 {dimension_numbers = #tpu.dot_dimension_numbers<[2], [1], [1], [2], [0, 0, 0, 1, 1, 2], [0], [0]>} : vector<8x8x8xbf16>, vector<8x8x8xbf16>, vector<8x8x8xf32> -> vector<8x8x8xf32>
    %68 = arith.truncf %67 : vector<8x8x8xf32> to vector<8x8x8xbf16>
    %cst_38 = arith.constant dense<0.000000e+00> : vector<8x8x32xf32>
    %69 = tpu.matmul %68, %47, %cst_38 {dimension_numbers = #tpu.dot_dimension_numbers<[2], [1], [1], [2], [0, 0, 0, 1, 1, 2], [0], [0]>} : vector<8x8x8xbf16>, vector<8x8x32xbf16>, vector<8x8x32xf32> -> vector<8x8x32xf32>
    %70 = vector.shape_cast %69 : vector<8x8x32xf32> to vector<2x4x8x32xf32>
    %cst_39 = arith.constant dense<0.000000e+00> : vector<2x8x32xf32>
    %71 = vector.multi_reduction <add>, %70, %cst_39 [1] : vector<2x4x8x32xf32> to vector<2x8x32xf32>
    %72 = vector.broadcast %49 : vector<2x1x32xf32> to vector<2x8x32xf32>
    %73 = arith.addf %71, %72 : vector<2x8x32xf32>
    %74 = arith.addf %2, %73 : vector<2x8x32xf32>
    %c0_40 = arith.constant 0 : index
    %c1 = arith.constant 1 : index
    %c0_41 = arith.constant 0 : index
    %c0_42 = arith.constant 0 : index
    %75 = vector.load %arg3[%c0_40, %c1, %c0_41, %c0_42] : memref<2x5x1x32xf32, #tpu.memory_space<vmem>>, vector<1x2x1x32xf32>
    %76 = vector.shape_cast %75 : vector<1x2x1x32xf32> to vector<2x1x32xf32>
    %c0_43 = arith.constant 0 : index
    %c1_44 = arith.constant 1 : index
    %c0_45 = arith.constant 0 : index
    %c0_46 = arith.constant 0 : index
    %77 = vector.load %arg4[%c0_43, %c1_44, %c0_45, %c0_46] : memref<2x5x1x32xf32, #tpu.memory_space<vmem>>, vector<1x2x1x32xf32>
    %78 = vector.shape_cast %77 : vector<1x2x1x32xf32> to vector<2x1x32xf32>
    %cst_47 = arith.constant dense<0.000000e+00> : vector<2x8xf32>
    %79 = vector.multi_reduction <add>, %74, %cst_47 [2] : vector<2x8x32xf32> to vector<2x8xf32>
    %80 = vector.shape_cast %79 : vector<2x8xf32> to vector<2x8x1xf32>
    %cst_48 = arith.constant 3.200000e+01 : f32
    %81 = vector.broadcast %cst_48 : f32 to vector<2x8x1xf32>
    %82 = arith.divf %80, %81 : vector<2x8x1xf32>
    %83 = vector.broadcast %82 : vector<2x8x1xf32> to vector<2x8x32xf32>
    %84 = arith.subf %74, %83 : vector<2x8x32xf32>
    %85 = arith.mulf %84, %84 : vector<2x8x32xf32>
    %cst_49 = arith.constant dense<0.000000e+00> : vector<2x8xf32>
    %86 = vector.multi_reduction <add>, %85, %cst_49 [2] : vector<2x8x32xf32> to vector<2x8xf32>
    %87 = vector.shape_cast %86 : vector<2x8xf32> to vector<2x8x1xf32>
    %cst_50 = arith.constant 3.200000e+01 : f32
    %88 = vector.broadcast %cst_50 : f32 to vector<2x8x1xf32>
    %89 = arith.divf %87, %88 : vector<2x8x1xf32>
    %90 = vector.broadcast %82 : vector<2x8x1xf32> to vector<2x8x32xf32>
    %91 = arith.subf %74, %90 : vector<2x8x32xf32>
    %cst_51 = arith.constant 9.99999974E-6 : f32
    %92 = vector.broadcast %cst_51 : f32 to vector<2x8x1xf32>
    %93 = arith.addf %89, %92 : vector<2x8x1xf32>
    %94 = math.rsqrt %93 : vector<2x8x1xf32>
    %95 = vector.broadcast %94 : vector<2x8x1xf32> to vector<2x8x32xf32>
    %96 = arith.mulf %91, %95 : vector<2x8x32xf32>
    %97 = vector.broadcast %76 : vector<2x1x32xf32> to vector<2x8x32xf32>
    %98 = arith.mulf %96, %97 : vector<2x8x32xf32>
    %99 = vector.broadcast %78 : vector<2x1x32xf32> to vector<2x8x32xf32>
    %100 = arith.addf %98, %99 : vector<2x8x32xf32>
    %c0_52 = arith.constant 0 : index
    %c1_53 = arith.constant 1 : index
    %c0_54 = arith.constant 0 : index
    %c0_55 = arith.constant 0 : index
    %c0_56 = arith.constant 0 : index
    %101 = vector.load %arg5[%c0_52, %c1_53, %c0_54, %c0_55, %c0_56] : memref<2x2x24x32x8xbf16, #tpu.memory_space<vmem>>, vector<1x1x24x32x8xbf16>
    %102 = vector.shape_cast %101 : vector<1x1x24x32x8xbf16> to vector<24x32x8xbf16>
    %103 = arith.truncf %100 : vector<2x8x32xf32> to vector<2x8x32xbf16>
    %104 = vector.shape_cast %103 : vector<2x8x32xbf16> to vector<2x1x8x32xbf16>
    %105 = vector.shape_cast %104 : vector<2x1x8x32xbf16> to vector<2x1x8x32xbf16>
    %106 = vector.broadcast %105 : vector<2x1x8x32xbf16> to vector<2x4x8x32xbf16>
    %107 = vector.shape_cast %106 : vector<2x4x8x32xbf16> to vector<8x8x32xbf16>
    %108 = tpu.concatenate %107, %107, %107 in 0 : vector<8x8x32xbf16>, vector<8x8x32xbf16>, vector<8x8x32xbf16> -> vector<24x8x32xbf16>
    %cst_57 = arith.constant dense<0.000000e+00> : vector<24x8x8xf32>
    %109 = tpu.matmul %108, %102, %cst_57 {dimension_numbers = #tpu.dot_dimension_numbers<[2], [1], [1], [2], [0, 0, 0, 1, 1, 2], [0], [0]>} : vector<24x8x32xbf16>, vector<24x32x8xbf16>, vector<24x8x8xf32> -> vector<24x8x8xf32>
    %110 = vector.extract_strided_slice %109 {offsets = [0, 0, 0], sizes = [8, 8, 8], strides = [1, 1, 1]} : vector<24x8x8xf32> to vector<8x8x8xf32>
    %111 = vector.extract_strided_slice %109 {offsets = [8, 0, 0], sizes = [8, 8, 8], strides = [1, 1, 1]} : vector<24x8x8xf32> to vector<8x8x8xf32>
    %112 = vector.extract_strided_slice %109 {offsets = [16, 0, 0], sizes = [8, 8, 8], strides = [1, 1, 1]} : vector<24x8x8xf32> to vector<8x8x8xf32>
    %c0_58 = arith.constant 0 : index
    %c1_59 = arith.constant 1 : index
    %c0_60 = arith.constant 0 : index
    %c0_61 = arith.constant 0 : index
    %c0_62 = arith.constant 0 : index
    %113 = vector.load %arg6[%c0_58, %c1_59, %c0_60, %c0_61, %c0_62] : memref<2x2x8x8x32xbf16, #tpu.memory_space<vmem>>, vector<1x1x8x8x32xbf16>
    %114 = vector.shape_cast %113 : vector<1x1x8x8x32xbf16> to vector<8x8x32xbf16>
    %c0_63 = arith.constant 0 : index
    %c1_64 = arith.constant 1 : index
    %c0_65 = arith.constant 0 : index
    %c0_66 = arith.constant 0 : index
    %c0_67 = arith.constant 0 : index
    %115 = vector.load %arg7[%c0_63, %c1_64, %c0_65, %c0_66, %c0_67] : memref<2x2x2x1x32xf32, #tpu.memory_space<vmem>>, vector<1x1x2x1x32xf32>
    %116 = vector.shape_cast %115 : vector<1x1x2x1x32xf32> to vector<2x1x32xf32>
    %117 = arith.truncf %110 : vector<8x8x8xf32> to vector<8x8x8xbf16>
    %118 = arith.truncf %111 : vector<8x8x8xf32> to vector<8x8x8xbf16>
    %cst_68 = arith.constant dense<0.000000e+00> : vector<8x8x8xf32>
    %119 = tpu.matmul %117, %118, %cst_68 {dimension_numbers = #tpu.dot_dimension_numbers<[2], [2], [1], [1], [0, 0, 0, 1, 1, 1], [0], [0]>} : vector<8x8x8xbf16>, vector<8x8x8xbf16>, vector<8x8x8xf32> -> vector<8x8x8xf32>
    %cst_69 = arith.constant 0.353553385 : f32
    %120 = vector.broadcast %cst_69 : f32 to vector<8x8x8xf32>
    %121 = arith.mulf %119, %120 : vector<8x8x8xf32>
    %cst_70 = arith.constant dense<0xFF800000> : vector<8x8xf32>
    %122 = vector.multi_reduction <maximumf>, %121, %cst_70 [2] : vector<8x8x8xf32> to vector<8x8xf32>
    %123 = vector.shape_cast %122 : vector<8x8xf32> to vector<8x8x1xf32>
    %124 = vector.broadcast %123 : vector<8x8x1xf32> to vector<8x8x8xf32>
    %125 = arith.subf %121, %124 : vector<8x8x8xf32>
    %126 = math.exp %125 : vector<8x8x8xf32>
    %cst_71 = arith.constant dense<0.000000e+00> : vector<8x8xf32>
    %127 = vector.multi_reduction <add>, %126, %cst_71 [2] : vector<8x8x8xf32> to vector<8x8xf32>
    %128 = vector.shape_cast %127 : vector<8x8xf32> to vector<8x8x1xf32>
    %129 = tpu.reciprocal %128 {approx = true} : vector<8x8x1xf32> -> vector<8x8x1xf32>
    %130 = vector.broadcast %129 : vector<8x8x1xf32> to vector<8x8x8xf32>
    %131 = arith.mulf %126, %130 : vector<8x8x8xf32>
    %132 = arith.truncf %131 : vector<8x8x8xf32> to vector<8x8x8xbf16>
    %133 = arith.truncf %112 : vector<8x8x8xf32> to vector<8x8x8xbf16>
    %cst_72 = arith.constant dense<0.000000e+00> : vector<8x8x8xf32>
    %134 = tpu.matmul %132, %133, %cst_72 {dimension_numbers = #tpu.dot_dimension_numbers<[2], [1], [1], [2], [0, 0, 0, 1, 1, 2], [0], [0]>} : vector<8x8x8xbf16>, vector<8x8x8xbf16>, vector<8x8x8xf32> -> vector<8x8x8xf32>
    %135 = arith.truncf %134 : vector<8x8x8xf32> to vector<8x8x8xbf16>
    %cst_73 = arith.constant dense<0.000000e+00> : vector<8x8x32xf32>
    %136 = tpu.matmul %135, %114, %cst_73 {dimension_numbers = #tpu.dot_dimension_numbers<[2], [1], [1], [2], [0, 0, 0, 1, 1, 2], [0], [0]>} : vector<8x8x8xbf16>, vector<8x8x32xbf16>, vector<8x8x32xf32> -> vector<8x8x32xf32>
    %137 = vector.shape_cast %136 : vector<8x8x32xf32> to vector<2x4x8x32xf32>
    %cst_74 = arith.constant dense<0.000000e+00> : vector<2x8x32xf32>
    %138 = vector.multi_reduction <add>, %137, %cst_74 [1] : vector<2x4x8x32xf32> to vector<2x8x32xf32>
    %139 = vector.broadcast %116 : vector<2x1x32xf32> to vector<2x8x32xf32>
    %140 = arith.addf %138, %139 : vector<2x8x32xf32>
    %141 = arith.addf %74, %140 : vector<2x8x32xf32>
    %c0_75 = arith.constant 0 : index
    %c3 = arith.constant 3 : index
    %c0_76 = arith.constant 0 : index
    %c0_77 = arith.constant 0 : index
    %142 = vector.load %arg3[%c0_75, %c3, %c0_76, %c0_77] : memref<2x5x1x32xf32, #tpu.memory_space<vmem>>, vector<1x2x1x32xf32>
    %143 = vector.shape_cast %142 : vector<1x2x1x32xf32> to vector<2x1x32xf32>
    %c0_78 = arith.constant 0 : index
    %c3_79 = arith.constant 3 : index
    %c0_80 = arith.constant 0 : index
    %c0_81 = arith.constant 0 : index
    %144 = vector.load %arg4[%c0_78, %c3_79, %c0_80, %c0_81] : memref<2x5x1x32xf32, #tpu.memory_space<vmem>>, vector<1x2x1x32xf32>
    %145 = vector.shape_cast %144 : vector<1x2x1x32xf32> to vector<2x1x32xf32>
    %c0_82 = arith.constant 0 : index
    %c0_83 = arith.constant 0 : index
    %c0_84 = arith.constant 0 : index
    %c0_85 = arith.constant 0 : index
    %146 = vector.load %arg8[%c0_82, %c0_83, %c0_84, %c0_85] : memref<2x2x32x64xbf16, #tpu.memory_space<vmem>>, vector<1x2x32x64xbf16>
    %147 = vector.shape_cast %146 : vector<1x2x32x64xbf16> to vector<2x32x64xbf16>
    %c0_86 = arith.constant 0 : index
    %c0_87 = arith.constant 0 : index
    %c0_88 = arith.constant 0 : index
    %c0_89 = arith.constant 0 : index
    %148 = vector.load %arg9[%c0_86, %c0_87, %c0_88, %c0_89] : memref<2x2x1x64xf32, #tpu.memory_space<vmem>>, vector<1x2x1x64xf32>
    %149 = vector.shape_cast %148 : vector<1x2x1x64xf32> to vector<2x1x64xf32>
    %c0_90 = arith.constant 0 : index
    %c0_91 = arith.constant 0 : index
    %c0_92 = arith.constant 0 : index
    %c0_93 = arith.constant 0 : index
    %150 = vector.load %arg10[%c0_90, %c0_91, %c0_92, %c0_93] : memref<2x2x64x32xbf16, #tpu.memory_space<vmem>>, vector<1x2x64x32xbf16>
    %151 = vector.shape_cast %150 : vector<1x2x64x32xbf16> to vector<2x64x32xbf16>
    %c0_94 = arith.constant 0 : index
    %c0_95 = arith.constant 0 : index
    %c0_96 = arith.constant 0 : index
    %c0_97 = arith.constant 0 : index
    %152 = vector.load %arg11[%c0_94, %c0_95, %c0_96, %c0_97] : memref<2x2x1x32xf32, #tpu.memory_space<vmem>>, vector<1x2x1x32xf32>
    %153 = vector.shape_cast %152 : vector<1x2x1x32xf32> to vector<2x1x32xf32>
    %cst_98 = arith.constant dense<0.000000e+00> : vector<2x8xf32>
    %154 = vector.multi_reduction <add>, %141, %cst_98 [2] : vector<2x8x32xf32> to vector<2x8xf32>
    %155 = vector.shape_cast %154 : vector<2x8xf32> to vector<2x8x1xf32>
    %cst_99 = arith.constant 3.200000e+01 : f32
    %156 = vector.broadcast %cst_99 : f32 to vector<2x8x1xf32>
    %157 = arith.divf %155, %156 : vector<2x8x1xf32>
    %158 = vector.broadcast %157 : vector<2x8x1xf32> to vector<2x8x32xf32>
    %159 = arith.subf %141, %158 : vector<2x8x32xf32>
    %160 = arith.mulf %159, %159 : vector<2x8x32xf32>
    %cst_100 = arith.constant dense<0.000000e+00> : vector<2x8xf32>
    %161 = vector.multi_reduction <add>, %160, %cst_100 [2] : vector<2x8x32xf32> to vector<2x8xf32>
    %162 = vector.shape_cast %161 : vector<2x8xf32> to vector<2x8x1xf32>
    %cst_101 = arith.constant 3.200000e+01 : f32
    %163 = vector.broadcast %cst_101 : f32 to vector<2x8x1xf32>
    %164 = arith.divf %162, %163 : vector<2x8x1xf32>
    %165 = vector.broadcast %157 : vector<2x8x1xf32> to vector<2x8x32xf32>
    %166 = arith.subf %141, %165 : vector<2x8x32xf32>
    %cst_102 = arith.constant 9.99999974E-6 : f32
    %167 = vector.broadcast %cst_102 : f32 to vector<2x8x1xf32>
    %168 = arith.addf %164, %167 : vector<2x8x1xf32>
    %169 = math.rsqrt %168 : vector<2x8x1xf32>
    %170 = vector.broadcast %169 : vector<2x8x1xf32> to vector<2x8x32xf32>
    %171 = arith.mulf %166, %170 : vector<2x8x32xf32>
    %172 = vector.broadcast %143 : vector<2x1x32xf32> to vector<2x8x32xf32>
    %173 = arith.mulf %171, %172 : vector<2x8x32xf32>
    %174 = vector.broadcast %145 : vector<2x1x32xf32> to vector<2x8x32xf32>
    %175 = arith.addf %173, %174 : vector<2x8x32xf32>
    %176 = arith.truncf %175 : vector<2x8x32xf32> to vector<2x8x32xbf16>
    %cst_103 = arith.constant dense<0.000000e+00> : vector<2x8x64xf32>
    %177 = tpu.matmul %176, %147, %cst_103 {dimension_numbers = #tpu.dot_dimension_numbers<[2], [1], [1], [2], [0, 0, 0, 1, 1, 2], [0], [0]>} : vector<2x8x32xbf16>, vector<2x32x64xbf16>, vector<2x8x64xf32> -> vector<2x8x64xf32>
    %178 = vector.broadcast %149 : vector<2x1x64xf32> to vector<2x8x64xf32>
    %179 = arith.addf %177, %178 : vector<2x8x64xf32>
    %cst_104 = arith.constant 5.000000e-01 : f32
    %180 = vector.broadcast %cst_104 : f32 to vector<2x8x64xf32>
    %181 = arith.mulf %180, %179 : vector<2x8x64xf32>
    %cst_105 = arith.constant 0.707106769 : f32
    %182 = vector.broadcast %cst_105 : f32 to vector<2x8x64xf32>
    %183 = arith.mulf %179, %182 : vector<2x8x64xf32>
    %184 = math.erf %183 : vector<2x8x64xf32>
    %cst_106 = arith.constant 1.000000e+00 : f32
    %185 = vector.broadcast %cst_106 : f32 to vector<2x8x64xf32>
    %186 = arith.addf %185, %184 : vector<2x8x64xf32>
    %187 = arith.mulf %181, %186 : vector<2x8x64xf32>
    %188 = arith.truncf %187 : vector<2x8x64xf32> to vector<2x8x64xbf16>
    %cst_107 = arith.constant dense<0.000000e+00> : vector<2x8x32xf32>
    %189 = tpu.matmul %188, %151, %cst_107 {dimension_numbers = #tpu.dot_dimension_numbers<[2], [1], [1], [2], [0, 0, 0, 1, 1, 2], [0], [0]>} : vector<2x8x64xbf16>, vector<2x64x32xbf16>, vector<2x8x32xf32> -> vector<2x8x32xf32>
    %190 = vector.broadcast %153 : vector<2x1x32xf32> to vector<2x8x32xf32>
    %191 = arith.addf %189, %190 : vector<2x8x32xf32>
    %192 = arith.addf %141, %191 : vector<2x8x32xf32>
    %c1_108 = arith.constant 1 : index
    %c0_109 = arith.constant 0 : index
    %c0_110 = arith.constant 0 : index
    %c0_111 = arith.constant 0 : index
    %193 = vector.load %arg3[%c1_108, %c0_109, %c0_110, %c0_111] : memref<2x5x1x32xf32, #tpu.memory_space<vmem>>, vector<1x1x1x32xf32>
    %194 = vector.shape_cast %193 : vector<1x1x1x32xf32> to vector<1x32xf32>
    %c1_112 = arith.constant 1 : index
    %c0_113 = arith.constant 0 : index
    %c0_114 = arith.constant 0 : index
    %c0_115 = arith.constant 0 : index
    %195 = vector.load %arg4[%c1_112, %c0_113, %c0_114, %c0_115] : memref<2x5x1x32xf32, #tpu.memory_space<vmem>>, vector<1x1x1x32xf32>
    %196 = vector.shape_cast %195 : vector<1x1x1x32xf32> to vector<1x32xf32>
    %cst_116 = arith.constant dense<0.000000e+00> : vector<2x8xf32>
    %197 = vector.multi_reduction <add>, %192, %cst_116 [2] : vector<2x8x32xf32> to vector<2x8xf32>
    %198 = vector.shape_cast %197 : vector<2x8xf32> to vector<2x8x1xf32>
    %cst_117 = arith.constant 3.200000e+01 : f32
    %199 = vector.broadcast %cst_117 : f32 to vector<2x8x1xf32>
    %200 = arith.divf %198, %199 : vector<2x8x1xf32>
    %201 = vector.broadcast %200 : vector<2x8x1xf32> to vector<2x8x32xf32>
    %202 = arith.subf %192, %201 : vector<2x8x32xf32>
    %203 = arith.mulf %202, %202 : vector<2x8x32xf32>
    %cst_118 = arith.constant dense<0.000000e+00> : vector<2x8xf32>
    %204 = vector.multi_reduction <add>, %203, %cst_118 [2] : vector<2x8x32xf32> to vector<2x8xf32>
    %205 = vector.shape_cast %204 : vector<2x8xf32> to vector<2x8x1xf32>
    %cst_119 = arith.constant 3.200000e+01 : f32
    %206 = vector.broadcast %cst_119 : f32 to vector<2x8x1xf32>
    %207 = arith.divf %205, %206 : vector<2x8x1xf32>
    %208 = vector.broadcast %200 : vector<2x8x1xf32> to vector<2x8x32xf32>
    %209 = arith.subf %192, %208 : vector<2x8x32xf32>
    %cst_120 = arith.constant 9.99999974E-6 : f32
    %210 = vector.broadcast %cst_120 : f32 to vector<2x8x1xf32>
    %211 = arith.addf %207, %210 : vector<2x8x1xf32>
    %212 = math.rsqrt %211 : vector<2x8x1xf32>
    %213 = vector.broadcast %212 : vector<2x8x1xf32> to vector<2x8x32xf32>
    %214 = arith.mulf %209, %213 : vector<2x8x32xf32>
    %215 = vector.shape_cast %194 : vector<1x32xf32> to vector<1x1x32xf32>
    %216 = vector.broadcast %215 : vector<1x1x32xf32> to vector<2x8x32xf32>
    %217 = arith.mulf %214, %216 : vector<2x8x32xf32>
    %218 = vector.shape_cast %196 : vector<1x32xf32> to vector<1x1x32xf32>
    %219 = vector.broadcast %218 : vector<1x1x32xf32> to vector<2x8x32xf32>
    %220 = arith.addf %217, %219 : vector<2x8x32xf32>
    %c1_121 = arith.constant 1 : index
    %c0_122 = arith.constant 0 : index
    %c0_123 = arith.constant 0 : index
    %c0_124 = arith.constant 0 : index
    %c0_125 = arith.constant 0 : index
    %221 = vector.load %arg5[%c1_121, %c0_122, %c0_123, %c0_124, %c0_125] : memref<2x2x24x32x8xbf16, #tpu.memory_space<vmem>>, vector<1x1x24x32x8xbf16>
    %222 = vector.shape_cast %221 : vector<1x1x24x32x8xbf16> to vector<24x32x8xbf16>
    %223 = arith.truncf %220 : vector<2x8x32xf32> to vector<2x8x32xbf16>
    %224 = vector.shape_cast %223 : vector<2x8x32xbf16> to vector<2x1x8x32xbf16>
    %225 = vector.shape_cast %224 : vector<2x1x8x32xbf16> to vector<2x1x8x32xbf16>
    %226 = vector.broadcast %225 : vector<2x1x8x32xbf16> to vector<2x4x8x32xbf16>
    %227 = vector.shape_cast %226 : vector<2x4x8x32xbf16> to vector<8x8x32xbf16>
    %228 = tpu.concatenate %227, %227, %227 in 0 : vector<8x8x32xbf16>, vector<8x8x32xbf16>, vector<8x8x32xbf16> -> vector<24x8x32xbf16>
    %cst_126 = arith.constant dense<0.000000e+00> : vector<24x8x8xf32>
    %229 = tpu.matmul %228, %222, %cst_126 {dimension_numbers = #tpu.dot_dimension_numbers<[2], [1], [1], [2], [0, 0, 0, 1, 1, 2], [0], [0]>} : vector<24x8x32xbf16>, vector<24x32x8xbf16>, vector<24x8x8xf32> -> vector<24x8x8xf32>
    %230 = vector.extract_strided_slice %229 {offsets = [0, 0, 0], sizes = [8, 8, 8], strides = [1, 1, 1]} : vector<24x8x8xf32> to vector<8x8x8xf32>
    %231 = vector.extract_strided_slice %229 {offsets = [8, 0, 0], sizes = [8, 8, 8], strides = [1, 1, 1]} : vector<24x8x8xf32> to vector<8x8x8xf32>
    %232 = vector.extract_strided_slice %229 {offsets = [16, 0, 0], sizes = [8, 8, 8], strides = [1, 1, 1]} : vector<24x8x8xf32> to vector<8x8x8xf32>
    %233 = vector.extract_strided_slice %230 {offsets = [4, 0, 0], sizes = [4, 8, 8], strides = [1, 1, 1]} : vector<8x8x8xf32> to vector<4x8x8xf32>
    %234 = vector.extract_strided_slice %230 {offsets = [0, 0, 0], sizes = [4, 8, 8], strides = [1, 1, 1]} : vector<8x8x8xf32> to vector<4x8x8xf32>
    %235 = tpu.concatenate %233, %234 in 0 : vector<4x8x8xf32>, vector<4x8x8xf32> -> vector<8x8x8xf32>
    %c1_127 = arith.constant 1 : index
    %c0_128 = arith.constant 0 : index
    %c0_129 = arith.constant 0 : index
    %c0_130 = arith.constant 0 : index
    %c0_131 = arith.constant 0 : index
    %236 = vector.load %arg6[%c1_127, %c0_128, %c0_129, %c0_130, %c0_131] : memref<2x2x8x8x32xbf16, #tpu.memory_space<vmem>>, vector<1x1x8x8x32xbf16>
    %237 = vector.shape_cast %236 : vector<1x1x8x8x32xbf16> to vector<8x8x32xbf16>
    %c1_132 = arith.constant 1 : index
    %c0_133 = arith.constant 0 : index
    %c0_134 = arith.constant 0 : index
    %c0_135 = arith.constant 0 : index
    %c0_136 = arith.constant 0 : index
    %238 = vector.load %arg7[%c1_132, %c0_133, %c0_134, %c0_135, %c0_136] : memref<2x2x2x1x32xf32, #tpu.memory_space<vmem>>, vector<1x1x2x1x32xf32>
    %239 = vector.shape_cast %238 : vector<1x1x2x1x32xf32> to vector<2x1x32xf32>
    %240 = arith.truncf %235 : vector<8x8x8xf32> to vector<8x8x8xbf16>
    %241 = arith.truncf %231 : vector<8x8x8xf32> to vector<8x8x8xbf16>
    %cst_137 = arith.constant dense<0.000000e+00> : vector<8x8x8xf32>
    %242 = tpu.matmul %240, %241, %cst_137 {dimension_numbers = #tpu.dot_dimension_numbers<[2], [2], [1], [1], [0, 0, 0, 1, 1, 1], [0], [0]>} : vector<8x8x8xbf16>, vector<8x8x8xbf16>, vector<8x8x8xf32> -> vector<8x8x8xf32>
    %cst_138 = arith.constant 0.353553385 : f32
    %243 = vector.broadcast %cst_138 : f32 to vector<8x8x8xf32>
    %244 = arith.mulf %242, %243 : vector<8x8x8xf32>
    %cst_139 = arith.constant dense<0xFF800000> : vector<8x8xf32>
    %245 = vector.multi_reduction <maximumf>, %244, %cst_139 [2] : vector<8x8x8xf32> to vector<8x8xf32>
    %246 = vector.shape_cast %245 : vector<8x8xf32> to vector<8x8x1xf32>
    %247 = vector.broadcast %246 : vector<8x8x1xf32> to vector<8x8x8xf32>
    %248 = arith.subf %244, %247 : vector<8x8x8xf32>
    %249 = math.exp %248 : vector<8x8x8xf32>
    %cst_140 = arith.constant dense<0.000000e+00> : vector<8x8xf32>
    %250 = vector.multi_reduction <add>, %249, %cst_140 [2] : vector<8x8x8xf32> to vector<8x8xf32>
    %251 = vector.shape_cast %250 : vector<8x8xf32> to vector<8x8x1xf32>
    %252 = tpu.reciprocal %251 {approx = true} : vector<8x8x1xf32> -> vector<8x8x1xf32>
    %253 = vector.broadcast %252 : vector<8x8x1xf32> to vector<8x8x8xf32>
    %254 = arith.mulf %249, %253 : vector<8x8x8xf32>
    %255 = arith.truncf %254 : vector<8x8x8xf32> to vector<8x8x8xbf16>
    %256 = arith.truncf %232 : vector<8x8x8xf32> to vector<8x8x8xbf16>
    %cst_141 = arith.constant dense<0.000000e+00> : vector<8x8x8xf32>
    %257 = tpu.matmul %255, %256, %cst_141 {dimension_numbers = #tpu.dot_dimension_numbers<[2], [1], [1], [2], [0, 0, 0, 1, 1, 2], [0], [0]>} : vector<8x8x8xbf16>, vector<8x8x8xbf16>, vector<8x8x8xf32> -> vector<8x8x8xf32>
    %258 = arith.truncf %257 : vector<8x8x8xf32> to vector<8x8x8xbf16>
    %cst_142 = arith.constant dense<0.000000e+00> : vector<8x8x32xf32>
    %259 = tpu.matmul %258, %237, %cst_142 {dimension_numbers = #tpu.dot_dimension_numbers<[2], [1], [1], [2], [0, 0, 0, 1, 1, 2], [0], [0]>} : vector<8x8x8xbf16>, vector<8x8x32xbf16>, vector<8x8x32xf32> -> vector<8x8x32xf32>
    %260 = vector.shape_cast %259 : vector<8x8x32xf32> to vector<2x4x8x32xf32>
    %cst_143 = arith.constant dense<0.000000e+00> : vector<2x8x32xf32>
    %261 = vector.multi_reduction <add>, %260, %cst_143 [1] : vector<2x4x8x32xf32> to vector<2x8x32xf32>
    %262 = vector.broadcast %239 : vector<2x1x32xf32> to vector<2x8x32xf32>
    %263 = arith.addf %261, %262 : vector<2x8x32xf32>
    %264 = arith.addf %192, %263 : vector<2x8x32xf32>
    %c1_144 = arith.constant 1 : index
    %c1_145 = arith.constant 1 : index
    %c0_146 = arith.constant 0 : index
    %c0_147 = arith.constant 0 : index
    %265 = vector.load %arg3[%c1_144, %c1_145, %c0_146, %c0_147] : memref<2x5x1x32xf32, #tpu.memory_space<vmem>>, vector<1x2x1x32xf32>
    %266 = vector.shape_cast %265 : vector<1x2x1x32xf32> to vector<2x1x32xf32>
    %c1_148 = arith.constant 1 : index
    %c1_149 = arith.constant 1 : index
    %c0_150 = arith.constant 0 : index
    %c0_151 = arith.constant 0 : index
    %267 = vector.load %arg4[%c1_148, %c1_149, %c0_150, %c0_151] : memref<2x5x1x32xf32, #tpu.memory_space<vmem>>, vector<1x2x1x32xf32>
    %268 = vector.shape_cast %267 : vector<1x2x1x32xf32> to vector<2x1x32xf32>
    %cst_152 = arith.constant dense<0.000000e+00> : vector<2x8xf32>
    %269 = vector.multi_reduction <add>, %264, %cst_152 [2] : vector<2x8x32xf32> to vector<2x8xf32>
    %270 = vector.shape_cast %269 : vector<2x8xf32> to vector<2x8x1xf32>
    %cst_153 = arith.constant 3.200000e+01 : f32
    %271 = vector.broadcast %cst_153 : f32 to vector<2x8x1xf32>
    %272 = arith.divf %270, %271 : vector<2x8x1xf32>
    %273 = vector.broadcast %272 : vector<2x8x1xf32> to vector<2x8x32xf32>
    %274 = arith.subf %264, %273 : vector<2x8x32xf32>
    %275 = arith.mulf %274, %274 : vector<2x8x32xf32>
    %cst_154 = arith.constant dense<0.000000e+00> : vector<2x8xf32>
    %276 = vector.multi_reduction <add>, %275, %cst_154 [2] : vector<2x8x32xf32> to vector<2x8xf32>
    %277 = vector.shape_cast %276 : vector<2x8xf32> to vector<2x8x1xf32>
    %cst_155 = arith.constant 3.200000e+01 : f32
    %278 = vector.broadcast %cst_155 : f32 to vector<2x8x1xf32>
    %279 = arith.divf %277, %278 : vector<2x8x1xf32>
    %280 = vector.broadcast %272 : vector<2x8x1xf32> to vector<2x8x32xf32>
    %281 = arith.subf %264, %280 : vector<2x8x32xf32>
    %cst_156 = arith.constant 9.99999974E-6 : f32
    %282 = vector.broadcast %cst_156 : f32 to vector<2x8x1xf32>
    %283 = arith.addf %279, %282 : vector<2x8x1xf32>
    %284 = math.rsqrt %283 : vector<2x8x1xf32>
    %285 = vector.broadcast %284 : vector<2x8x1xf32> to vector<2x8x32xf32>
    %286 = arith.mulf %281, %285 : vector<2x8x32xf32>
    %287 = vector.broadcast %266 : vector<2x1x32xf32> to vector<2x8x32xf32>
    %288 = arith.mulf %286, %287 : vector<2x8x32xf32>
    %289 = vector.broadcast %268 : vector<2x1x32xf32> to vector<2x8x32xf32>
    %290 = arith.addf %288, %289 : vector<2x8x32xf32>
    %c1_157 = arith.constant 1 : index
    %c1_158 = arith.constant 1 : index
    %c0_159 = arith.constant 0 : index
    %c0_160 = arith.constant 0 : index
    %c0_161 = arith.constant 0 : index
    %291 = vector.load %arg5[%c1_157, %c1_158, %c0_159, %c0_160, %c0_161] : memref<2x2x24x32x8xbf16, #tpu.memory_space<vmem>>, vector<1x1x24x32x8xbf16>
    %292 = vector.shape_cast %291 : vector<1x1x24x32x8xbf16> to vector<24x32x8xbf16>
    %293 = arith.truncf %290 : vector<2x8x32xf32> to vector<2x8x32xbf16>
    %294 = vector.shape_cast %293 : vector<2x8x32xbf16> to vector<2x1x8x32xbf16>
    %295 = vector.shape_cast %294 : vector<2x1x8x32xbf16> to vector<2x1x8x32xbf16>
    %296 = vector.broadcast %295 : vector<2x1x8x32xbf16> to vector<2x4x8x32xbf16>
    %297 = vector.shape_cast %296 : vector<2x4x8x32xbf16> to vector<8x8x32xbf16>
    %298 = tpu.concatenate %297, %297, %297 in 0 : vector<8x8x32xbf16>, vector<8x8x32xbf16>, vector<8x8x32xbf16> -> vector<24x8x32xbf16>
    %cst_162 = arith.constant dense<0.000000e+00> : vector<24x8x8xf32>
    %299 = tpu.matmul %298, %292, %cst_162 {dimension_numbers = #tpu.dot_dimension_numbers<[2], [1], [1], [2], [0, 0, 0, 1, 1, 2], [0], [0]>} : vector<24x8x32xbf16>, vector<24x32x8xbf16>, vector<24x8x8xf32> -> vector<24x8x8xf32>
    %300 = vector.extract_strided_slice %299 {offsets = [0, 0, 0], sizes = [8, 8, 8], strides = [1, 1, 1]} : vector<24x8x8xf32> to vector<8x8x8xf32>
    %301 = vector.extract_strided_slice %299 {offsets = [8, 0, 0], sizes = [8, 8, 8], strides = [1, 1, 1]} : vector<24x8x8xf32> to vector<8x8x8xf32>
    %302 = vector.extract_strided_slice %299 {offsets = [16, 0, 0], sizes = [8, 8, 8], strides = [1, 1, 1]} : vector<24x8x8xf32> to vector<8x8x8xf32>
    %c1_163 = arith.constant 1 : index
    %c1_164 = arith.constant 1 : index
    %c0_165 = arith.constant 0 : index
    %c0_166 = arith.constant 0 : index
    %c0_167 = arith.constant 0 : index
    %303 = vector.load %arg6[%c1_163, %c1_164, %c0_165, %c0_166, %c0_167] : memref<2x2x8x8x32xbf16, #tpu.memory_space<vmem>>, vector<1x1x8x8x32xbf16>
    %304 = vector.shape_cast %303 : vector<1x1x8x8x32xbf16> to vector<8x8x32xbf16>
    %c1_168 = arith.constant 1 : index
    %c1_169 = arith.constant 1 : index
    %c0_170 = arith.constant 0 : index
    %c0_171 = arith.constant 0 : index
    %c0_172 = arith.constant 0 : index
    %305 = vector.load %arg7[%c1_168, %c1_169, %c0_170, %c0_171, %c0_172] : memref<2x2x2x1x32xf32, #tpu.memory_space<vmem>>, vector<1x1x2x1x32xf32>
    %306 = vector.shape_cast %305 : vector<1x1x2x1x32xf32> to vector<2x1x32xf32>
    %307 = arith.truncf %300 : vector<8x8x8xf32> to vector<8x8x8xbf16>
    %308 = arith.truncf %301 : vector<8x8x8xf32> to vector<8x8x8xbf16>
    %cst_173 = arith.constant dense<0.000000e+00> : vector<8x8x8xf32>
    %309 = tpu.matmul %307, %308, %cst_173 {dimension_numbers = #tpu.dot_dimension_numbers<[2], [2], [1], [1], [0, 0, 0, 1, 1, 1], [0], [0]>} : vector<8x8x8xbf16>, vector<8x8x8xbf16>, vector<8x8x8xf32> -> vector<8x8x8xf32>
    %cst_174 = arith.constant 0.353553385 : f32
    %310 = vector.broadcast %cst_174 : f32 to vector<8x8x8xf32>
    %311 = arith.mulf %309, %310 : vector<8x8x8xf32>
    %cst_175 = arith.constant dense<0xFF800000> : vector<8x8xf32>
    %312 = vector.multi_reduction <maximumf>, %311, %cst_175 [2] : vector<8x8x8xf32> to vector<8x8xf32>
    %313 = vector.shape_cast %312 : vector<8x8xf32> to vector<8x8x1xf32>
    %314 = vector.broadcast %313 : vector<8x8x1xf32> to vector<8x8x8xf32>
    %315 = arith.subf %311, %314 : vector<8x8x8xf32>
    %316 = math.exp %315 : vector<8x8x8xf32>
    %cst_176 = arith.constant dense<0.000000e+00> : vector<8x8xf32>
    %317 = vector.multi_reduction <add>, %316, %cst_176 [2] : vector<8x8x8xf32> to vector<8x8xf32>
    %318 = vector.shape_cast %317 : vector<8x8xf32> to vector<8x8x1xf32>
    %319 = tpu.reciprocal %318 {approx = true} : vector<8x8x1xf32> -> vector<8x8x1xf32>
    %320 = vector.broadcast %319 : vector<8x8x1xf32> to vector<8x8x8xf32>
    %321 = arith.mulf %316, %320 : vector<8x8x8xf32>
    %322 = arith.truncf %321 : vector<8x8x8xf32> to vector<8x8x8xbf16>
    %323 = arith.truncf %302 : vector<8x8x8xf32> to vector<8x8x8xbf16>
    %cst_177 = arith.constant dense<0.000000e+00> : vector<8x8x8xf32>
    %324 = tpu.matmul %322, %323, %cst_177 {dimension_numbers = #tpu.dot_dimension_numbers<[2], [1], [1], [2], [0, 0, 0, 1, 1, 2], [0], [0]>} : vector<8x8x8xbf16>, vector<8x8x8xbf16>, vector<8x8x8xf32> -> vector<8x8x8xf32>
    %325 = arith.truncf %324 : vector<8x8x8xf32> to vector<8x8x8xbf16>
    %cst_178 = arith.constant dense<0.000000e+00> : vector<8x8x32xf32>
    %326 = tpu.matmul %325, %304, %cst_178 {dimension_numbers = #tpu.dot_dimension_numbers<[2], [1], [1], [2], [0, 0, 0, 1, 1, 2], [0], [0]>} : vector<8x8x8xbf16>, vector<8x8x32xbf16>, vector<8x8x32xf32> -> vector<8x8x32xf32>
    %327 = vector.shape_cast %326 : vector<8x8x32xf32> to vector<2x4x8x32xf32>
    %cst_179 = arith.constant dense<0.000000e+00> : vector<2x8x32xf32>
    %328 = vector.multi_reduction <add>, %327, %cst_179 [1] : vector<2x4x8x32xf32> to vector<2x8x32xf32>
    %329 = vector.broadcast %306 : vector<2x1x32xf32> to vector<2x8x32xf32>
    %330 = arith.addf %328, %329 : vector<2x8x32xf32>
    %331 = arith.addf %264, %330 : vector<2x8x32xf32>
    %c1_180 = arith.constant 1 : index
    %c3_181 = arith.constant 3 : index
    %c0_182 = arith.constant 0 : index
    %c0_183 = arith.constant 0 : index
    %332 = vector.load %arg3[%c1_180, %c3_181, %c0_182, %c0_183] : memref<2x5x1x32xf32, #tpu.memory_space<vmem>>, vector<1x2x1x32xf32>
    %333 = vector.shape_cast %332 : vector<1x2x1x32xf32> to vector<2x1x32xf32>
    %c1_184 = arith.constant 1 : index
    %c3_185 = arith.constant 3 : index
    %c0_186 = arith.constant 0 : index
    %c0_187 = arith.constant 0 : index
    %334 = vector.load %arg4[%c1_184, %c3_185, %c0_186, %c0_187] : memref<2x5x1x32xf32, #tpu.memory_space<vmem>>, vector<1x2x1x32xf32>
    %335 = vector.shape_cast %334 : vector<1x2x1x32xf32> to vector<2x1x32xf32>
    %c1_188 = arith.constant 1 : index
    %c0_189 = arith.constant 0 : index
    %c0_190 = arith.constant 0 : index
    %c0_191 = arith.constant 0 : index
    %336 = vector.load %arg8[%c1_188, %c0_189, %c0_190, %c0_191] : memref<2x2x32x64xbf16, #tpu.memory_space<vmem>>, vector<1x2x32x64xbf16>
    %337 = vector.shape_cast %336 : vector<1x2x32x64xbf16> to vector<2x32x64xbf16>
    %c1_192 = arith.constant 1 : index
    %c0_193 = arith.constant 0 : index
    %c0_194 = arith.constant 0 : index
    %c0_195 = arith.constant 0 : index
    %338 = vector.load %arg9[%c1_192, %c0_193, %c0_194, %c0_195] : memref<2x2x1x64xf32, #tpu.memory_space<vmem>>, vector<1x2x1x64xf32>
    %339 = vector.shape_cast %338 : vector<1x2x1x64xf32> to vector<2x1x64xf32>
    %c1_196 = arith.constant 1 : index
    %c0_197 = arith.constant 0 : index
    %c0_198 = arith.constant 0 : index
    %c0_199 = arith.constant 0 : index
    %340 = vector.load %arg10[%c1_196, %c0_197, %c0_198, %c0_199] : memref<2x2x64x32xbf16, #tpu.memory_space<vmem>>, vector<1x2x64x32xbf16>
    %341 = vector.shape_cast %340 : vector<1x2x64x32xbf16> to vector<2x64x32xbf16>
    %c1_200 = arith.constant 1 : index
    %c0_201 = arith.constant 0 : index
    %c0_202 = arith.constant 0 : index
    %c0_203 = arith.constant 0 : index
    %342 = vector.load %arg11[%c1_200, %c0_201, %c0_202, %c0_203] : memref<2x2x1x32xf32, #tpu.memory_space<vmem>>, vector<1x2x1x32xf32>
    %343 = vector.shape_cast %342 : vector<1x2x1x32xf32> to vector<2x1x32xf32>
    %cst_204 = arith.constant dense<0.000000e+00> : vector<2x8xf32>
    %344 = vector.multi_reduction <add>, %331, %cst_204 [2] : vector<2x8x32xf32> to vector<2x8xf32>
    %345 = vector.shape_cast %344 : vector<2x8xf32> to vector<2x8x1xf32>
    %cst_205 = arith.constant 3.200000e+01 : f32
    %346 = vector.broadcast %cst_205 : f32 to vector<2x8x1xf32>
    %347 = arith.divf %345, %346 : vector<2x8x1xf32>
    %348 = vector.broadcast %347 : vector<2x8x1xf32> to vector<2x8x32xf32>
    %349 = arith.subf %331, %348 : vector<2x8x32xf32>
    %350 = arith.mulf %349, %349 : vector<2x8x32xf32>
    %cst_206 = arith.constant dense<0.000000e+00> : vector<2x8xf32>
    %351 = vector.multi_reduction <add>, %350, %cst_206 [2] : vector<2x8x32xf32> to vector<2x8xf32>
    %352 = vector.shape_cast %351 : vector<2x8xf32> to vector<2x8x1xf32>
    %cst_207 = arith.constant 3.200000e+01 : f32
    %353 = vector.broadcast %cst_207 : f32 to vector<2x8x1xf32>
    %354 = arith.divf %352, %353 : vector<2x8x1xf32>
    %355 = vector.broadcast %347 : vector<2x8x1xf32> to vector<2x8x32xf32>
    %356 = arith.subf %331, %355 : vector<2x8x32xf32>
    %cst_208 = arith.constant 9.99999974E-6 : f32
    %357 = vector.broadcast %cst_208 : f32 to vector<2x8x1xf32>
    %358 = arith.addf %354, %357 : vector<2x8x1xf32>
    %359 = math.rsqrt %358 : vector<2x8x1xf32>
    %360 = vector.broadcast %359 : vector<2x8x1xf32> to vector<2x8x32xf32>
    %361 = arith.mulf %356, %360 : vector<2x8x32xf32>
    %362 = vector.broadcast %333 : vector<2x1x32xf32> to vector<2x8x32xf32>
    %363 = arith.mulf %361, %362 : vector<2x8x32xf32>
    %364 = vector.broadcast %335 : vector<2x1x32xf32> to vector<2x8x32xf32>
    %365 = arith.addf %363, %364 : vector<2x8x32xf32>
    %366 = arith.truncf %365 : vector<2x8x32xf32> to vector<2x8x32xbf16>
    %cst_209 = arith.constant dense<0.000000e+00> : vector<2x8x64xf32>
    %367 = tpu.matmul %366, %337, %cst_209 {dimension_numbers = #tpu.dot_dimension_numbers<[2], [1], [1], [2], [0, 0, 0, 1, 1, 2], [0], [0]>} : vector<2x8x32xbf16>, vector<2x32x64xbf16>, vector<2x8x64xf32> -> vector<2x8x64xf32>
    %368 = vector.broadcast %339 : vector<2x1x64xf32> to vector<2x8x64xf32>
    %369 = arith.addf %367, %368 : vector<2x8x64xf32>
    %cst_210 = arith.constant 5.000000e-01 : f32
    %370 = vector.broadcast %cst_210 : f32 to vector<2x8x64xf32>
    %371 = arith.mulf %370, %369 : vector<2x8x64xf32>
    %cst_211 = arith.constant 0.707106769 : f32
    %372 = vector.broadcast %cst_211 : f32 to vector<2x8x64xf32>
    %373 = arith.mulf %369, %372 : vector<2x8x64xf32>
    %374 = math.erf %373 : vector<2x8x64xf32>
    %cst_212 = arith.constant 1.000000e+00 : f32
    %375 = vector.broadcast %cst_212 : f32 to vector<2x8x64xf32>
    %376 = arith.addf %375, %374 : vector<2x8x64xf32>
    %377 = arith.mulf %371, %376 : vector<2x8x64xf32>
    %378 = arith.truncf %377 : vector<2x8x64xf32> to vector<2x8x64xbf16>
    %cst_213 = arith.constant dense<0.000000e+00> : vector<2x8x32xf32>
    %379 = tpu.matmul %378, %341, %cst_213 {dimension_numbers = #tpu.dot_dimension_numbers<[2], [1], [1], [2], [0, 0, 0, 1, 1, 2], [0], [0]>} : vector<2x8x64xbf16>, vector<2x64x32xbf16>, vector<2x8x32xf32> -> vector<2x8x32xf32>
    %380 = vector.broadcast %343 : vector<2x1x32xf32> to vector<2x8x32xf32>
    %381 = arith.addf %379, %380 : vector<2x8x32xf32>
    %382 = arith.addf %331, %381 : vector<2x8x32xf32>
    %383 = vector.extract_strided_slice %382 {offsets = [0, 0, 0], sizes = [1, 8, 32], strides = [1, 1, 1]} : vector<2x8x32xf32> to vector<1x8x32xf32>
    %c0_214 = arith.constant 0 : index
    %c0_215 = arith.constant 0 : index
    %c0_216 = arith.constant 0 : index
    %384 = vector.load %arg12[%c0_214, %c0_215, %c0_216] : memref<1x8x32xf32, #tpu.memory_space<vmem>>, vector<1x8x32xf32>
    tpu.vector_store %arg12[%c0_214, %c0_215, %c0_216], %383 {strides = array<i32>} : memref<1x8x32xf32, #tpu.memory_space<vmem>>, vector<1x8x32xf32>,
    %385 = vector.extract_strided_slice %382 {offsets = [1, 0, 0], sizes = [1, 8, 32], strides = [1, 1, 1]} : vector<2x8x32xf32> to vector<1x8x32xf32>
    %c0_217 = arith.constant 0 : index
    %c0_218 = arith.constant 0 : index
    %c0_219 = arith.constant 0 : index
    %386 = vector.load %arg13[%c0_217, %c0_218, %c0_219] : memref<1x8x32xf32, #tpu.memory_space<vmem>>, vector<1x8x32xf32>
    tpu.vector_store %arg13[%c0_217, %c0_218, %c0_219], %385 {strides = array<i32>} : memref<1x8x32xf32, #tpu.memory_space<vmem>>, vector<1x8x32xf32>,
    return
  }
  func.func @transform_0(%arg0: i32) -> (i32, i32, i32) {
    %c0_i32 = arith.constant 0 : i32
    %c0_i32_0 = arith.constant 0 : i32
    %c0_i32_1 = arith.constant 0 : i32
    return %arg0, %c0_i32, %c0_i32_0 : i32, i32, i32
  }
  func.func @transform_1(%arg0: i32) -> (i32, i32, i32) {
    %c0_i32 = arith.constant 0 : i32
    %c0_i32_0 = arith.constant 0 : i32
    %c0_i32_1 = arith.constant 0 : i32
    return %arg0, %c0_i32, %c0_i32_0 : i32, i32, i32
  }
  func.func @transform_2(%arg0: i32) -> (i32, i32, i32, i32) {
    %c0_i32 = arith.constant 0 : i32
    %c0_i32_0 = arith.constant 0 : i32
    %c0_i32_1 = arith.constant 0 : i32
    %c0_i32_2 = arith.constant 0 : i32
    %c0_i32_3 = arith.constant 0 : i32
    return %c0_i32, %c0_i32_0, %c0_i32_1, %c0_i32_2 : i32, i32, i32, i32
  }
  func.func @transform_3(%arg0: i32) -> (i32, i32, i32, i32) {
    %c0_i32 = arith.constant 0 : i32
    %c0_i32_0 = arith.constant 0 : i32
    %c0_i32_1 = arith.constant 0 : i32
    %c0_i32_2 = arith.constant 0 : i32
    %c0_i32_3 = arith.constant 0 : i32
    return %c0_i32, %c0_i32_0, %c0_i32_1, %c0_i32_2 : i32, i32, i32, i32
  }
  func.func @transform_4(%arg0: i32) -> (i32, i32, i32, i32, i32) {
    %c0_i32 = arith.constant 0 : i32
    %c0_i32_0 = arith.constant 0 : i32
    %c0_i32_1 = arith.constant 0 : i32
    %c0_i32_2 = arith.constant 0 : i32
    %c0_i32_3 = arith.constant 0 : i32
    %c0_i32_4 = arith.constant 0 : i32
    return %c0_i32, %c0_i32_0, %c0_i32_1, %c0_i32_2, %c0_i32_3 : i32, i32, i32, i32, i32
  }
  func.func @transform_5(%arg0: i32) -> (i32, i32, i32, i32, i32) {
    %c0_i32 = arith.constant 0 : i32
    %c0_i32_0 = arith.constant 0 : i32
    %c0_i32_1 = arith.constant 0 : i32
    %c0_i32_2 = arith.constant 0 : i32
    %c0_i32_3 = arith.constant 0 : i32
    %c0_i32_4 = arith.constant 0 : i32
    return %c0_i32, %c0_i32_0, %c0_i32_1, %c0_i32_2, %c0_i32_3 : i32, i32, i32, i32, i32
  }
  func.func @transform_6(%arg0: i32) -> (i32, i32, i32, i32, i32) {
    %c0_i32 = arith.constant 0 : i32
    %c0_i32_0 = arith.constant 0 : i32
    %c0_i32_1 = arith.constant 0 : i32
    %c0_i32_2 = arith.constant 0 : i32
    %c0_i32_3 = arith.constant 0 : i32
    %c0_i32_4 = arith.constant 0 : i32
    return %c0_i32, %c0_i32_0, %c0_i32_1, %c0_i32_2, %c0_i32_3 : i32, i32, i32, i32, i32
  }
  func.func @transform_7(%arg0: i32) -> (i32, i32, i32, i32) {
    %c0_i32 = arith.constant 0 : i32
    %c0_i32_0 = arith.constant 0 : i32
    %c0_i32_1 = arith.constant 0 : i32
    %c0_i32_2 = arith.constant 0 : i32
    %c0_i32_3 = arith.constant 0 : i32
    return %c0_i32, %c0_i32_0, %c0_i32_1, %c0_i32_2 : i32, i32, i32, i32
  }
  func.func @transform_8(%arg0: i32) -> (i32, i32, i32, i32) {
    %c0_i32 = arith.constant 0 : i32
    %c0_i32_0 = arith.constant 0 : i32
    %c0_i32_1 = arith.constant 0 : i32
    %c0_i32_2 = arith.constant 0 : i32
    %c0_i32_3 = arith.constant 0 : i32
    return %c0_i32, %c0_i32_0, %c0_i32_1, %c0_i32_2 : i32, i32, i32, i32
  }
  func.func @transform_9(%arg0: i32) -> (i32, i32, i32, i32) {
    %c0_i32 = arith.constant 0 : i32
    %c0_i32_0 = arith.constant 0 : i32
    %c0_i32_1 = arith.constant 0 : i32
    %c0_i32_2 = arith.constant 0 : i32
    %c0_i32_3 = arith.constant 0 : i32
    return %c0_i32, %c0_i32_0, %c0_i32_1, %c0_i32_2 : i32, i32, i32, i32
  }
  func.func @transform_10(%arg0: i32) -> (i32, i32, i32, i32) {
    %c0_i32 = arith.constant 0 : i32
    %c0_i32_0 = arith.constant 0 : i32
    %c0_i32_1 = arith.constant 0 : i32
    %c0_i32_2 = arith.constant 0 : i32
    %c0_i32_3 = arith.constant 0 : i32
    return %c0_i32, %c0_i32_0, %c0_i32_1, %c0_i32_2 : i32, i32, i32, i32
  }
  func.func @transform_11(%arg0: i32) -> (i32, i32, i32) {
    %c0_i32 = arith.constant 0 : i32
    %c0_i32_0 = arith.constant 0 : i32
    %c0_i32_1 = arith.constant 0 : i32
    return %arg0, %c0_i32, %c0_i32_0 : i32, i32, i32
  }
  func.func @transform_12(%arg0: i32) -> (i32, i32, i32) {
    %c0_i32 = arith.constant 0 : i32
    %c0_i32_0 = arith.constant 0 : i32
    %c0_i32_1 = arith.constant 0 : i32
    return %arg0, %c0_i32, %c0_i32_0 : i32, i32, i32
  }
}

</mosaic_0001>

<bundles_post_ra>
// kernel: cross_transformer.1
= control target key start
LH: loop header
LB: loop body
LE: loop exit
PB: predicated region body
PF: predicated region fallthrough
CT: control target
= control target key end

     0   :  { %s10601_s0 = inlined_call_operand.vmem [shape: f32[2,8,32], index: 0, kind: input, shape index: {}]   ;;  %s10602_s1 = inlined_call_operand.vmem [shape: f32[2,8,32], index: 1, kind: input, shape index: {}]   ;;  %s10603_s2 = inlined_call_operand.vmem [shape: f32[2,5,1,32], index: 2, kind: input, shape index: {}]   ;;  %s10604_s3 = inlined_call_operand.vmem [shape: f32[2,5,1,32], index: 3, kind: input, shape index: {}]   ;;  %s10605_s4 = inlined_call_operand.vmem [shape: bf16[2,2,24,32,8], index: 4, kind: input, shape index: {}]   ;;  %s10606_s5 = inlined_call_operand.vmem [shape: bf16[2,2,8,8,32], index: 5, kind: input, shape index: {}]   ;;  %s10607_s6 = inlined_call_operand.vmem [shape: f32[2,2,2,1,32], index: 6, kind: input, shape index: {}]   ;;  %s10608_s7 = inlined_call_operand.vmem [shape: bf16[2,2,32,64], index: 7, kind: input, shape index: {}]   ;;  %s10609_s8 = inlined_call_operand.vmem [shape: f32[2,2,1,64], index: 8, kind: input, shape index: {}]   ;;  %s10610_s9 = inlined_call_operand.vmem [shape: bf16[2,2,64,32], index: 9, kind: input, shape index: {}]   ;;  %s10611_s10 = inlined_call_operand.vmem [shape: f32[2,2,1,32], index: 10, kind: input, shape index: {}]   ;;  %s10612_s11 = inlined_call_operand.hbm [shape: f32[2,8,32], index: 11, kind: output, shape index: {0}]   ;;  %s10613_s12 = inlined_call_operand.hbm [shape: f32[2,8,32], index: 12, kind: output, shape index: {1}]  }
   0x1   :  { %10616 = sst [smem:[#allocation9_spill]] %s10601_s0 }
   0x2   :  { %10617 = sst [smem:[#allocation10_spill]] %s10602_s1 }
   0x3   :  { %10618 = sst [smem:[#allocation11_spill]] %s10603_s2 }
   0x4   :  { %10619 = sst [smem:[#allocation12_spill]] %s10604_s3 }
   0x5   :  { %18 = vsyncpa [#allocation3], 0 }
   0x6   :  { %20 = vsyncpa [#allocation3 + $0x1], 0 }
   0x7   :  { %21 = vsyncpa [#allocation5], 0 }
   0x8   :  { %23 = vsyncpa [#allocation5 + $0x1], 0  ;;  %s8912_s21 = smov 0   ;;  %s8914_s22 = smov 0  }
   0x9   :  { %s8916_s23 = smov 0   ;;  %s8918_s24 = smov 0  }
   0xa LB: > { %s8933_s25 = sadd.s32 4294967295, %s8844_s24   ;;  %s6843_s26 = sadd.s32 4294967294, %s8844_s24   ;;  %s8844_s24 = sphi %s8918_s24, %s10633_s24   ;;  %s8840_s23 = sphi %s8916_s23, %s10632_s23   ;;  %s8836_s22 = sphi %s8914_s22, %s10631_s22   ;;  %s8832_s21 = sphi %s8912_s21, %s10630_s21  }
   0xb   : > { %s8937_s27 = sadd.s32 1, %s8844_s24   ;;  %s277_s28 = sadd.s32 1, %s8840_s23 }
   0xc   : > { %s274_s29 = ssub.s32 %s8844_s24, %s8937_s27  ;;  %p287_p0 = scmp.ne.s32.totalorder %s8840_s23, %s8836_s22 }
   0xd   : > { %p275_p1 = scmp.eq.s32.totalorder %s274_s29, 0  ;;  %p288_p2 = scmp.eq.s32.totalorder %s8933_s25, 1 }
   0xe   : > { %p293_p3 = scmp.ne.s32.totalorder %s8836_s22, %s8832_s21  ;;  %p294_p4 = scmp.eq.s32.totalorder %s6843_s26, 1 }
   0xf   : > { %s8948_s30 = scalar_select %p275_p1, %s8840_s23, %s277_s28  }
  0x10   : > { %p8950_p5 = por %p288_p2, %p287_p0  ;;  %p8954_p6 = por %p294_p4, %p293_p3 }
  0x11   : > { %10620 = sst [smem:[#allocation8_spill]] %s8948_s30  ;;  %p6846_p7 = scmp.ge.s32.totalorder %s8844_s24, 1 }
  0x12   : > { %p379_p8 = scmp.lt.s32.totalorder %s8844_s24, 3 }
  0x14   : > { %p380_p9 = pnand %p6846_p7, %p379_p8 }
  0x15   : > { %p429_p10 = scmp.lt.s32.totalorder (!%p380_p9), %s8933_s25, 1  ;;  %s10623_s0 = sld [smem:[#allocation9_spill]] (!%p380_p9) }
  0x16   : > { %383 = sbr.rel (%p380_p9) target bundleno = 5676 (0x162c), region = 64  ;;  %s10624_s1 = sld [smem:[#allocation10_spill]] (!%p380_p9) }
  0x17   : > { %s10625_s2 = sld [smem:[#allocation11_spill]] (!%p380_p9)  ;;  %s10615_s26 = sshll.u32 (!%p380_p9), %s8933_s25, 3 }
  0x18   : > { %s10626_s3 = sld [smem:[#allocation12_spill]] (!%p380_p9)  ;;  %s6720_s20 = scalar_lea.hbm (!%p380_p9), %s10612_s11, %s10615_s26 }
  0x1b   : > { %s430_s15 = scalar_select %p429_p10, %s8933_s25, 1  ;;  %vm442_vm0 = vcmask 261120   ;;  %v8846_v4 = vmov 32.0   ;;  %v8290_v21 = vld [vmem:[%s10605_s4 + $0x8] sm:$0xff]  ;;  %v8292_v22 = vld [vmem:[%s10605_s4 + $0x18] sm:$0xff]  ;;  %v8289_v25 = vld [vmem:[%s10605_s4] sm:$0xff] }
  0x1c   : > { %8586 = vrcp.f32 %v8846_v4  ;;  %v8294_v23 = vld [vmem:[%s10605_s4 + $0x28] sm:$0xff]  ;;  %v8296_v24 = vld [vmem:[%s10605_s4 + $0x38] sm:$0xff]  ;;  %623 = vmatpush.bf16.msra.mxu0 %v8290_v21  ;;  %648 = vmatpush.bf16.msra.mxu1 %v8292_v22  ;;  %v8291_v26 = vld [vmem:[%s10605_s4 + $0x10] sm:$0xff]  ;;  %vm1234_vm8 = vcmask 64512   ;;  %vm1502_vm9 = vcmask 1043456  }
  0x1d   : > { %s6849_s16 = sshll.u32 %s430_s15, 3  ;;  %673 = vmatpush.bf16.msra.mxu2 %v8294_v23  ;;  %698 = vmatpush.bf16.msra.mxu3 %v8296_v24  ;;  %v8293_v27 = vld [vmem:[%s10605_s4 + $0x20] sm:$0xff]  ;;  %v8295_v28 = vld [vmem:[%s10605_s4 + $0x30] sm:$0xff]  ;;  %v8298_v32 = vld [vmem:[%s10605_s4 + $0x48] sm:$0xff] }
  0x1e   : > { %s8965_s19 = scalar_lea.vmem %s10623_s0, %s6849_s16  ;;  %s8970_s28 = scalar_lea.vmem %s10624_s1, %s6849_s16  ;;  %v8300_v33 = vld [vmem:[%s10605_s4 + $0x58] sm:$0xff]  ;;  %v8302_v34 = vld [vmem:[%s10605_s4 + $0x68] sm:$0xff]  ;;  %v8297_v36 = vld [vmem:[%s10605_s4 + $0x40] sm:$0xff] }
  0x1f   : > { %v438_v0 = vld [vmem:[%s8965_s19] sm:$0xff]  ;;  %v8304_v35 = vld [vmem:[%s10605_s4 + $0x78] sm:$0xff]  ;;  %v8299_v37 = vld [vmem:[%s10605_s4 + $0x50] sm:$0xff] }
  0x20   : > { %v443_v1 = vsel %vm442_vm0, %v438_v0, 0.0  ;;  %v439_v2 = vld [vmem:[%s8970_s28] sm:$0xff]  ;;  %624 = vmatpush.bf16.msra.mxu0 %v8289_v25  ;;  %649 = vmatpush.bf16.msra.mxu1 %v8291_v26  ;;  %v8303_v40 = vld [vmem:[%s10605_s4 + $0x70] sm:$0xff]  ;;  %v8306_v62 = vld [vmem:[%s10605_s4 + $0x88] sm:$0xff] }
  0x21   : > { %444 = vadd.xlane.f32.xlu0 %v443_v1  ;;  %v446_v3 = vsel %vm442_vm0, %v439_v2, 0.0  ;;  %674 = vmatpush.bf16.msra.mxu2 %v8293_v27  ;;  %v8301_v39 = vld [vmem:[%s10605_s4 + $0x60] sm:$0xff]  ;;  %v8308_v63 = vld [vmem:[%s10605_s4 + $0x98] sm:$0xff]  ;;  %v8310_v1 = vld [vmem:[%s10605_s4 + $0xa8] sm:$0xff] }
  0x22   : > { %v8587_v5 = vpop.eup %8586  ;;  %699 = vmatpush.bf16.msra.mxu3 %v8295_v28  ;;  %v8550_v51 = vld [vmem:[%s10625_s2] ss:$0 sm:$0xff]  ;;  %v8324_v21 = vld [vmem:[%s10605_s4 + $0x118] sm:$0xff]  ;;  %v8326_v22 = vld [vmem:[%s10605_s4 + $0x128] sm:$0xff] }
  0x23   : > { %v450_v6 = vmul.f32 32.0, %v8587_v5  ;;  %vm454_vm1 = vweird.f32 %v8587_v5  ;;  %v8551_v54 = vld [vmem:[%s10626_s3] ss:$0 sm:$0xff]  ;;  %v8328_v23 = vld [vmem:[%s10605_s4 + $0x138] sm:$0xff]  ;;  %v8323_v25 = vld [vmem:[%s10605_s4 + $0x110] sm:$0xff] }
  0x24   : > { %726 = vmatpush.bf16.msrb.mxu0 %v8298_v32  ;;  %751 = vmatpush.bf16.msrb.mxu1 %v8300_v33  ;;  %v8305_v4 = vld [vmem:[%s10605_s4 + $0x80] sm:$0xff]  ;;  %v8327_v27 = vld [vmem:[%s10605_s4 + $0x130] sm:$0xff]  ;;  %v8330_v28 = vld [vmem:[%s10605_s4 + $0x148] sm:$0xff] }
  0x25   : > { %v451_v7 = vsub.f32 1.0, %v450_v6  ;;  %776 = vmatpush.bf16.msrb.mxu2 %v8302_v34  ;;  %v8309_v6 = vld [vmem:[%s10605_s4 + $0xa0] sm:$0xff]  ;;  %v8331_v33 = vld [vmem:[%s10605_s4 + $0x150] sm:$0xff] }
  0x26   : > { %801 = vmatpush.bf16.msrb.mxu3 %v8304_v35  ;;  %v8321_v24 = vld [vmem:[%s10605_s4 + $0x100] sm:$0xff]  ;;  %v8335_v35 = vld [vmem:[%s10605_s4 + $0x170] sm:$0xff] }
  0x27   : > { %v452_v8 = vmul.f32 %v8587_v5, %v451_v7  ;;  %v8311_v7 = vld [vmem:[%s10605_s4 + $0xb0] sm:$0xff]  ;;  %v8325_v26 = vld [vmem:[%s10605_s4 + $0x120] sm:$0xff] }
  0x28   : > { %727 = vmatpush.bf16.msrb.mxu0 %v8297_v36  ;;  %752 = vmatpush.bf16.msrb.mxu1 %v8299_v37  ;;  %v8329_v32 = vld [vmem:[%s10605_s4 + $0x140] sm:$0xff] }
  0x29   : > { %447 = vadd.xlane.f32.xlu0 %v446_v3  ;;  %v453_v9 = vadd.f32 %v8587_v5, %v452_v8  ;;  %777 = vmatpush.bf16.msrb.mxu2 %v8301_v39  ;;  %v8333_v34 = vld [vmem:[%s10605_s4 + $0x160] sm:$0xff] }
  0x2a   : > { %802 = vmatpush.bf16.msrb.mxu3 %v8303_v40 }
  0x2b   : > { %v8976_v10 = vsel %vm454_vm1, %v8587_v5, %v453_v9  ;;  %v8307_v5 = vld [vmem:[%s10605_s4 + $0x90] sm:$0xff] }
  0x94   : > { %v445_v11 = vpop.xlane.xlu0 %444 }
  0x95   : > { %v456_v12 = vmul.f32 %v8976_v10, %v445_v11 }
  0x97   : > { %v8979_v13 = vsub.f32 %v438_v0, %v456_v12  ;;  %v8314_v12 = vld [vmem:[%s10605_s4 + $0xc8] sm:$0xff] }
  0x99   : > { %v460_v14 = vmul.f32 %v8979_v13, %v8979_v13 }
  0x9b   : > { %v462_v15 = vsel %vm442_vm0, %v460_v14, 0.0  ;;  %v8318_v14 = vld [vmem:[%s10605_s4 + $0xe8] sm:$0xff] }
  0x9c   : > { %463 = vadd.xlane.f32.xlu1 %v462_v15  ;;  %v448_v16 = vpop.xlane.xlu0 %447  ;;  %v8320_v15 = vld [vmem:[%s10605_s4 + $0xf8] sm:$0xff] }
  0x9d   : > { %v457_v17 = vmul.f32 %v8976_v10, %v448_v16  ;;  %v8313_v16 = vld [vmem:[%s10605_s4 + $0xc0] sm:$0xff] }
  0x9f   : > { %v8985_v18 = vsub.f32 %v439_v2, %v457_v17  ;;  %v8312_v2 = vld [vmem:[%s10605_s4 + $0xb8] sm:$0xff]  ;;  %v8315_v17 = vld [vmem:[%s10605_s4 + $0xd0] sm:$0xff] }
  0xa1   : > { %v461_v19 = vmul.f32 %v8985_v18, %v8985_v18 }
  0xa3   : > { %v465_v20 = vsel %vm442_vm0, %v461_v19, 0.0  ;;  %v8319_v19 = vld [vmem:[%s10605_s4 + $0xf0] sm:$0xff] }
  0xa4   : > { %466 = vadd.xlane.f32.xlu1 %v465_v20  ;;  %v8322_v20 = vld [vmem:[%s10605_s4 + $0x108] sm:$0xff] }
 0x10f   : > { %v464_v29 = vpop.xlane.xlu1 %463 }
 0x110   : > { %v468_v30 = vmul.f32 %v464_v29, %v8976_v10  ;;  %v8332_v29 = vld [vmem:[%s10605_s4 + $0x158] sm:$0xff] }
 0x112   : > { %v470_v31 = vadd.f32 1e-05, %v468_v30  ;;  %v8334_v30 = vld [vmem:[%s10605_s4 + $0x168] sm:$0xff] }
 0x114   : > { %8588 = vrsqrt.f32 %v470_v31  ;;  %vm478_vm3 = vweird.f32 %v470_v31 }
 0x117   : > { %v467_v38 = vpop.xlane.xlu1 %466 }
 0x118   : > { %v469_v41 = vmul.f32 %v467_v38, %v8976_v10 }
 0x11a   : > { %v8589_v42 = vpop.eup %8588  ;;  %v471_v43 = vadd.f32 1e-05, %v469_v41 }
 0x11b   : > { %v473_v44 = vmul.f32 %v8589_v42, %v470_v31  ;;  %vm479_vm2 = vweird.f32 %v8589_v42  ;;  %v8336_v31 = vld [vmem:[%s10605_s4 + $0x178] sm:$0xff] }
 0x11c   : > { %8590 = vrsqrt.f32 %v471_v43  ;;  %vm480_vm4 = vmor %vm478_vm3, %vm479_vm2  ;;  %vm488_vm5 = vweird.f32 %v471_v43 }
 0x11d   : > { %v474_v45 = vmul.f32 %v8589_v42, %v473_v44 }
 0x11f   : > { %v475_v46 = vmul.f32 0.5, %v474_v45 }
 0x121   : > { %v476_v47 = vsub.f32 1.5, %v475_v46 }
 0x122   : > { %v8591_v48 = vpop.eup %8590 }
 0x123   : > { %v477_v49 = vmul.f32 %v8589_v42, %v476_v47  ;;  %v483_v50 = vmul.f32 %v8591_v48, %v471_v43  ;;  %vm489_vm6 = vweird.f32 %v8591_v48 }
 0x124   : > { %vm490_vm7 = vmor %vm488_vm5, %vm489_vm6 }
 0x125   : > { %v481_v52 = vsel %vm480_vm4, %v8589_v42, %v477_v49  ;;  %v484_v53 = vmul.f32 %v8591_v48, %v483_v50 }
 0x126   : > { %v492_v55 = vmul.f32 %v481_v52, %v8979_v13  ;;  %v8316_v13 = vld [vmem:[%s10605_s4 + $0xd8] sm:$0xff] }
 0x127   : > { %v485_v56 = vmul.f32 0.5, %v484_v53 }
 0x128   : > { %v497_v57 = vmul.f32 %v8550_v51, %v492_v55 }
 0x129   : > { %v486_v58 = vsub.f32 1.5, %v485_v56 }
 0x12a   : > { %v502_v59 = vadd.f32 %v8551_v54, %v497_v57 }
 0x12b   : > { %v487_v60 = vmul.f32 %v8591_v48, %v486_v58 }
 0x12c   : > { %v9047_v61 = vpack.c.bf16 %v502_v59, %v502_v59 }
 0x12d   : > { %v491_v0 = vsel %vm490_vm7, %v8591_v48, %v487_v60 }
 0x12e   : > { %6859 = vmatmul.msk.bf16.vlgmr.msra.gmra.mxu0 %vm442_vm0, %v9047_v61  ;;  %6868 = vmatmul.msk.bf16.vlgmr.msra.gmra.mxu1 %vm442_vm0, %v9047_v61  ;;  %v493_v3 = vmul.f32 %v491_v0, %v8985_v18  ;;  %v8317_v18 = vld [vmem:[%s10605_s4 + $0xe0] sm:$0xff] }
 0x12f   : > { %6877 = vmatmul.msk.bf16.vlgmr.msra.gmra.mxu2 %vm442_vm0, %v9047_v61  ;;  %6886 = vmatmul.msk.bf16.vlgmr.msra.gmra.mxu3 %vm442_vm0, %v9047_v61 }
 0x130   : > { %826 = vmatpush.bf16.msra.mxu0 %v8306_v62  ;;  %851 = vmatpush.bf16.msra.mxu1 %v8308_v63  ;;  %v498_v8 = vmul.f32 %v8550_v51, %v493_v3 }
 0x131   : > { %876 = vmatpush.bf16.msra.mxu2 %v8310_v1  ;;  %901 = vmatpush.bf16.msra.mxu3 %v8312_v2 }
 0x132   : > { %v503_v9 = vadd.f32 %v8551_v54, %v498_v8 }
 0x134   : > { %827 = vmatpush.bf16.msra.mxu0 %v8305_v4  ;;  %852 = vmatpush.bf16.msra.mxu1 %v8307_v5  ;;  %v9082_v11 = vpack.c.bf16 %v503_v9, %v503_v9 }
 0x135   : > { %877 = vmatpush.bf16.msra.mxu2 %v8309_v6  ;;  %902 = vmatpush.bf16.msra.mxu3 %v8311_v7 }
 0x13e   : > { %6895 = vmatmul.msk.bf16.vlgmr.msrb.gmra.mxu0 %vm442_vm0, %v9082_v11  ;;  %6904 = vmatmul.msk.bf16.vlgmr.msrb.gmra.mxu1 %vm442_vm0, %v9082_v11 }
 0x13f   : > { %6913 = vmatmul.msk.bf16.vlgmr.msrb.gmra.mxu2 %vm442_vm0, %v9082_v11  ;;  %6922 = vmatmul.msk.bf16.vlgmr.msrb.gmra.mxu3 %vm442_vm0, %v9082_v11 }
 0x140   : > { %926 = vmatpush.bf16.msrb.mxu0 %v8314_v12  ;;  %951 = vmatpush.bf16.msrb.mxu1 %v8316_v13 }
 0x141   : > { %976 = vmatpush.bf16.msrb.mxu2 %v8318_v14  ;;  %1001 = vmatpush.bf16.msrb.mxu3 %v8320_v15 }
 0x144   : > { %927 = vmatpush.bf16.msrb.mxu0 %v8313_v16  ;;  %952 = vmatpush.bf16.msrb.mxu1 %v8315_v17 }
 0x145   : > { %977 = vmatpush.bf16.msrb.mxu2 %v8317_v18  ;;  %1002 = vmatpush.bf16.msrb.mxu3 %v8319_v19 }
 0x14e   : > { %6931 = vmatmul.msk.bf16.vlgmr.msra.gmra.mxu0 %vm442_vm0, %v9047_v61  ;;  %6940 = vmatmul.msk.bf16.vlgmr.msra.gmra.mxu1 %vm442_vm0, %v9047_v61 }
 0x14f   : > { %6949 = vmatmul.msk.bf16.vlgmr.msra.gmra.mxu2 %vm442_vm0, %v9047_v61  ;;  %6958 = vmatmul.msk.bf16.vlgmr.msra.gmra.mxu3 %vm442_vm0, %v9047_v61 }
 0x150   : > { %1026 = vmatpush.bf16.msra.mxu0 %v8322_v20  ;;  %1051 = vmatpush.bf16.msra.mxu1 %v8324_v21 }
 0x151   : > { %1076 = vmatpush.bf16.msra.mxu2 %v8326_v22  ;;  %1101 = vmatpush.bf16.msra.mxu3 %v8328_v23 }
 0x154   : > { %1027 = vmatpush.bf16.msra.mxu0 %v8321_v24  ;;  %1052 = vmatpush.bf16.msra.mxu1 %v8323_v25 }
 0x155   : > { %1077 = vmatpush.bf16.msra.mxu2 %v8325_v26  ;;  %1102 = vmatpush.bf16.msra.mxu3 %v8327_v27 }
 0x15e   : > { %6967 = vmatmul.msk.bf16.vlgmr.msrb.gmra.mxu0 %vm442_vm0, %v9082_v11  ;;  %6976 = vmatmul.msk.bf16.vlgmr.msrb.gmra.mxu1 %vm442_vm0, %v9082_v11 }
 0x15f   : > { %6985 = vmatmul.msk.bf16.vlgmr.msrb.gmra.mxu2 %vm442_vm0, %v9082_v11  ;;  %6994 = vmatmul.msk.bf16.vlgmr.msrb.gmra.mxu3 %vm442_vm0, %v9082_v11 }
 0x160   : > { %1126 = vmatpush.bf16.msrb.mxu0 %v8330_v28  ;;  %1151 = vmatpush.bf16.msrb.mxu1 %v8332_v29 }
 0x161   : > { %1176 = vmatpush.bf16.msrb.mxu2 %v8334_v30  ;;  %1201 = vmatpush.bf16.msrb.mxu3 %v8336_v31 }
 0x164   : > { %1127 = vmatpush.bf16.msrb.mxu0 %v8329_v32  ;;  %1152 = vmatpush.bf16.msrb.mxu1 %v8331_v33 }
 0x165   : > { %1177 = vmatpush.bf16.msrb.mxu2 %v8333_v34  ;;  %1202 = vmatpush.bf16.msrb.mxu3 %v8335_v35 }
 0x16e   : > { %7003 = vmatmul.msk.bf16.vlgmr.msra.gmra.mxu0 %vm442_vm0, %v9047_v61  ;;  %7012 = vmatmul.msk.bf16.vlgmr.msra.gmra.mxu1 %vm442_vm0, %v9047_v61 }
 0x16f   : > { %7021 = vmatmul.msk.bf16.vlgmr.msra.gmra.mxu2 %vm442_vm0, %v9047_v61  ;;  %7030 = vmatmul.msk.bf16.vlgmr.msra.gmra.mxu3 %vm442_vm0, %v9047_v61 }
 0x17e   : > { %7039 = vmatmul.msk.bf16.vlgmr.msrb.gmra.mxu0 %vm442_vm0, %v9082_v11  ;;  %7048 = vmatmul.msk.bf16.vlgmr.msrb.gmra.mxu1 %vm442_vm0, %v9082_v11 }
 0x17f   : > { %7057 = vmatmul.msk.bf16.vlgmr.msrb.gmra.mxu2 %vm442_vm0, %v9082_v11  ;;  %7066 = vmatmul.msk.bf16.vlgmr.msrb.gmra.mxu3 %vm442_vm0, %v9082_v11 }
 0x1ab   : > { %v9196_v36 = vpop.f32.mrf.mxu0  ;;  %v9198_v37 = vpop.f32.mrf.mxu1 }
 0x1ac   : > { %v1222_v21 = vpack.c.bf16 %v9196_v36, %v9196_v36  ;;  %v1223_v22 = vpack.c.bf16 %v9198_v37, %v9198_v37 }
 0x1b2   : > { %v9200_v38 = vpop.f32.mrf.mxu2  ;;  %v9202_v39 = vpop.f32.mrf.mxu3 }
 0x1b3   : > { %v628_v40 = vpop.f32.mrf.mxu0  ;;  %v653_v41 = vpop.f32.mrf.mxu1  ;;  %v1224_v27 = vpack.c.bf16 %v9200_v38, %v9200_v38  ;;  %v1225_v28 = vpack.c.bf16 %v9202_v39, %v9202_v39 }
 0x1ba   : > { %v678_v42 = vpop.f32.mrf.mxu2  ;;  %v703_v43 = vpop.f32.mrf.mxu3 }
 0x1bb   : > { %v729_v44 = vpop.f32.mrf.mxu0  ;;  %v754_v45 = vpop.f32.mrf.mxu1 }
 0x1bc   : > { %v1218_v0 = vpack.c.bf16 %v729_v44, %v729_v44  ;;  %v1219_v1 = vpack.c.bf16 %v754_v45, %v754_v45 }
 0x1c2   : > { %v779_v46 = vpop.f32.mrf.mxu2  ;;  %v804_v47 = vpop.f32.mrf.mxu3 }
 0x1c3   : > { %v731_v48 = vpop.f32.mrf.mxu0  ;;  %v756_v49 = vpop.f32.mrf.mxu1  ;;  %v1220_v6 = vpack.c.bf16 %v779_v46, %v779_v46  ;;  %v1221_v7 = vpack.c.bf16 %v804_v47, %v804_v47 }
 0x1ca   : > { %v781_v50 = vpop.f32.mrf.mxu2  ;;  %v806_v51 = vpop.f32.mrf.mxu3 }
 0x1cb   : > { %v829_v52 = vpop.f32.mrf.mxu0  ;;  %v854_v53 = vpop.f32.mrf.mxu1 }
 0x1cc   : > { %v1226_v54 = vpack.c.bf16 %v829_v52, %v829_v52  ;;  %v1227_v55 = vpack.c.bf16 %v854_v53, %v854_v53 }
 0x1ce   : > { %v1239_v56 = vsel %vm1234_vm8, %v1226_v54, 0  ;;  %v1258_v57 = vsel %vm1234_vm8, %v1227_v55, 0 }
 0x1cf   : > { %1248 = vmatpush.bf16.xpose.msra.mxu0 %v1239_v56  ;;  %1267 = vmatpush.bf16.xpose.msra.mxu1 %v1258_v57 }
 0x1d2   : > { %v879_v58 = vpop.f32.mrf.mxu2  ;;  %v904_v59 = vpop.f32.mrf.mxu3 }
 0x1d3   : > { %v1228_v60 = vpack.c.bf16 %v879_v58, %v879_v58  ;;  %v1229_v61 = vpack.c.bf16 %v904_v59, %v904_v59  ;;  %v831_v62 = vpop.f32.mrf.mxu0  ;;  %v856_v63 = vpop.f32.mrf.mxu1 }
 0x1d5   : > { %v1277_v2 = vsel %vm1234_vm8, %v1228_v60, 0  ;;  %v1296_v3 = vsel %vm1234_vm8, %v1229_v61, 0 }
 0x1d6   : > { %1286 = vmatpush.bf16.xpose.msra.mxu2 %v1277_v2  ;;  %1305 = vmatpush.bf16.xpose.msra.mxu3 %v1296_v3 }
 0x1d7   : > { %7067 = vmatmul.msk.bf16.vlgmr.msra.gmra.mxu0 %vm1234_vm8, %v1218_v0  ;;  %7068 = vmatmul.msk.bf16.vlgmr.msra.gmra.mxu1 %vm1234_vm8, %v1219_v1 }
 0x1da   : > { %v881_v4 = vpop.f32.mrf.mxu2  ;;  %v906_v5 = vpop.f32.mrf.mxu3 }
 0x1db   : > { %v929_v8 = vpop.f32.mrf.mxu0  ;;  %v954_v9 = vpop.f32.mrf.mxu1 }
 0x1dc   : > { %v1230_v11 = vpack.c.bf16 %v929_v8, %v929_v8  ;;  %v1231_v12 = vpack.c.bf16 %v954_v9, %v954_v9 }
 0x1dd   : > { %7069 = vmatmul.msk.bf16.vlgmr.msra.gmra.mxu2 %vm1234_vm8, %v1220_v6  ;;  %7070 = vmatmul.msk.bf16.vlgmr.msra.gmra.mxu3 %vm1234_vm8, %v1221_v7 }
 0x1de   : > { %v1315_v13 = vsel %vm1234_vm8, %v1230_v11, 0  ;;  %v1334_v14 = vsel %vm1234_vm8, %v1231_v12, 0 }
 0x1df   : > { %1324 = vmatpush.bf16.xpose.msrb.mxu0 %v1315_v13  ;;  %1343 = vmatpush.bf16.xpose.msrb.mxu1 %v1334_v14 }
 0x1e2   : > { %v979_v15 = vpop.f32.mrf.mxu2  ;;  %v1004_v16 = vpop.f32.mrf.mxu3 }
 0x1e3   : > { %v1232_v17 = vpack.c.bf16 %v979_v15, %v979_v15  ;;  %v1233_v18 = vpack.c.bf16 %v1004_v16, %v1004_v16  ;;  %v931_v19 = vpop.f32.mrf.mxu0  ;;  %v956_v20 = vpop.f32.mrf.mxu1 }
 0x1e5   : > { %v1353_v23 = vsel %vm1234_vm8, %v1232_v17, 0  ;;  %v1372_v24 = vsel %vm1234_vm8, %v1233_v18, 0 }
 0x1e6   : > { %1362 = vmatpush.bf16.xpose.msrb.mxu2 %v1353_v23  ;;  %1381 = vmatpush.bf16.xpose.msrb.mxu3 %v1372_v24 }
 0x1e7   : > { %7071 = vmatmul.msk.bf16.vlgmr.msrb.gmra.mxu0 %vm1234_vm8, %v1222_v21  ;;  %7072 = vmatmul.msk.bf16.vlgmr.msrb.gmra.mxu1 %vm1234_vm8, %v1223_v22 }
 0x1ea   : > { %v981_v25 = vpop.f32.mrf.mxu2  ;;  %v1006_v26 = vpop.f32.mrf.mxu3 }
 0x1eb   : > { %v1029_v29 = vpop.f32.mrf.mxu0  ;;  %v1054_v30 = vpop.f32.mrf.mxu1 }
 0x1ec   : > { %v1491_v31 = vpack.c.bf16 %v1029_v29, %v1029_v29  ;;  %v1492_v32 = vpack.c.bf16 %v1054_v30, %v1054_v30 }
 0x1ed   : > { %7073 = vmatmul.msk.bf16.vlgmr.msrb.gmra.mxu2 %vm1234_vm8, %v1224_v27  ;;  %7074 = vmatmul.msk.bf16.vlgmr.msrb.gmra.mxu3 %vm1234_vm8, %v1225_v28 }
 0x1ee   : > { %v1504_v33 = vsel %vm1502_vm9, %v1491_v31, 0  ;;  %v1523_v34 = vsel %vm1502_vm9, %v1492_v32, 0 }
 0x1ef   : > { %1513 = vmatpush.bf16.msra.mxu0 %v1504_v33  ;;  %1532 = vmatpush.bf16.msra.mxu1 %v1523_v34 }
 0x1f2   : > { %v1079_v35 = vpop.f32.mrf.mxu2  ;;  %v1104_v36 = vpop.f32.mrf.mxu3 }
 0x1f3   : > { %v1493_v37 = vpack.c.bf16 %v1079_v35, %v1079_v35  ;;  %v1494_v38 = vpack.c.bf16 %v1104_v36, %v1104_v36  ;;  %v1031_v39 = vpop.f32.mrf.mxu0  ;;  %v1056_v40 = vpop.f32.mrf.mxu1 }
 0x1f5   : > { %v1542_v41 = vsel %vm1502_vm9, %v1493_v37, 0  ;;  %v1561_v42 = vsel %vm1502_vm9, %v1494_v38, 0 }
 0x1f6   : > { %1551 = vmatpush.bf16.msra.mxu2 %v1542_v41  ;;  %1570 = vmatpush.bf16.msra.mxu3 %v1561_v42 }
 0x1fa   : > { %v1081_v43 = vpop.f32.mrf.mxu2  ;;  %v1106_v44 = vpop.f32.mrf.mxu3 }
 0x1fb   : > { %v1129_v45 = vpop.f32.mrf.mxu0  ;;  %v1154_v46 = vpop.f32.mrf.mxu1 }
 0x1fc   : > { %v1495_v47 = vpack.c.bf16 %v1129_v45, %v1129_v45  ;;  %v1496_v48 = vpack.c.bf16 %v1154_v46, %v1154_v46 }
 0x1fe   : > { %v1580_v49 = vsel %vm1502_vm9, %v1495_v47, 0  ;;  %v1599_v50 = vsel %vm1502_vm9, %v1496_v48, 0 }
 0x1ff   : > { %1589 = vmatpush.bf16.msrb.mxu0 %v1580_v49  ;;  %1608 = vmatpush.bf16.msrb.mxu1 %v1599_v50 }
 0x202   : > { %v1179_v51 = vpop.f32.mrf.mxu2  ;;  %v1204_v52 = vpop.f32.mrf.mxu3 }
 0x203   : > { %v1497_v53 = vpack.c.bf16 %v1179_v51, %v1179_v51  ;;  %v1498_v54 = vpack.c.bf16 %v1204_v52, %v1204_v52  ;;  %v1131_v55 = vpop.f32.mrf.mxu0  ;;  %v1156_v56 = vpop.f32.mrf.mxu1 }
 0x205   : > { %v1618_v57 = vsel %vm1502_vm9, %v1497_v53, 0  ;;  %v1637_v58 = vsel %vm1502_vm9, %v1498_v54, 0 }
 0x206   : > { %1627 = vmatpush.bf16.msrb.mxu2 %v1618_v57  ;;  %1646 = vmatpush.bf16.msrb.mxu3 %v1637_v58 }
 0x20a   : > { %v1181_v59 = vpop.f32.mrf.mxu2  ;;  %v1206_v60 = vpop.f32.mrf.mxu3 }
 0x254   : > { %v1250_v61 = vpop.f32.mrf.mxu0  ;;  %v1269_v62 = vpop.f32.mrf.mxu1 }
 0x255   : > { %v1387_v63 = vmul.f32 0.35355338, %v1250_v61  ;;  %v1388_v0 = vmul.f32 0.35355338, %v1269_v62 }
 0x257   : > { %v1398_v1 = vsel %vm1234_vm8, %v1388_v0, -inf  ;;  %v1395_v2 = vsel %vm1234_vm8, %v1387_v63, -inf }
 0x258   : > { %1399 = vmax.xlane.f32.xlu1 %v1398_v1  ;;  %1396 = vmax.xlane.f32.xlu0 %v1395_v2 }
 0x25c   : > { %v1252_v3 = vpop.f32.mrf.mxu0  ;;  %v1271_v4 = vpop.f32.mrf.mxu1 }
 0x260   : > { %v1288_v5 = vpop.f32.mrf.mxu2  ;;  %v1307_v6 = vpop.f32.mrf.mxu3 }
 0x261   : > { %v1389_v7 = vmul.f32 0.35355338, %v1288_v5  ;;  %v1390_v13 = vmul.f32 0.35355338, %v1307_v6 }
 0x263   : > { %v1401_v8 = vsel %vm1234_vm8, %v1389_v7, -inf  ;;  %v1404_v17 = vsel %vm1234_vm8, %v1390_v13, -inf }
 0x264   : > { %1402 = vmax.xlane.f32.xlu2 %v1401_v8  ;;  %v1326_v9 = vpop.f32.mrf.mxu0  ;;  %v1345_v11 = vpop.f32.mrf.mxu1 }
 0x265   : > { %v1391_v12 = vmul.f32 0.35355338, %v1326_v9  ;;  %v1392_v26 = vmul.f32 0.35355338, %v1345_v11 }
 0x267   : > { %v1407_v14 = vsel %vm1234_vm8, %v1391_v12, -inf  ;;  %v1410_v29 = vsel %vm1234_vm8, %v1392_v26, -inf }
 0x268   : > { %v1290_v15 = vpop.f32.mrf.mxu2  ;;  %v1309_v16 = vpop.f32.mrf.mxu3  ;;  %1408 = vmax.xlane.f32.xlu1 %v1407_v14 }
 0x26c   : > { %1405 = vmax.xlane.f32.xlu2 %v1404_v17  ;;  %v1328_v18 = vpop.f32.mrf.mxu0  ;;  %v1347_v19 = vpop.f32.mrf.mxu1 }
 0x270   : > { %v1364_v20 = vpop.f32.mrf.mxu2  ;;  %v1383_v21 = vpop.f32.mrf.mxu3 }
 0x271   : > { %v1393_v22 = vmul.f32 0.35355338, %v1364_v20  ;;  %v1394_v23 = vmul.f32 0.35355338, %v1383_v21 }
 0x273   : > { %v1413_v24 = vsel %vm1234_vm8, %v1393_v22, -inf  ;;  %v1416_v25 = vsel %vm1234_vm8, %v1394_v23, -inf }
 0x274   : > { %1414 = vmax.xlane.f32.xlu2 %v1413_v24  ;;  %1417 = vmax.xlane.f32.xlu0 %v1416_v25 }
 0x278   : > { %v1366_v27 = vpop.f32.mrf.mxu2  ;;  %v1385_v28 = vpop.f32.mrf.mxu3 }
 0x27c   : > { %1411 = vmax.xlane.f32.xlu2 %v1410_v29 }
 0x2cb   : > { %v1397_v30 = vpop.xlane.xlu0 %1396  ;;  %v1400_v34 = vpop.xlane.xlu1 %1399 }
 0x2cc   : > { %v1419_v31 = vsub.f32 %v1387_v63, %v1397_v30  ;;  %v1420_v38 = vsub.f32 %v1388_v0, %v1400_v34 }
 0x2ce   : > { %v1427_v32 = vmul.f32 1.442695, %v1419_v31  ;;  %v1429_v40 = vmul.f32 1.442695, %v1420_v38 }
 0x2d0   : > { %8592 = vpow2.f32 %v1427_v32 }
 0x2d6   : > { %v8593_v33 = vpop.eup %8592 }
 0x2d7   : > { %v1403_v35 = vpop.xlane.xlu2 %1402  ;;  %v1443_v37 = vsel %vm1234_vm8, %v8593_v33, 0.0 }
 0x2d8   : > { %v1421_v36 = vsub.f32 %v1389_v7, %v1403_v35  ;;  %1444 = vadd.xlane.f32.xlu2 %v1443_v37 }
 0x2da   : > { %v1431_v39 = vmul.f32 1.442695, %v1421_v36 }
 0x2db   : > { %v1409_v41 = vpop.xlane.xlu1 %1408 }
 0x2dc   : > { %8594 = vpow2.f32 %v1431_v39  ;;  %v1423_v45 = vsub.f32 %v1391_v12, %v1409_v41  ;;  %v1208_v39 = vld [vmem:[%s10606_s5] sm:$0xf]  ;;  %v1210_v41 = vld [vmem:[%s10606_s5 + $0x8] sm:$0xf] }
 0x2dd   : > { %8596 = vpow2.f32 %v1429_v40  ;;  %v1664_v40 = vsel %vm1502_vm9, %v1208_v39, 0 }
 0x2de   : > { %v1435_v48 = vmul.f32 1.442695, %v1423_v45  ;;  %v1211_v45 = vld [vmem:[%s10606_s5 + $0xc] sm:$0xf] }
 0x2df   : > { %v1406_v42 = vpop.xlane.xlu2 %1405 }
 0x2e0   : > { %v1422_v43 = vsub.f32 %v1390_v13, %v1406_v42  ;;  %v1702_v42 = vsel %vm1502_vm9, %v1210_v41, 0 }
 0x2e2   : > { %v8595_v44 = vpop.eup %8594  ;;  %v1433_v46 = vmul.f32 1.442695, %v1422_v43  ;;  %v1209_v43 = vld [vmem:[%s10606_s5 + $0x4] sm:$0xf] }
 0x2e3   : > { %v1449_v47 = vsel %vm1234_vm8, %v8595_v44, 0.0  ;;  %v8597_v51 = vpop.eup %8596 }
 0x2e4   : > { %8598 = vpow2.f32 %v1433_v46  ;;  %1450 = vadd.xlane.f32.xlu0 %v1449_v47  ;;  %v1446_v57 = vsel %vm1234_vm8, %v8597_v51, 0.0  ;;  %v1721_v46 = vsel %vm1502_vm9, %v1211_v45, 0  ;;  %v1212_v47 = vld [vmem:[%s10606_s5 + $0x10] sm:$0xf] }
 0x2e5   : > { %8600 = vpow2.f32 %v1435_v48  ;;  %v1740_v48 = vsel %vm1502_vm9, %v1212_v47, 0  ;;  %v8553_v47 = vld [vmem:[%s10607_s6 + $0x1] ss:$0 sm:$0xff] }
 0x2e7   : > { %v1415_v49 = vpop.xlane.xlu2 %1414  ;;  %v1418_v50 = vpop.xlane.xlu0 %1417 }
 0x2e8   : > { %v1425_v52 = vsub.f32 %v1393_v22, %v1415_v49  ;;  %v1426_v53 = vsub.f32 %v1394_v23, %v1418_v50 }
 0x2ea   : > { %v8599_v54 = vpop.eup %8598  ;;  %v1439_v55 = vmul.f32 1.442695, %v1425_v52  ;;  %v1441_v56 = vmul.f32 1.442695, %v1426_v53  ;;  %v1213_v53 = vld [vmem:[%s10606_s5 + $0x14] sm:$0xf] }
 0x2eb   : > { %v1452_v58 = vsel %vm1234_vm8, %v8599_v54, 0.0  ;;  %v8601_v60 = vpop.eup %8600 }
 0x2ec   : > { %8602 = vpow2.f32 %v1439_v55  ;;  %1447 = vadd.xlane.f32.xlu0 %v1446_v57  ;;  %1453 = vadd.xlane.f32.xlu1 %v1452_v58  ;;  %v1455_v2 = vsel %vm1234_vm8, %v8601_v60, 0.0  ;;  %v1215_v55 = vld [vmem:[%s10606_s5 + $0x1c] sm:$0xf] }
 0x2ed   : > { %8604 = vpow2.f32 %v1441_v56  ;;  %v1797_v56 = vsel %vm1502_vm9, %v1215_v55, 0 }
 0x2ef   : > { %v1412_v59 = vpop.xlane.xlu2 %1411 }
 0x2f0   : > { %v1424_v61 = vsub.f32 %v1392_v26, %v1412_v59 }
 0x2f2   : > { %v8603_v62 = vpop.eup %8602  ;;  %v1437_v63 = vmul.f32 1.442695, %v1424_v61 }
 0x2f3   : > { %v8605_v0 = vpop.eup %8604  ;;  %v1461_v1 = vsel %vm1234_vm8, %v8603_v62, 0.0 }
 0x2f4   : > { %8606 = vpow2.f32 %v1437_v63  ;;  %v1464_v3 = vsel %vm1234_vm8, %v8605_v0, 0.0  ;;  %1462 = vadd.xlane.f32.xlu1 %v1461_v1  ;;  %1456 = vadd.xlane.f32.xlu0 %v1455_v2 }
 0x2f5   : > { %1465 = vadd.xlane.f32.xlu2 %v1464_v3 }
 0x2fa   : > { %v8607_v4 = vpop.eup %8606 }
 0x2fb   : > { %v1458_v5 = vsel %vm1234_vm8, %v8607_v4, 0.0 }
 0x2fc   : > { %1459 = vadd.xlane.f32.xlu1 %v1458_v5 }
 0x34b   : > { %v1445_v6 = vpop.xlane.xlu2 %1444 }
 0x34c   : > { %8608 = vrcp.f32 %v1445_v6 }
 0x352   : > { %v8609_v7 = vpop.eup %8608 }
 0x353   : > { %v1475_v8 = vmul.f32 %v8609_v7, %v8593_v33 }
 0x355   : > { %v1483_v9 = vpack.c.bf16 %v1475_v8, %v1475_v8 }
 0x357   : > { %v1451_v11 = vpop.xlane.xlu0 %1450  ;;  %7075 = vmatmul.msk.bf16.vlgmr.msra.gmra.mxu0 %vm1234_vm8, %v1483_v9 }
 0x358   : > { %8610 = vrcp.f32 %v1451_v11  ;;  %1673 = vmatpush.bf16.msra.mxu0 %v1664_v40 }
 0x35e   : > { %v8611_v12 = vpop.eup %8610 }
 0x35f   : > { %v1477_v13 = vmul.f32 %v8611_v12, %v8595_v44  ;;  %v1448_v14 = vpop.xlane.xlu0 %1447  ;;  %v1454_v15 = vpop.xlane.xlu1 %1453  ;;  %v1683_v44 = vsel %vm1502_vm9, %v1209_v43, 0 }
 0x360   : > { %8612 = vrcp.f32 %v1448_v14 }
 0x361   : > { %v1485_v16 = vpack.c.bf16 %v1477_v13, %v1477_v13  ;;  %8614 = vrcp.f32 %v1454_v15 }
 0x363   : > { %7077 = vmatmul.msk.bf16.vlgmr.msra.gmra.mxu2 %vm1234_vm8, %v1485_v16 }
 0x364   : > { %1711 = vmatpush.bf16.msra.mxu2 %v1702_v42 }
 0x366   : > { %v8613_v17 = vpop.eup %8612 }
 0x367   : > { %v8615_v18 = vpop.eup %8614  ;;  %v1476_v19 = vmul.f32 %v8613_v17, %v8597_v51  ;;  %v1457_v20 = vpop.xlane.xlu0 %1456  ;;  %v1214_v51 = vld [vmem:[%s10606_s5 + $0x18] sm:$0xf] }
 0x368   : > { %v1463_v21 = vpop.xlane.xlu1 %1462  ;;  %v1478_v22 = vmul.f32 %v8615_v18, %v8599_v54  ;;  %8616 = vrcp.f32 %v1457_v20  ;;  %v1466_v25 = vpop.xlane.xlu2 %1465  ;;  %v1778_v52 = vsel %vm1502_vm9, %v1214_v51, 0  ;;  %v1759_v54 = vsel %vm1502_vm9, %v1213_v53, 0 }
 0x369   : > { %v1484_v23 = vpack.c.bf16 %v1476_v19, %v1476_v19  ;;  %8618 = vrcp.f32 %v1463_v21 }
 0x36a   : > { %v1486_v24 = vpack.c.bf16 %v1478_v22, %v1478_v22  ;;  %8620 = vrcp.f32 %v1466_v25 }
 0x36b   : > { %7076 = vmatmul.msk.bf16.vlgmr.msra.gmra.mxu1 %vm1234_vm8, %v1484_v23 }
 0x36c   : > { %7078 = vmatmul.msk.bf16.vlgmr.msra.gmra.mxu3 %vm1234_vm8, %v1486_v24  ;;  %1692 = vmatpush.bf16.msra.mxu1 %v1683_v44 }
 0x36d   : > { %1730 = vmatpush.bf16.msra.mxu3 %v1721_v46 }
 0x36e   : > { %v8617_v26 = vpop.eup %8616 }
 0x36f   : > { %v1479_v27 = vmul.f32 %v8617_v26, %v8601_v60  ;;  %v8619_v29 = vpop.eup %8618 }
 0x370   : > { %v1460_v28 = vpop.xlane.xlu1 %1459  ;;  %v1481_v31 = vmul.f32 %v8619_v29, %v8603_v62  ;;  %v8621_v32 = vpop.eup %8620  ;;  %v8552_v29 = vld [vmem:[%s10607_s6] ss:$0 sm:$0xff] }
 0x371   : > { %8622 = vrcp.f32 %v1460_v28  ;;  %v1487_v30 = vpack.c.bf16 %v1479_v27, %v1479_v27  ;;  %v1482_v35 = vmul.f32 %v8621_v32, %v8605_v0 }
 0x372   : > { %v1489_v33 = vpack.c.bf16 %v1481_v31, %v1481_v31 }
 0x373   : > { %7079 = vmatmul.msk.bf16.vlgmr.msrb.gmra.mxu0 %vm1234_vm8, %v1487_v30  ;;  %v1490_v38 = vpack.c.bf16 %v1482_v35, %v1482_v35  ;;  %v8748_v35 = vld [vmem:[%s8965_s19] sm:$0xff]  ;;  %s6724_s19 = sshll.u32 %s6720_s20, 4  ;;  %s6725_s19 = int_to_ptr.hbm [resolvable:$true] %s6724_s19 }
 0x374   : > { %7081 = vmatmul.msk.bf16.vlgmr.msrb.gmra.mxu2 %vm1234_vm8, %v1489_v33  ;;  %1749 = vmatpush.bf16.msrb.mxu0 %v1740_v48  ;;  %s8764_s15 = sshra.s32 %s6725_s19, 4  ;;  %s8765_s15 = int_to_ptr.hbm [resolvable:$true] %s8764_s15 }
 0x375   : > { %1787 = vmatpush.bf16.msrb.mxu2 %v1778_v52  ;;  %v8749_v52 = vld [vmem:[%s8970_s28] sm:$0xff]  ;;  %s10534_s28 = sand.u32 1, %s8836_s22   ;;  %s8766_s16 = scalar_lea.hbm %s8765_s15, 8 }
 0x376   : > { %s10614_s29 = sshll.u32 %s10534_s28, 3  ;;  %s6705_s30 = scalar_lea.sflag [#allocation3], %s10534_s28 }
 0x377   : > { %v8623_v34 = vpop.eup %8622  ;;  %s421_s0 = scalar_lea.vmem [#allocation2], %s10614_s29  ;;  %p8767_p11 = scmp.ne.s32.totalorder %s8765_s15, %s8766_s16 }
 0x378   : > { %v1480_v36 = vmul.f32 %v8623_v34, %v8607_v4  ;;  %s6722_s1 = sshll.u32 %s421_s0, 4  ;;  %s8770_s29 = scalar_lea.hbm %s10612_s11, 16  ;;  %s6723_s1 = int_to_ptr.vmem [resolvable:$true] %s6722_s1 }
 0x379   : > { %p8768_p12 = pnand %p8767_p11, %p8950_p5  ;;  %p8771_p0 = scmp.lt.s32.totalorder %s8765_s15, %s10612_s11 }
 0x37a   : > { %v1488_v37 = vpack.c.bf16 %v1480_v36, %v1480_v36  ;;  %p8772_p1 = scmp.lt.s32.totalorder %s8770_s29, %s8766_s16 }
 0x37b   : > { %p8769_p13 = pneg %p8768_p12 }
 0x37c   : > { %7080 = vmatmul.msk.bf16.vlgmr.msrb.gmra.mxu1 %vm1234_vm8, %v1488_v37  ;;  %7082 = vmatmul.msk.bf16.vlgmr.msrb.gmra.mxu3 %vm1234_vm8, %v1490_v38  ;;  %p8773_p2 = por %p8772_p1, %p8771_p0 }
 0x37d   : > { %1768 = vmatpush.bf16.msrb.mxu1 %v1759_v54  ;;  %1806 = vmatpush.bf16.msrb.mxu3 %v1797_v56 }
 0x37e   : > { %p8774_p3 = pnand %p8773_p2, %p8769_p13 }
 0x3d4   : > { %v1515_v49 = vpop.f32.mrf.mxu0 }
 0x3d5   : > { %v1652_v50 = vpack.c.bf16 %v1515_v49, %v1515_v49 }
 0x3d7   : > { %7083 = vmatmul.msk.bf16.vlgmr.msra.gmra.mxu0 %vm1234_vm8, %v1652_v50 }
 0x3dc   : > { %v1517_v57 = vpop.f32.mrf.mxu0 }
 0x3e6   : > { %v1553_v58 = vpop.f32.mrf.mxu2 }
 0x3e7   : > { %v1654_v59 = vpack.c.bf16 %v1553_v58, %v1553_v58 }
 0x3e8   : > { %v1534_v60 = vpop.f32.mrf.mxu1 }
 0x3e9   : > { %v1653_v61 = vpack.c.bf16 %v1534_v60, %v1534_v60  ;;  %7085 = vmatmul.msk.bf16.vlgmr.msra.gmra.mxu2 %vm1234_vm8, %v1654_v59 }
 0x3eb   : > { %7084 = vmatmul.msk.bf16.vlgmr.msra.gmra.mxu1 %vm1234_vm8, %v1653_v61 }
 0x3ee   : > { %v1555_v62 = vpop.f32.mrf.mxu2 }
 0x3ef   : > { %v1572_v63 = vpop.f32.mrf.mxu3 }
 0x3f0   : > { %v1655_v0 = vpack.c.bf16 %v1572_v63, %v1572_v63  ;;  %v1536_v1 = vpop.f32.mrf.mxu1  ;;  %v1591_v2 = vpop.f32.mrf.mxu0 }
 0x3f1   : > { %v1656_v3 = vpack.c.bf16 %v1591_v2, %v1591_v2  ;;  %v8338_v2 = vld [vmem:[%s10605_s4 + $0x188] sm:$0xff] }
 0x3f2   : > { %7086 = vmatmul.msk.bf16.vlgmr.msra.gmra.mxu3 %vm1234_vm8, %v1655_v0  ;;  %2022 = vmatpush.bf16.msra.mxu0 %v8338_v2  ;;  %v8363_v2 = vld [vmem:[%s10605_s4 + $0x250] sm:$0xff] }
 0x3f3   : > { %7087 = vmatmul.msk.bf16.vlgmr.msrb.gmra.mxu0 %vm1234_vm8, %v1656_v3  ;;  %v8340_v3 = vld [vmem:[%s10605_s4 + $0x198] sm:$0xff] }
 0x3f4   : > { %2047 = vmatpush.bf16.msra.mxu1 %v8340_v3  ;;  %v8365_v3 = vld [vmem:[%s10605_s4 + $0x260] sm:$0xff] }
 0x3f7   : > { %v1574_v4 = vpop.f32.mrf.mxu3  ;;  %v1629_v5 = vpop.f32.mrf.mxu2 }
 0x3f8   : > { %v1593_v6 = vpop.f32.mrf.mxu0  ;;  %v1658_v7 = vpack.c.bf16 %v1629_v5, %v1629_v5  ;;  %v8342_v4 = vld [vmem:[%s10605_s4 + $0x1a8] sm:$0xff]  ;;  %v8344_v5 = vld [vmem:[%s10605_s4 + $0x1b8] sm:$0xff] }
 0x3f9   : > { %v1610_v8 = vpop.f32.mrf.mxu1  ;;  %2072 = vmatpush.bf16.msra.mxu2 %v8342_v4  ;;  %2097 = vmatpush.bf16.msra.mxu3 %v8344_v5  ;;  %v8337_v6 = vld [vmem:[%s10605_s4 + $0x180] sm:$0xff]  ;;  %v8367_v4 = vld [vmem:[%s10605_s4 + $0x270] sm:$0xff]  ;;  %v8370_v5 = vld [vmem:[%s10605_s4 + $0x288] sm:$0xff] }
 0x3fa   : > { %v1657_v9 = vpack.c.bf16 %v1610_v8, %v1610_v8  ;;  %7089 = vmatmul.msk.bf16.vlgmr.msrb.gmra.mxu2 %vm1234_vm8, %v1658_v7  ;;  %v8339_v7 = vld [vmem:[%s10605_s4 + $0x190] sm:$0xff]  ;;  %v8341_v8 = vld [vmem:[%s10605_s4 + $0x1a0] sm:$0xff]  ;;  %2023 = vmatpush.bf16.msra.mxu0 %v8337_v6  ;;  %v8372_v6 = vld [vmem:[%s10605_s4 + $0x298] sm:$0xff] }
 0x3fb   : > { %2048 = vmatpush.bf16.msra.mxu1 %v8339_v7  ;;  %v8374_v7 = vld [vmem:[%s10605_s4 + $0x2a8] sm:$0xff] }
 0x3fc   : > { %7088 = vmatmul.msk.bf16.vlgmr.msrb.gmra.mxu1 %vm1234_vm8, %v1657_v9  ;;  %v8343_v9 = vld [vmem:[%s10605_s4 + $0x1b0] sm:$0xff] }
 0x3fd   : > { %2073 = vmatpush.bf16.msra.mxu2 %v8341_v8  ;;  %2098 = vmatpush.bf16.msra.mxu3 %v8343_v9  ;;  %v8376_v8 = vld [vmem:[%s10605_s4 + $0x2b8] sm:$0xff]  ;;  %v8369_v9 = vld [vmem:[%s10605_s4 + $0x280] sm:$0xff] }
 0x3ff   : > { %v1648_v11 = vpop.f32.mrf.mxu3  ;;  %v1631_v12 = vpop.f32.mrf.mxu2 }
 0x400   : > { %v1659_v13 = vpack.c.bf16 %v1648_v11, %v1648_v11 }
 0x401   : > { %v1612_v14 = vpop.f32.mrf.mxu1 }
 0x402   : > { %7090 = vmatmul.msk.bf16.vlgmr.msrb.gmra.mxu3 %vm1234_vm8, %v1659_v13  ;;  %v8346_v14 = vld [vmem:[%s10605_s4 + $0x1c8] sm:$0xff] }
 0x403   : > { %2125 = vmatpush.bf16.msrb.mxu0 %v8346_v14  ;;  %v8378_v14 = vld [vmem:[%s10605_s4 + $0x2c8] sm:$0xff] }
 0x407   : > { %v1650_v15 = vpop.f32.mrf.mxu3 }
 0x408   : > { %v8348_v15 = vld [vmem:[%s10605_s4 + $0x1d8] sm:$0xff] }
 0x409   : > { %2150 = vmatpush.bf16.msrb.mxu1 %v8348_v15  ;;  %v8380_v15 = vld [vmem:[%s10605_s4 + $0x2d8] sm:$0xff] }
 0x454   : > { %v1675_v16 = vpop.f32.mrf.mxu0 }
 0x455   : > { %v1812_v23 = vsel %vm442_vm0, %v1675_v16, 0.0  ;;  %v8350_v16 = vld [vmem:[%s10605_s4 + $0x1e8] sm:$0xff] }
 0x456   : > { %2175 = vmatpush.bf16.msrb.mxu2 %v8350_v16  ;;  %v8382_v16 = vld [vmem:[%s10605_s4 + $0x2e8] sm:$0xff] }
 0x45c   : > { %v1677_v17 = vpop.f32.mrf.mxu0 }
 0x45d   : > { %v8352_v17 = vld [vmem:[%s10605_s4 + $0x1f8] sm:$0xff] }
 0x45e   : > { %2200 = vmatpush.bf16.msrb.mxu3 %v8352_v17  ;;  %v8384_v17 = vld [vmem:[%s10605_s4 + $0x2f8] sm:$0xff] }
 0x468   : > { %v1694_v18 = vpop.f32.mrf.mxu1 }
 0x469   : > { %v1813_v20 = vsel %vm442_vm0, %v1694_v18, 0.0 }
 0x46a   : > { %v1814_v25 = vadd.f32 %v1813_v20, %v1812_v23  ;;  %v8347_v20 = vld [vmem:[%s10605_s4 + $0x1d0] sm:$0xff] }
 0x46b   : > { %v8351_v23 = vld [vmem:[%s10605_s4 + $0x1f0] sm:$0xff]  ;;  %2151 = vmatpush.bf16.msrb.mxu1 %v8347_v20  ;;  %v8381_v20 = vld [vmem:[%s10605_s4 + $0x2e0] sm:$0xff] }
 0x46c   : > { %v1713_v19 = vpop.f32.mrf.mxu2  ;;  %2201 = vmatpush.bf16.msrb.mxu3 %v8351_v23 }
 0x46d   : > { %v1815_v24 = vsel %vm442_vm0, %v1713_v19, 0.0  ;;  %v8345_v19 = vld [vmem:[%s10605_s4 + $0x1c0] sm:$0xff] }
 0x46e   : > { %v1816_v27 = vadd.f32 %v1815_v24, %v1814_v25  ;;  %2126 = vmatpush.bf16.msrb.mxu0 %v8345_v19  ;;  %v8379_v19 = vld [vmem:[%s10605_s4 + $0x2d0] sm:$0xff] }
 0x470   : > { %v1696_v21 = vpop.f32.mrf.mxu1  ;;  %v1751_v22 = vpop.f32.mrf.mxu0 }
 0x471   : > { %v1819_v42 = vsel %vm442_vm0, %v1751_v22, 0.0  ;;  %v8349_v21 = vld [vmem:[%s10605_s4 + $0x1e0] sm:$0xff] }
 0x472   : > { %2176 = vmatpush.bf16.msrb.mxu2 %v8349_v21  ;;  %v8383_v21 = vld [vmem:[%s10605_s4 + $0x2f0] sm:$0xff] }
 0x474   : > { %v1715_v26 = vpop.f32.mrf.mxu2 }
 0x475   : > { %v1732_v28 = vpop.f32.mrf.mxu3 }
 0x476   : > { %v1817_v30 = vsel %vm442_vm0, %v1732_v28, 0.0 }
 0x477   : > { %v1818_v31 = vadd.f32 %v1817_v30, %v1816_v27 }
 0x478   : > { %v1753_v32 = vpop.f32.mrf.mxu0 }
 0x479   : > { %v1832_v33 = vadd.f32 %v8552_v29, %v1818_v31  ;;  %v1770_v34 = vpop.f32.mrf.mxu1  ;;  %v8554_v31 = vld [vmem:[%s10625_s2 + $0x1] ss:$0 sm:$0xff] }
 0x47a   : > { %v1820_v40 = vsel %vm442_vm0, %v1770_v34, 0.0 }
 0x47b   : > { %v9308_v36 = vadd.f32 %v8748_v35, %v1832_v33  ;;  %v1821_v44 = vadd.f32 %v1820_v40, %v1819_v42  ;;  %v8555_v33 = vld [vmem:[%s10626_s3 + $0x1] ss:$0 sm:$0xff]  ;;  %v8356_v42 = vld [vmem:[%s10605_s4 + $0x218] sm:$0xff] }
 0x47d   : > { %v1734_v37 = vpop.f32.mrf.mxu3  ;;  %v1842_v38 = vsel %vm442_vm0, %v9308_v36, 0.0  ;;  %v1789_v39 = vpop.f32.mrf.mxu2 }
 0x47e   : > { %1843 = vadd.xlane.f32.xlu2 %v1842_v38  ;;  %v1822_v43 = vsel %vm442_vm0, %v1789_v39, 0.0 }
 0x47f   : > { %v1823_v45 = vadd.f32 %v1822_v43, %v1821_v44  ;;  %v8358_v44 = vld [vmem:[%s10605_s4 + $0x228] sm:$0xff] }
 0x481   : > { %v1772_v41 = vpop.f32.mrf.mxu1 }
 0x482   : > { %v8354_v41 = vld [vmem:[%s10605_s4 + $0x208] sm:$0xff] }
 0x485   : > { %v1808_v46 = vpop.f32.mrf.mxu3  ;;  %v1791_v48 = vpop.f32.mrf.mxu2 }
 0x486   : > { %v1824_v49 = vsel %vm442_vm0, %v1808_v46, 0.0  ;;  %v8355_v48 = vld [vmem:[%s10605_s4 + $0x210] sm:$0xff] }
 0x487   : > { %v1825_v50 = vadd.f32 %v1824_v49, %v1823_v45  ;;  %v8360_v45 = vld [vmem:[%s10605_s4 + $0x238] sm:$0xff] }
 0x489   : > { %v1833_v51 = vadd.f32 %v8553_v47, %v1825_v50  ;;  %v8353_v47 = vld [vmem:[%s10605_s4 + $0x200] sm:$0xff] }
 0x48a   : > { %v8357_v50 = vld [vmem:[%s10605_s4 + $0x220] sm:$0xff] }
 0x48b   : > { %v9320_v53 = vadd.f32 %v8749_v52, %v1833_v51  ;;  %v8359_v51 = vld [vmem:[%s10605_s4 + $0x230] sm:$0xff] }
 0x48d   : > { %v1810_v54 = vpop.f32.mrf.mxu3  ;;  %v1845_v55 = vsel %vm442_vm0, %v9320_v53, 0.0 }
 0x48e   : > { %1846 = vadd.xlane.f32.xlu0 %v1845_v55  ;;  %v8556_v54 = vld [vmem:[%s10625_s2 + $0x2] ss:$0 sm:$0xff] }
 0x4f1   : > { %v1844_v56 = vpop.xlane.xlu2 %1843 }
 0x4f2   : > { %v1848_v57 = vmul.f32 %v1844_v56, %v8976_v10  ;;  %v8557_v56 = vld [vmem:[%s10626_s3 + $0x2] ss:$0 sm:$0xff] }
 0x4f4   : > { %v1850_v58 = vsub.f32 %v9308_v36, %v1848_v57 }
 0x4f6   : > { %v1852_v59 = vmul.f32 %v1850_v58, %v1850_v58 }
 0x4f8   : > { %v1854_v60 = vsel %vm442_vm0, %v1852_v59, 0.0 }
 0x4f9   : > { %1855 = vadd.xlane.f32.xlu1 %v1854_v60 }
 0x501   : > { %v1847_v61 = vpop.xlane.xlu0 %1846 }
 0x502   : > { %v1849_v62 = vmul.f32 %v1847_v61, %v8976_v10  ;;  %v8362_v61 = vld [vmem:[%s10605_s4 + $0x248] sm:$0xff] }
 0x504   : > { %v9329_v63 = vsub.f32 %v9320_v53, %v1849_v62  ;;  %v8364_v62 = vld [vmem:[%s10605_s4 + $0x258] sm:$0xff] }
 0x506   : > { %v1853_v0 = vmul.f32 %v9329_v63, %v9329_v63 }
 0x508   : > { %v1857_v1 = vsel %vm442_vm0, %v1853_v0, 0.0  ;;  %v8366_v0 = vld [vmem:[%s10605_s4 + $0x268] sm:$0xff] }
 0x509   : > { %1858 = vadd.xlane.f32.xlu2 %v1857_v1  ;;  %v8361_v1 = vld [vmem:[%s10605_s4 + $0x240] sm:$0xff] }
 0x56c   : > { %v1856_v11 = vpop.xlane.xlu1 %1855 }
 0x56d   : > { %v1860_v12 = vmul.f32 %v1856_v11, %v8976_v10  ;;  %v8371_v11 = vld [vmem:[%s10605_s4 + $0x290] sm:$0xff] }
 0x56f   : > { %v1862_v13 = vadd.f32 1e-05, %v1860_v12  ;;  %v8373_v12 = vld [vmem:[%s10605_s4 + $0x2a0] sm:$0xff] }
 0x571   : > { %8624 = vrsqrt.f32 %v1862_v13  ;;  %vm1870_vm11 = vweird.f32 %v1862_v13 }
 0x577   : > { %v8625_v18 = vpop.eup %8624 }
 0x578   : > { %v1865_v22 = vmul.f32 %v8625_v18, %v1862_v13  ;;  %vm1871_vm10 = vweird.f32 %v8625_v18  ;;  %v8375_v13 = vld [vmem:[%s10605_s4 + $0x2b0] sm:$0xff] }
 0x579   : > { %vm1872_vm12 = vmor %vm1870_vm11, %vm1871_vm10 }
 0x57a   : > { %v1866_v24 = vmul.f32 %v8625_v18, %v1865_v22 }
 0x57c   : > { %v1867_v25 = vmul.f32 0.5, %v1866_v24  ;;  %v1859_v26 = vpop.xlane.xlu2 %1858 }
 0x57d   : > { %v1861_v27 = vmul.f32 %v1859_v26, %v8976_v10 }
 0x57e   : > { %v1868_v28 = vsub.f32 1.5, %v1867_v25 }
 0x57f   : > { %v1863_v29 = vadd.f32 1e-05, %v1861_v27 }
 0x580   : > { %v1869_v30 = vmul.f32 %v8625_v18, %v1868_v28 }
 0x581   : > { %8626 = vrsqrt.f32 %v1863_v29  ;;  %vm1880_vm14 = vweird.f32 %v1863_v29 }
 0x582   : > { %v1873_v32 = vsel %vm1872_vm12, %v8625_v18, %v1869_v30  ;;  %v8377_v18 = vld [vmem:[%s10605_s4 + $0x2c0] sm:$0xff] }
 0x583   : > { %v1884_v34 = vmul.f32 %v1873_v32, %v1850_v58 }
 0x585   : > { %v1892_v35 = vmul.f32 %v8554_v31, %v1884_v34 }
 0x587   : > { %v8627_v37 = vpop.eup %8626  ;;  %v1900_v38 = vadd.f32 %v8555_v33, %v1892_v35 }
 0x588   : > { %v1875_v39 = vmul.f32 %v8627_v37, %v1863_v29  ;;  %vm1881_vm13 = vweird.f32 %v8627_v37 }
 0x589   : > { %v9390_v40 = vpack.c.bf16 %v1900_v38, %v1900_v38  ;;  %vm1882_vm15 = vmor %vm1880_vm14, %vm1881_vm13  ;;  %vm3513_vm13 = vcmask 523264  }
 0x58a   : > { %v1876_v43 = vmul.f32 %v8627_v37, %v1875_v39 }
 0x58b   : > { %7199 = vmatmul.msk.bf16.vlgmr.msra.gmra.mxu0 %vm442_vm0, %v9390_v40  ;;  %7208 = vmatmul.msk.bf16.vlgmr.msra.gmra.mxu1 %vm442_vm0, %v9390_v40 }
 0x58c   : > { %v1877_v46 = vmul.f32 0.5, %v1876_v43  ;;  %7217 = vmatmul.msk.bf16.vlgmr.msra.gmra.mxu2 %vm442_vm0, %v9390_v40  ;;  %7226 = vmatmul.msk.bf16.vlgmr.msra.gmra.mxu3 %vm442_vm0, %v9390_v40 }
 0x58d   : > { %2225 = vmatpush.bf16.msra.mxu0 %v8354_v41  ;;  %2250 = vmatpush.bf16.msra.mxu1 %v8356_v42 }
 0x58e   : > { %v1878_v49 = vsub.f32 1.5, %v1877_v46  ;;  %2275 = vmatpush.bf16.msra.mxu2 %v8358_v44  ;;  %2300 = vmatpush.bf16.msra.mxu3 %v8360_v45 }
 0x590   : > { %v1879_v52 = vmul.f32 %v8627_v37, %v1878_v49 }
 0x591   : > { %2226 = vmatpush.bf16.msra.mxu0 %v8353_v47  ;;  %2251 = vmatpush.bf16.msra.mxu1 %v8355_v48 }
 0x592   : > { %v1883_v55 = vsel %vm1882_vm15, %v8627_v37, %v1879_v52  ;;  %2276 = vmatpush.bf16.msra.mxu2 %v8357_v50  ;;  %2301 = vmatpush.bf16.msra.mxu3 %v8359_v51 }
 0x593   : > { %v1885_v57 = vmul.f32 %v1883_v55, %v9329_v63  ;;  %v8368_v63 = vld [vmem:[%s10605_s4 + $0x278] sm:$0xff] }
 0x595   : > { %v1893_v58 = vmul.f32 %v8556_v54, %v1885_v57 }
 0x597   : > { %v1901_v59 = vadd.f32 %v8557_v56, %v1893_v58 }
 0x599   : > { %v9431_v60 = vpack.c.bf16 %v1901_v59, %v1901_v59 }
 0x59b   : > { %7235 = vmatmul.msk.bf16.vlgmr.msrb.gmra.mxu0 %vm442_vm0, %v9431_v60  ;;  %7244 = vmatmul.msk.bf16.vlgmr.msrb.gmra.mxu1 %vm442_vm0, %v9431_v60 }
 0x59c   : > { %7253 = vmatmul.msk.bf16.vlgmr.msrb.gmra.mxu2 %vm442_vm0, %v9431_v60  ;;  %7262 = vmatmul.msk.bf16.vlgmr.msrb.gmra.mxu3 %vm442_vm0, %v9431_v60 }
 0x59d   : > { %2325 = vmatpush.bf16.msrb.mxu0 %v8362_v61  ;;  %2350 = vmatpush.bf16.msrb.mxu1 %v8364_v62 }
 0x59e   : > { %2375 = vmatpush.bf16.msrb.mxu2 %v8366_v0  ;;  %2400 = vmatpush.bf16.msrb.mxu3 %v8368_v63 }
 0x5a1   : > { %2326 = vmatpush.bf16.msrb.mxu0 %v8361_v1  ;;  %2351 = vmatpush.bf16.msrb.mxu1 %v8363_v2 }
 0x5a2   : > { %2376 = vmatpush.bf16.msrb.mxu2 %v8365_v3  ;;  %2401 = vmatpush.bf16.msrb.mxu3 %v8367_v4 }
 0x5ab   : > { %7271 = vmatmul.msk.bf16.vlgmr.msra.gmra.mxu0 %vm442_vm0, %v9390_v40  ;;  %7280 = vmatmul.msk.bf16.vlgmr.msra.gmra.mxu1 %vm442_vm0, %v9390_v40 }
 0x5ac   : > { %7289 = vmatmul.msk.bf16.vlgmr.msra.gmra.mxu2 %vm442_vm0, %v9390_v40  ;;  %7298 = vmatmul.msk.bf16.vlgmr.msra.gmra.mxu3 %vm442_vm0, %v9390_v40 }
 0x5ad   : > { %2425 = vmatpush.bf16.msra.mxu0 %v8370_v5  ;;  %2450 = vmatpush.bf16.msra.mxu1 %v8372_v6 }
 0x5ae   : > { %2475 = vmatpush.bf16.msra.mxu2 %v8374_v7  ;;  %2500 = vmatpush.bf16.msra.mxu3 %v8376_v8 }
 0x5b1   : > { %2426 = vmatpush.bf16.msra.mxu0 %v8369_v9  ;;  %2451 = vmatpush.bf16.msra.mxu1 %v8371_v11 }
 0x5b2   : > { %2476 = vmatpush.bf16.msra.mxu2 %v8373_v12  ;;  %2501 = vmatpush.bf16.msra.mxu3 %v8375_v13 }
 0x5bb   : > { %7307 = vmatmul.msk.bf16.vlgmr.msrb.gmra.mxu0 %vm442_vm0, %v9431_v60  ;;  %7316 = vmatmul.msk.bf16.vlgmr.msrb.gmra.mxu1 %vm442_vm0, %v9431_v60 }
 0x5bc   : > { %7325 = vmatmul.msk.bf16.vlgmr.msrb.gmra.mxu2 %vm442_vm0, %v9431_v60  ;;  %7334 = vmatmul.msk.bf16.vlgmr.msrb.gmra.mxu3 %vm442_vm0, %v9431_v60 }
 0x5bd   : > { %2525 = vmatpush.bf16.msrb.mxu0 %v8378_v14  ;;  %2550 = vmatpush.bf16.msrb.mxu1 %v8380_v15 }
 0x5be   : > { %2575 = vmatpush.bf16.msrb.mxu2 %v8382_v16  ;;  %2600 = vmatpush.bf16.msrb.mxu3 %v8384_v17 }
 0x5c1   : > { %2526 = vmatpush.bf16.msrb.mxu0 %v8377_v18  ;;  %2551 = vmatpush.bf16.msrb.mxu1 %v8379_v19 }
 0x5c2   : > { %2576 = vmatpush.bf16.msrb.mxu2 %v8381_v20  ;;  %2601 = vmatpush.bf16.msrb.mxu3 %v8383_v21 }
 0x5cb   : > { %7343 = vmatmul.msk.bf16.vlgmr.msra.gmra.mxu0 %vm442_vm0, %v9390_v40  ;;  %7352 = vmatmul.msk.bf16.vlgmr.msra.gmra.mxu1 %vm442_vm0, %v9390_v40 }
 0x5cc   : > { %7361 = vmatmul.msk.bf16.vlgmr.msra.gmra.mxu2 %vm442_vm0, %v9390_v40  ;;  %7370 = vmatmul.msk.bf16.vlgmr.msra.gmra.mxu3 %vm442_vm0, %v9390_v40 }
 0x5db   : > { %7379 = vmatmul.msk.bf16.vlgmr.msrb.gmra.mxu0 %vm442_vm0, %v9431_v60  ;;  %7388 = vmatmul.msk.bf16.vlgmr.msrb.gmra.mxu1 %vm442_vm0, %v9431_v60 }
 0x5dc   : > { %7397 = vmatmul.msk.bf16.vlgmr.msrb.gmra.mxu2 %vm442_vm0, %v9431_v60  ;;  %7406 = vmatmul.msk.bf16.vlgmr.msrb.gmra.mxu3 %vm442_vm0, %v9431_v60 }
 0x608   : > { %v2025_v22 = vpop.f32.mrf.mxu0  ;;  %v2050_v23 = vpop.f32.mrf.mxu1 }
 0x609   : > { %v2619_v51 = vpack.c.bf16 %v2025_v22, %v2025_v22  ;;  %v2620_v52 = vpack.c.bf16 %v2050_v23, %v2050_v23 }
 0x60f   : > { %v2075_v24 = vpop.f32.mrf.mxu2  ;;  %v2100_v25 = vpop.f32.mrf.mxu3 }
 0x610   : > { %v2027_v26 = vpop.f32.mrf.mxu0  ;;  %v2052_v27 = vpop.f32.mrf.mxu1  ;;  %v2621_v58 = vpack.c.bf16 %v2075_v24, %v2075_v24  ;;  %v2622_v59 = vpack.c.bf16 %v2100_v25, %v2100_v25 }
 0x617   : > { %v2077_v28 = vpop.f32.mrf.mxu2  ;;  %v2102_v29 = vpop.f32.mrf.mxu3 }
 0x618   : > { %v2128_v30 = vpop.f32.mrf.mxu0  ;;  %v2153_v31 = vpop.f32.mrf.mxu1 }
 0x619   : > { %v2623_v8 = vpack.c.bf16 %v2128_v30, %v2128_v30  ;;  %v2624_v9 = vpack.c.bf16 %v2153_v31, %v2153_v31 }
 0x61f   : > { %v9545_v32 = vpop.f32.mrf.mxu2  ;;  %v9547_v33 = vpop.f32.mrf.mxu3 }
 0x620   : > { %v2130_v34 = vpop.f32.mrf.mxu0  ;;  %v2155_v35 = vpop.f32.mrf.mxu1  ;;  %v2625_v15 = vpack.c.bf16 %v9545_v32, %v9545_v32  ;;  %v2626_v16 = vpack.c.bf16 %v9547_v33, %v9547_v33 }
 0x627   : > { %v2180_v37 = vpop.f32.mrf.mxu2  ;;  %v2205_v38 = vpop.f32.mrf.mxu3 }
 0x628   : > { %v2228_v39 = vpop.f32.mrf.mxu0  ;;  %v2253_v40 = vpop.f32.mrf.mxu1 }
 0x629   : > { %v2627_v41 = vpack.c.bf16 %v2228_v39, %v2228_v39  ;;  %v2628_v42 = vpack.c.bf16 %v2253_v40, %v2253_v40 }
 0x62b   : > { %v2639_v43 = vsel %vm1234_vm8, %v2627_v41, 0  ;;  %v2658_v44 = vsel %vm1234_vm8, %v2628_v42, 0 }
 0x62c   : > { %2648 = vmatpush.bf16.xpose.msra.mxu0 %v2639_v43  ;;  %2667 = vmatpush.bf16.xpose.msra.mxu1 %v2658_v44 }
 0x62f   : > { %v2278_v45 = vpop.f32.mrf.mxu2  ;;  %v2303_v46 = vpop.f32.mrf.mxu3 }
 0x630   : > { %v2629_v47 = vpack.c.bf16 %v2278_v45, %v2278_v45  ;;  %v2630_v48 = vpack.c.bf16 %v2303_v46, %v2303_v46  ;;  %v2230_v49 = vpop.f32.mrf.mxu0  ;;  %v2255_v50 = vpop.f32.mrf.mxu1 }
 0x632   : > { %v2677_v54 = vsel %vm1234_vm8, %v2629_v47, 0  ;;  %v2696_v55 = vsel %vm1234_vm8, %v2630_v48, 0 }
 0x633   : > { %2686 = vmatpush.bf16.xpose.msra.mxu2 %v2677_v54  ;;  %2705 = vmatpush.bf16.xpose.msra.mxu3 %v2696_v55 }
 0x634   : > { %7417 = vmatmul.msk.bf16.vlgmr.msra.gmra.mxu0 %vm1234_vm8, %v2619_v51  ;;  %7418 = vmatmul.msk.bf16.vlgmr.msra.gmra.mxu1 %vm1234_vm8, %v2620_v52 }
 0x637   : > { %v2280_v56 = vpop.f32.mrf.mxu2  ;;  %v2305_v57 = vpop.f32.mrf.mxu3 }
 0x638   : > { %v2328_v60 = vpop.f32.mrf.mxu0  ;;  %v2353_v61 = vpop.f32.mrf.mxu1 }
 0x639   : > { %v2631_v62 = vpack.c.bf16 %v2328_v60, %v2328_v60  ;;  %v2632_v0 = vpack.c.bf16 %v2353_v61, %v2353_v61 }
 0x63a   : > { %7419 = vmatmul.msk.bf16.vlgmr.msra.gmra.mxu2 %vm1234_vm8, %v2621_v58  ;;  %7420 = vmatmul.msk.bf16.vlgmr.msra.gmra.mxu3 %vm1234_vm8, %v2622_v59 }
 0x63b   : > { %v2715_v63 = vsel %vm1234_vm8, %v2631_v62, 0  ;;  %v2734_v1 = vsel %vm1234_vm8, %v2632_v0, 0 }
 0x63c   : > { %2724 = vmatpush.bf16.xpose.msrb.mxu0 %v2715_v63  ;;  %2743 = vmatpush.bf16.xpose.msrb.mxu1 %v2734_v1 }
 0x63f   : > { %v2378_v2 = vpop.f32.mrf.mxu2  ;;  %v2403_v3 = vpop.f32.mrf.mxu3 }
 0x640   : > { %v2633_v4 = vpack.c.bf16 %v2378_v2, %v2378_v2  ;;  %v2634_v5 = vpack.c.bf16 %v2403_v3, %v2403_v3  ;;  %v2330_v6 = vpop.f32.mrf.mxu0  ;;  %v2355_v7 = vpop.f32.mrf.mxu1 }
 0x642   : > { %v2753_v11 = vsel %vm1234_vm8, %v2633_v4, 0  ;;  %v2772_v12 = vsel %vm1234_vm8, %v2634_v5, 0 }
 0x643   : > { %2762 = vmatpush.bf16.xpose.msrb.mxu2 %v2753_v11  ;;  %2781 = vmatpush.bf16.xpose.msrb.mxu3 %v2772_v12 }
 0x644   : > { %7421 = vmatmul.msk.bf16.vlgmr.msrb.gmra.mxu0 %vm1234_vm8, %v2623_v8  ;;  %7422 = vmatmul.msk.bf16.vlgmr.msrb.gmra.mxu1 %vm1234_vm8, %v2624_v9 }
 0x647   : > { %v2380_v13 = vpop.f32.mrf.mxu2  ;;  %v2405_v14 = vpop.f32.mrf.mxu3 }
 0x648   : > { %v2428_v17 = vpop.f32.mrf.mxu0  ;;  %v2453_v18 = vpop.f32.mrf.mxu1 }
 0x649   : > { %v2891_v19 = vpack.c.bf16 %v2428_v17, %v2428_v17  ;;  %v2892_v20 = vpack.c.bf16 %v2453_v18, %v2453_v18 }
 0x64a   : > { %7423 = vmatmul.msk.bf16.vlgmr.msrb.gmra.mxu2 %vm1234_vm8, %v2625_v15  ;;  %7424 = vmatmul.msk.bf16.vlgmr.msrb.gmra.mxu3 %vm1234_vm8, %v2626_v16 }
 0x64b   : > { %v2903_v21 = vsel %vm1502_vm9, %v2891_v19, 0  ;;  %v2922_v22 = vsel %vm1502_vm9, %v2892_v20, 0 }
 0x64c   : > { %2912 = vmatpush.bf16.msra.mxu0 %v2903_v21  ;;  %2931 = vmatpush.bf16.msra.mxu1 %v2922_v22 }
 0x64f   : > { %v2478_v23 = vpop.f32.mrf.mxu2  ;;  %v2503_v24 = vpop.f32.mrf.mxu3 }
 0x650   : > { %v2893_v25 = vpack.c.bf16 %v2478_v23, %v2478_v23  ;;  %v2894_v26 = vpack.c.bf16 %v2503_v24, %v2503_v24  ;;  %v2430_v27 = vpop.f32.mrf.mxu0  ;;  %v2455_v28 = vpop.f32.mrf.mxu1 }
 0x652   : > { %v2941_v29 = vsel %vm1502_vm9, %v2893_v25, 0  ;;  %v2960_v30 = vsel %vm1502_vm9, %v2894_v26, 0 }
 0x653   : > { %2950 = vmatpush.bf16.msra.mxu2 %v2941_v29  ;;  %2969 = vmatpush.bf16.msra.mxu3 %v2960_v30 }
 0x657   : > { %v2480_v31 = vpop.f32.mrf.mxu2  ;;  %v2505_v32 = vpop.f32.mrf.mxu3 }
 0x658   : > { %v2528_v33 = vpop.f32.mrf.mxu0  ;;  %v2553_v34 = vpop.f32.mrf.mxu1 }
 0x659   : > { %v2895_v35 = vpack.c.bf16 %v2528_v33, %v2528_v33  ;;  %v2896_v37 = vpack.c.bf16 %v2553_v34, %v2553_v34 }
 0x65b   : > { %v2979_v38 = vsel %vm1502_vm9, %v2895_v35, 0  ;;  %v2998_v39 = vsel %vm1502_vm9, %v2896_v37, 0 }
 0x65c   : > { %2988 = vmatpush.bf16.msrb.mxu0 %v2979_v38  ;;  %3007 = vmatpush.bf16.msrb.mxu1 %v2998_v39 }
 0x65f   : > { %v2578_v40 = vpop.f32.mrf.mxu2  ;;  %v2603_v41 = vpop.f32.mrf.mxu3 }
 0x660   : > { %v2897_v42 = vpack.c.bf16 %v2578_v40, %v2578_v40  ;;  %v2898_v43 = vpack.c.bf16 %v2603_v41, %v2603_v41  ;;  %v2530_v44 = vpop.f32.mrf.mxu0  ;;  %v2555_v45 = vpop.f32.mrf.mxu1 }
 0x662   : > { %v3017_v46 = vsel %vm1502_vm9, %v2897_v42, 0  ;;  %v3036_v47 = vsel %vm1502_vm9, %v2898_v43, 0 }
 0x663   : > { %3026 = vmatpush.bf16.msrb.mxu2 %v3017_v46  ;;  %3045 = vmatpush.bf16.msrb.mxu3 %v3036_v47 }
 0x667   : > { %v2580_v48 = vpop.f32.mrf.mxu2  ;;  %v2605_v49 = vpop.f32.mrf.mxu3 }
 0x6b1   : > { %v2650_v50 = vpop.f32.mrf.mxu0  ;;  %v2669_v51 = vpop.f32.mrf.mxu1 }
 0x6b2   : > { %v2787_v52 = vmul.f32 0.35355338, %v2650_v50  ;;  %v2788_v1 = vmul.f32 0.35355338, %v2669_v51 }
 0x6b4   : > { %v2795_v54 = vsel %vm1234_vm8, %v2787_v52, -inf  ;;  %v2798_v4 = vsel %vm1234_vm8, %v2788_v1, -inf }
 0x6b5   : > { %2796 = vmax.xlane.f32.xlu2 %v2795_v54 }
 0x6b9   : > { %v2652_v55 = vpop.f32.mrf.mxu0  ;;  %v2671_v56 = vpop.f32.mrf.mxu1 }
 0x6bd   : > { %v2688_v57 = vpop.f32.mrf.mxu2  ;;  %v2707_v58 = vpop.f32.mrf.mxu3 }
 0x6be   : > { %v2789_v59 = vmul.f32 0.35355338, %v2688_v57  ;;  %v2790_v60 = vmul.f32 0.35355338, %v2707_v58 }
 0x6c0   : > { %v2804_v61 = vsel %vm1234_vm8, %v2790_v60, -inf  ;;  %v2801_v62 = vsel %vm1234_vm8, %v2789_v59, -inf }
 0x6c1   : > { %2805 = vmax.xlane.f32.xlu1 %v2804_v61  ;;  %2802 = vmax.xlane.f32.xlu0 %v2801_v62  ;;  %v2726_v0 = vpop.f32.mrf.mxu0  ;;  %v2745_v63 = vpop.f32.mrf.mxu1 }
 0x6c2   : > { %v2791_v7 = vmul.f32 0.35355338, %v2726_v0  ;;  %v2792_v16 = vmul.f32 0.35355338, %v2745_v63 }
 0x6c4   : > { %v2807_v15 = vsel %vm1234_vm8, %v2791_v7, -inf  ;;  %v2810_v19 = vsel %vm1234_vm8, %v2792_v16, -inf }
 0x6c5   : > { %v2690_v2 = vpop.f32.mrf.mxu2  ;;  %v2709_v3 = vpop.f32.mrf.mxu3 }
 0x6c9   : > { %2799 = vmax.xlane.f32.xlu0 %v2798_v4  ;;  %v2728_v5 = vpop.f32.mrf.mxu0  ;;  %v2747_v6 = vpop.f32.mrf.mxu1 }
 0x6cd   : > { %v2764_v8 = vpop.f32.mrf.mxu2  ;;  %v2783_v9 = vpop.f32.mrf.mxu3 }
 0x6ce   : > { %v2793_v11 = vmul.f32 0.35355338, %v2764_v8  ;;  %v2794_v12 = vmul.f32 0.35355338, %v2783_v9 }
 0x6d0   : > { %v2813_v13 = vsel %vm1234_vm8, %v2793_v11, -inf  ;;  %v2816_v14 = vsel %vm1234_vm8, %v2794_v12, -inf }
 0x6d1   : > { %2814 = vmax.xlane.f32.xlu1 %v2813_v13  ;;  %2817 = vmax.xlane.f32.xlu2 %v2816_v14 }
 0x6d2   : > { %2808 = vmax.xlane.f32.xlu0 %v2807_v15 }
 0x6d5   : > { %v2766_v17 = vpop.f32.mrf.mxu2  ;;  %v2785_v18 = vpop.f32.mrf.mxu3 }
 0x6d9   : > { %2811 = vmax.xlane.f32.xlu1 %v2810_v19 }
 0x728   : > { %v2797_v20 = vpop.xlane.xlu2 %2796 }
 0x729   : > { %v2819_v21 = vsub.f32 %v2787_v52, %v2797_v20 }
 0x72b   : > { %v2827_v22 = vmul.f32 1.442695, %v2819_v21 }
 0x72d   : > { %8628 = vpow2.f32 %v2827_v22 }
 0x733   : > { %v8629_v23 = vpop.eup %8628 }
 0x734   : > { %v2806_v24 = vpop.xlane.xlu1 %2805  ;;  %v2803_v25 = vpop.xlane.xlu0 %2802  ;;  %v2843_v26 = vsel %vm1234_vm8, %v8629_v23, 0.0 }
 0x735   : > { %v2822_v27 = vsub.f32 %v2790_v60, %v2806_v24  ;;  %v2821_v28 = vsub.f32 %v2789_v59, %v2803_v25  ;;  %2844 = vadd.xlane.f32.xlu1 %v2843_v26 }
 0x737   : > { %v2833_v29 = vmul.f32 1.442695, %v2822_v27  ;;  %v2831_v30 = vmul.f32 1.442695, %v2821_v28 }
 0x739   : > { %8630 = vpow2.f32 %v2833_v29 }
 0x73a   : > { %8632 = vpow2.f32 %v2831_v30 }
 0x73c   : > { %v2800_v31 = vpop.xlane.xlu0 %2799 }
 0x73d   : > { %v2820_v32 = vsub.f32 %v2788_v1, %v2800_v31  ;;  %v7407_v31 = vld [vmem:[%s10606_s5 + $0x20] sm:$0xf] }
 0x73f   : > { %v8631_v33 = vpop.eup %8630  ;;  %v2829_v34 = vmul.f32 1.442695, %v2820_v32  ;;  %v3063_v32 = vsel %vm1502_vm9, %v7407_v31, 0 }
 0x740   : > { %v8633_v35 = vpop.eup %8632  ;;  %v2852_v37 = vsel %vm1234_vm8, %v8631_v33, 0.0 }
 0x741   : > { %8634 = vpow2.f32 %v2829_v34  ;;  %v2849_v38 = vsel %vm1234_vm8, %v8633_v35, 0.0  ;;  %2853 = vadd.xlane.f32.xlu0 %v2852_v37  ;;  %v7410_v34 = vld [vmem:[%s10606_s5 + $0x2c] sm:$0xf] }
 0x742   : > { %2850 = vadd.xlane.f32.xlu2 %v2849_v38  ;;  %v3120_v37 = vsel %vm1502_vm9, %v7410_v34, 0  ;;  %v7408_v38 = vld [vmem:[%s10606_s5 + $0x24] sm:$0xf] }
 0x744   : > { %v2815_v39 = vpop.xlane.xlu1 %2814  ;;  %v2818_v40 = vpop.xlane.xlu2 %2817 }
 0x745   : > { %v2825_v41 = vsub.f32 %v2793_v11, %v2815_v39  ;;  %v2826_v42 = vsub.f32 %v2794_v12, %v2818_v40  ;;  %v2809_v43 = vpop.xlane.xlu0 %2808  ;;  %v3082_v39 = vsel %vm1502_vm9, %v7408_v38, 0  ;;  %v7411_v40 = vld [vmem:[%s10606_s5 + $0x30] sm:$0xf] }
 0x746   : > { %v2823_v44 = vsub.f32 %v2791_v7, %v2809_v43 }
 0x747   : > { %v8635_v45 = vpop.eup %8634  ;;  %v2839_v46 = vmul.f32 1.442695, %v2825_v41  ;;  %v2841_v47 = vmul.f32 1.442695, %v2826_v42  ;;  %v3139_v41 = vsel %vm1502_vm9, %v7411_v40, 0 }
 0x748   : > { %v2835_v48 = vmul.f32 1.442695, %v2823_v44  ;;  %v2846_v49 = vsel %vm1234_vm8, %v8635_v45, 0.0  ;;  %v7413_v42 = vld [vmem:[%s10606_s5 + $0x38] sm:$0xf] }
 0x749   : > { %8636 = vpow2.f32 %v2839_v46  ;;  %v3177_v44 = vsel %vm1502_vm9, %v7413_v42, 0  ;;  %v7414_v46 = vld [vmem:[%s10606_s5 + $0x3c] sm:$0xf] }
 0x74a   : > { %8638 = vpow2.f32 %v2841_v47  ;;  %2847 = vadd.xlane.f32.xlu2 %v2846_v49  ;;  %v3196_v47 = vsel %vm1502_vm9, %v7414_v46, 0 }
 0x74b   : > { %8640 = vpow2.f32 %v2835_v48  ;;  %v7412_v48 = vld [vmem:[%s10606_s5 + $0x34] sm:$0xf] }
 0x74c   : > { %v2812_v50 = vpop.xlane.xlu1 %2811  ;;  %v3158_v49 = vsel %vm1502_vm9, %v7412_v48, 0 }
 0x74d   : > { %v2824_v51 = vsub.f32 %v2792_v16, %v2812_v50 }
 0x74f   : > { %v8637_v52 = vpop.eup %8636  ;;  %v2837_v54 = vmul.f32 1.442695, %v2824_v51 }
 0x750   : > { %v8639_v55 = vpop.eup %8638  ;;  %v2861_v56 = vsel %vm1234_vm8, %v8637_v52, 0.0 }
 0x751   : > { %v8641_v57 = vpop.eup %8640  ;;  %8642 = vpow2.f32 %v2837_v54  ;;  %v2864_v58 = vsel %vm1234_vm8, %v8639_v55, 0.0  ;;  %2862 = vadd.xlane.f32.xlu0 %v2861_v56 }
 0x752   : > { %2865 = vadd.xlane.f32.xlu1 %v2864_v58  ;;  %v2855_v59 = vsel %vm1234_vm8, %v8641_v57, 0.0 }
 0x753   : > { %2856 = vadd.xlane.f32.xlu2 %v2855_v59 }
 0x757   : > { %v8643_v60 = vpop.eup %8642 }
 0x758   : > { %v2858_v61 = vsel %vm1234_vm8, %v8643_v60, 0.0 }
 0x759   : > { %2859 = vadd.xlane.f32.xlu0 %v2858_v61 }
 0x7a8   : > { %v2845_v62 = vpop.xlane.xlu1 %2844 }
 0x7a9   : > { %8644 = vrcp.f32 %v2845_v62 }
 0x7af   : > { %v8645_v0 = vpop.eup %8644 }
 0x7b0   : > { %v2875_v63 = vmul.f32 %v8645_v0, %v8629_v23 }
 0x7b2   : > { %v2883_v1 = vpack.c.bf16 %v2875_v63, %v2875_v63 }
 0x7b4   : > { %7425 = vmatmul.msk.bf16.vlgmr.msra.gmra.mxu0 %vm1234_vm8, %v2883_v1  ;;  %v2854_v2 = vpop.xlane.xlu0 %2853 }
 0x7b5   : > { %v2851_v3 = vpop.xlane.xlu2 %2850  ;;  %8646 = vrcp.f32 %v2854_v2  ;;  %3072 = vmatpush.bf16.msra.mxu0 %v3063_v32 }
 0x7b6   : > { %8648 = vrcp.f32 %v2851_v3 }
 0x7bb   : > { %v8647_v4 = vpop.eup %8646 }
 0x7bc   : > { %v8649_v5 = vpop.eup %8648  ;;  %v2878_v6 = vmul.f32 %v8647_v4, %v8631_v33  ;;  %v7409_v33 = vld [vmem:[%s10606_s5 + $0x28] sm:$0xf] }
 0x7bd   : > { %v2877_v7 = vmul.f32 %v8649_v5, %v8633_v35  ;;  %v2848_v8 = vpop.xlane.xlu2 %2847  ;;  %v3101_v35 = vsel %vm1502_vm9, %v7409_v33, 0 }
 0x7be   : > { %v2886_v9 = vpack.c.bf16 %v2878_v6, %v2878_v6  ;;  %8650 = vrcp.f32 %v2848_v8 }
 0x7bf   : > { %v2885_v11 = vpack.c.bf16 %v2877_v7, %v2877_v7 }
 0x7c0   : > { %7428 = vmatmul.msk.bf16.vlgmr.msra.gmra.mxu3 %vm1234_vm8, %v2886_v9 }
 0x7c1   : > { %7427 = vmatmul.msk.bf16.vlgmr.msra.gmra.mxu2 %vm1234_vm8, %v2885_v11  ;;  %3129 = vmatpush.bf16.msra.mxu3 %v3120_v37 }
 0x7c2   : > { %3110 = vmatpush.bf16.msra.mxu2 %v3101_v35 }
 0x7c4   : > { %v8651_v12 = vpop.eup %8650  ;;  %v2863_v13 = vpop.xlane.xlu0 %2862 }
 0x7c5   : > { %v2876_v14 = vmul.f32 %v8651_v12, %v8635_v45  ;;  %v2866_v15 = vpop.xlane.xlu1 %2865  ;;  %8652 = vrcp.f32 %v2863_v13 }
 0x7c6   : > { %8654 = vrcp.f32 %v2866_v15  ;;  %v2857_v16 = vpop.xlane.xlu2 %2856 }
 0x7c7   : > { %v2884_v17 = vpack.c.bf16 %v2876_v14, %v2876_v14  ;;  %8656 = vrcp.f32 %v2857_v16 }
 0x7c9   : > { %7426 = vmatmul.msk.bf16.vlgmr.msra.gmra.mxu1 %vm1234_vm8, %v2884_v17 }
 0x7ca   : > { %3091 = vmatpush.bf16.msra.mxu1 %v3082_v39 }
 0x7cb   : > { %v8653_v18 = vpop.eup %8652 }
 0x7cc   : > { %v8655_v19 = vpop.eup %8654  ;;  %v2881_v20 = vmul.f32 %v8653_v18, %v8637_v52  ;;  %v2860_v21 = vpop.xlane.xlu0 %2859 }
 0x7cd   : > { %v8657_v22 = vpop.eup %8656  ;;  %v2882_v23 = vmul.f32 %v8655_v19, %v8639_v55  ;;  %8658 = vrcp.f32 %v2860_v21 }
 0x7ce   : > { %v2879_v24 = vmul.f32 %v8657_v22, %v8641_v57  ;;  %v2889_v25 = vpack.c.bf16 %v2881_v20, %v2881_v20  ;;  %v8558_v20 = vld [vmem:[%s10607_s6 + $0x2] ss:$0 sm:$0xff] }
 0x7cf   : > { %v2890_v26 = vpack.c.bf16 %v2882_v23, %v2882_v23 }
 0x7d0   : > { %v2887_v27 = vpack.c.bf16 %v2879_v24, %v2879_v24 }
 0x7d1   : > { %7431 = vmatmul.msk.bf16.vlgmr.msrb.gmra.mxu2 %vm1234_vm8, %v2889_v25  ;;  %7432 = vmatmul.msk.bf16.vlgmr.msrb.gmra.mxu3 %vm1234_vm8, %v2890_v26 }
 0x7d2   : > { %7429 = vmatmul.msk.bf16.vlgmr.msrb.gmra.mxu0 %vm1234_vm8, %v2887_v27  ;;  %3186 = vmatpush.bf16.msrb.mxu2 %v3177_v44 }
 0x7d3   : > { %v8659_v28 = vpop.eup %8658  ;;  %3148 = vmatpush.bf16.msrb.mxu0 %v3139_v41  ;;  %3205 = vmatpush.bf16.msrb.mxu3 %v3196_v47 }
 0x7d4   : > { %v2880_v29 = vmul.f32 %v8659_v28, %v8643_v60 }
 0x7d6   : > { %v2888_v30 = vpack.c.bf16 %v2880_v29, %v2880_v29 }
 0x7d9   : > { %7430 = vmatmul.msk.bf16.vlgmr.msrb.gmra.mxu1 %vm1234_vm8, %v2888_v30 }
 0x7da   : > { %3167 = vmatpush.bf16.msrb.mxu1 %v3158_v49 }
 0x831   : > { %v2914_v43 = vpop.f32.mrf.mxu0 }
 0x832   : > { %v3051_v45 = vpack.c.bf16 %v2914_v43, %v2914_v43 }
 0x834   : > { %7433 = vmatmul.msk.bf16.vlgmr.msra.gmra.mxu0 %vm1234_vm8, %v3051_v45 }
 0x839   : > { %v2916_v50 = vpop.f32.mrf.mxu0 }
 0x843   : > { %v2971_v51 = vpop.f32.mrf.mxu3 }
 0x844   : > { %v2952_v52 = vpop.f32.mrf.mxu2  ;;  %v3054_v54 = vpack.c.bf16 %v2971_v51, %v2971_v51 }
 0x845   : > { %v3053_v55 = vpack.c.bf16 %v2952_v52, %v2952_v52 }
 0x846   : > { %v2933_v56 = vpop.f32.mrf.mxu1  ;;  %7436 = vmatmul.msk.bf16.vlgmr.msra.gmra.mxu3 %vm1234_vm8, %v3054_v54 }
 0x847   : > { %v3052_v57 = vpack.c.bf16 %v2933_v56, %v2933_v56  ;;  %7435 = vmatmul.msk.bf16.vlgmr.msra.gmra.mxu2 %vm1234_vm8, %v3053_v55 }
 0x849   : > { %7434 = vmatmul.msk.bf16.vlgmr.msra.gmra.mxu1 %vm1234_vm8, %v3052_v57 }
 0x84b   : > { %v2973_v58 = vpop.f32.mrf.mxu3 }
 0x84c   : > { %v2954_v59 = vpop.f32.mrf.mxu2  ;;  %v8386_v58 = vld [vmem:[%s10608_s7 + $0x8] sm:$0xff] }
 0x84d   : > { %3358 = vmatpush.bf16.msra.mxu0 %v8386_v58  ;;  %v8385_v59 = vld [vmem:[%s10608_s7] sm:$0xff] }
 0x84e   : > { %v2935_v60 = vpop.f32.mrf.mxu1 }
 0x84f   : > { %v2990_v61 = vpop.f32.mrf.mxu0 }
 0x850   : > { %v3055_v62 = vpack.c.bf16 %v2990_v61, %v2990_v61 }
 0x851   : > { %3359 = vmatpush.bf16.msra.mxu0 %v8385_v59  ;;  %v8389_v59 = vld [vmem:[%s10610_s9] sm:$0xff] }
 0x852   : > { %7437 = vmatmul.msk.bf16.vlgmr.msrb.gmra.mxu0 %vm1234_vm8, %v3055_v62 }
 0x854   : > { %v3028_v0 = vpop.f32.mrf.mxu2  ;;  %v3047_v63 = vpop.f32.mrf.mxu3 }
 0x855   : > { %v3057_v1 = vpack.c.bf16 %v3028_v0, %v3028_v0  ;;  %v3058_v2 = vpack.c.bf16 %v3047_v63, %v3047_v63  ;;  %v8388_v0 = vld [vmem:[%s10608_s7 + $0x18] sm:$0xff] }
 0x856   : > { %v3009_v3 = vpop.f32.mrf.mxu1  ;;  %3386 = vmatpush.bf16.msra.mxu1 %v8388_v0 }
 0x857   : > { %v2992_v4 = vpop.f32.mrf.mxu0  ;;  %v3056_v5 = vpack.c.bf16 %v3009_v3, %v3009_v3  ;;  %7439 = vmatmul.msk.bf16.vlgmr.msrb.gmra.mxu2 %vm1234_vm8, %v3057_v1  ;;  %7440 = vmatmul.msk.bf16.vlgmr.msrb.gmra.mxu3 %vm1234_vm8, %v3058_v2  ;;  %v8387_v1 = vld [vmem:[%s10608_s7 + $0x10] sm:$0xff] }
 0x859   : > { %7438 = vmatmul.msk.bf16.vlgmr.msrb.gmra.mxu1 %vm1234_vm8, %v3056_v5 }
 0x85a   : > { %3387 = vmatpush.bf16.msra.mxu1 %v8387_v1 }
 0x85c   : > { %v3030_v6 = vpop.f32.mrf.mxu2  ;;  %v3049_v7 = vpop.f32.mrf.mxu3 }
 0x85e   : > { %v3011_v8 = vpop.f32.mrf.mxu1 }
 0x8b1   : > { %v3074_v9 = vpop.f32.mrf.mxu0 }
 0x8b2   : > { %v3211_v14 = vsel %vm442_vm0, %v3074_v9, 0.0 }
 0x8b9   : > { %v3076_v11 = vpop.f32.mrf.mxu0 }
 0x8ba   : > { %v8560_v11 = vld [vmem:[%s10625_s2 + $0x3] ss:$0 sm:$0xff] }
 0x8c6   : > { %v3093_v12 = vpop.f32.mrf.mxu1 }
 0x8c7   : > { %v3212_v13 = vsel %vm442_vm0, %v3093_v12, 0.0 }
 0x8c8   : > { %v3213_v16 = vadd.f32 %v3212_v13, %v3211_v14  ;;  %v8561_v13 = vld [vmem:[%s10626_s3 + $0x3] ss:$0 sm:$0xff] }
 0x8c9   : > { %v3131_v15 = vpop.f32.mrf.mxu3 }
 0x8ca   : > { %v3112_v17 = vpop.f32.mrf.mxu2  ;;  %v3216_v21 = vsel %vm442_vm0, %v3131_v15, 0.0 }
 0x8cb   : > { %v3214_v18 = vsel %vm442_vm0, %v3112_v17, 0.0 }
 0x8cc   : > { %v3215_v19 = vadd.f32 %v3214_v18, %v3213_v16 }
 0x8ce   : > { %v3217_v22 = vadd.f32 %v3216_v21, %v3215_v19  ;;  %v3095_v23 = vpop.f32.mrf.mxu1 }
 0x8cf   : > { %v3150_v24 = vpop.f32.mrf.mxu0 }
 0x8d0   : > { %v3231_v25 = vadd.f32 %v8558_v20, %v3217_v22  ;;  %v3218_v33 = vsel %vm442_vm0, %v3150_v24, 0.0  ;;  %v8562_v24 = vld [vmem:[%s10625_s2 + $0x4] ss:$0 sm:$0xff] }
 0x8d1   : > { %v3133_v26 = vpop.f32.mrf.mxu3 }
 0x8d2   : > { %v3114_v27 = vpop.f32.mrf.mxu2  ;;  %v9649_v28 = vadd.f32 %v3231_v25, %v9308_v36  ;;  %v8559_v36 = vld [vmem:[%s10607_s6 + $0x3] ss:$0 sm:$0xff]  ;;  %v8563_v26 = vld [vmem:[%s10626_s3 + $0x4] ss:$0 sm:$0xff] }
 0x8d4   : > { %v3269_v29 = vsel %vm442_vm0, %v9649_v28, 0.0 }
 0x8d5   : > { %3270 = vadd.xlane.f32.xlu1 %v3269_v29 }
 0x8d6   : > { %v3169_v30 = vpop.f32.mrf.mxu1 }
 0x8d7   : > { %v3152_v31 = vpop.f32.mrf.mxu0  ;;  %v3219_v32 = vsel %vm442_vm0, %v3169_v30, 0.0 }
 0x8d8   : > { %v3220_v34 = vadd.f32 %v3219_v32, %v3218_v33  ;;  %v8564_v32 = vld [vmem:[%s10609_s8] ss:$0 sm:$0xff] }
 0x8da   : > { %v3188_v35 = vpop.f32.mrf.mxu2  ;;  %v3207_v37 = vpop.f32.mrf.mxu3 }
 0x8db   : > { %v3221_v38 = vsel %vm442_vm0, %v3188_v35, 0.0  ;;  %v3223_v40 = vsel %vm442_vm0, %v3207_v37, 0.0 }
 0x8dc   : > { %v3222_v39 = vadd.f32 %v3221_v38, %v3220_v34 }
 0x8de   : > { %v3224_v41 = vadd.f32 %v3223_v40, %v3222_v39  ;;  %v3171_v42 = vpop.f32.mrf.mxu1 }
 0x8e0   : > { %v3232_v43 = vadd.f32 %v8559_v36, %v3224_v41  ;;  %v8392_v41 = vld [vmem:[%s10610_s9 + $0x18] sm:$0xff] }
 0x8e1   : > { %3521 = vmatpush.bf16.msra.mxu2 %v8392_v41 }
 0x8e2   : > { %v3190_v44 = vpop.f32.mrf.mxu2  ;;  %v3209_v45 = vpop.f32.mrf.mxu3  ;;  %v9661_v46 = vadd.f32 %v3232_v43, %v9320_v53 }
 0x8e4   : > { %v3272_v47 = vsel %vm442_vm0, %v9661_v46, 0.0 }
 0x8e5   : > { %3273 = vadd.xlane.f32.xlu2 %v3272_v47  ;;  %v8565_v47 = vld [vmem:[%s10609_s8 + $0x1] ss:$0 sm:$0xff] }
 0x948   : > { %v3271_v48 = vpop.xlane.xlu1 %3270 }
 0x949   : > { %v3275_v49 = vmul.f32 %v3271_v48, %v8976_v10  ;;  %v8391_v48 = vld [vmem:[%s10610_s9 + $0x10] sm:$0xff] }
 0x94a   : > { %3522 = vmatpush.bf16.msra.mxu2 %v8391_v48 }
 0x94b   : > { %v3277_v50 = vsub.f32 %v9649_v28, %v3275_v49 }
 0x94d   : > { %v3279_v51 = vmul.f32 %v3277_v50, %v3277_v50 }
 0x94f   : > { %v3281_v52 = vsel %vm442_vm0, %v3279_v51, 0.0 }
 0x950   : > { %3282 = vadd.xlane.f32.xlu0 %v3281_v52 }
 0x958   : > { %v3274_v54 = vpop.xlane.xlu2 %3273 }
 0x959   : > { %v3276_v55 = vmul.f32 %v3274_v54, %v8976_v10 }
 0x95b   : > { %v3278_v56 = vsub.f32 %v9661_v46, %v3276_v55  ;;  %v8390_v55 = vld [vmem:[%s10610_s9 + $0x8] sm:$0xff] }
 0x95c   : > { %3523 = vmatpush.bf16.msra.mxu2 %v8390_v55 }
 0x95d   : > { %v3280_v53 = vmul.f32 %v3278_v56, %v3278_v56 }
 0x95f   : > { %v3284_v57 = vsel %vm442_vm0, %v3280_v53, 0.0 }
 0x960   : > { %3285 = vadd.xlane.f32.xlu1 %v3284_v57  ;;  %3524 = vmatpush.bf16.msra.mxu2 %v8389_v59 }
 0x9c3   : > { %v3283_v60 = vpop.xlane.xlu0 %3282 }
 0x9c4   : > { %v3287_v61 = vmul.f32 %v3283_v60, %v8976_v10 }
 0x9c6   : > { %v3289_v62 = vadd.f32 1e-05, %v3287_v61 }
 0x9c8   : > { %8660 = vrsqrt.f32 %v3289_v62  ;;  %vm3297_vm2 = vweird.f32 %v3289_v62 }
 0x9ce   : > { %v8661_v63 = vpop.eup %8660 }
 0x9cf   : > { %v3292_v2 = vmul.f32 %v8661_v63, %v3289_v62  ;;  %vm3298_vm1 = vweird.f32 %v8661_v63 }
 0x9d0   : > { %vm3299_vm3 = vmor %vm3297_vm2, %vm3298_vm1 }
 0x9d1   : > { %v3293_v3 = vmul.f32 %v8661_v63, %v3292_v2  ;;  %v8396_v2 = vld [vmem:[%s10610_s9 + $0x38] sm:$0xff] }
 0x9d2   : > { %3561 = vmatpush.bf16.msra.mxu3 %v8396_v2 }
 0x9d3   : > { %v3294_v4 = vmul.f32 0.5, %v3293_v3  ;;  %v3286_v5 = vpop.xlane.xlu1 %3285 }
 0x9d4   : > { %v3288_v6 = vmul.f32 %v3286_v5, %v8976_v10 }
 0x9d5   : > { %v3295_v7 = vsub.f32 1.5, %v3294_v4 }
 0x9d6   : > { %v3290_v8 = vadd.f32 1e-05, %v3288_v6 }
 0x9d7   : > { %v3296_v9 = vmul.f32 %v8661_v63, %v3295_v7 }
 0x9d8   : > { %8662 = vrsqrt.f32 %v3290_v8  ;;  %vm3307_vm5 = vweird.f32 %v3290_v8 }
 0x9d9   : > { %v3300_v12 = vsel %vm3299_vm3, %v8661_v63, %v3296_v9  ;;  %v8395_v9 = vld [vmem:[%s10610_s9 + $0x30] sm:$0xff] }
 0x9da   : > { %v3311_v14 = vmul.f32 %v3300_v12, %v3277_v50  ;;  %3562 = vmatpush.bf16.msra.mxu3 %v8395_v9 }
 0x9dc   : > { %v3319_v15 = vmul.f32 %v8560_v11, %v3311_v14 }
 0x9de   : > { %v8663_v16 = vpop.eup %8662  ;;  %v3327_v17 = vadd.f32 %v8561_v13, %v3319_v15 }
 0x9df   : > { %v3302_v18 = vmul.f32 %v8663_v16, %v3290_v8  ;;  %vm3308_vm4 = vweird.f32 %v8663_v16 }
 0x9e0   : > { %v3329_v19 = vpack.c.bf16 %v3327_v17, %v3327_v17  ;;  %vm3309_vm6 = vmor %vm3307_vm5, %vm3308_vm4 }
 0x9e1   : > { %v3303_v20 = vmul.f32 %v8663_v16, %v3302_v18 }
 0x9e2   : > { %7453 = vmatmul.msk.bf16.vlgmr.msra.gmra.mxu0 %vm442_vm0, %v3329_v19 }
 0x9e3   : > { %v3304_v21 = vmul.f32 0.5, %v3303_v20 }
 0x9e5   : > { %v3305_v22 = vsub.f32 1.5, %v3304_v21 }
 0x9e7   : > { %v3306_v23 = vmul.f32 %v8663_v16, %v3305_v22 }
 0x9e9   : > { %v3310_v25 = vsel %vm3309_vm6, %v8663_v16, %v3306_v23  ;;  %v8394_v16 = vld [vmem:[%s10610_s9 + $0x28] sm:$0xff]  ;;  %v8393_v23 = vld [vmem:[%s10610_s9 + $0x20] sm:$0xff] }
 0x9ea   : > { %v3312_v27 = vmul.f32 %v3310_v25, %v3278_v56  ;;  %3563 = vmatpush.bf16.msra.mxu3 %v8394_v16 }
 0x9ec   : > { %v3320_v29 = vmul.f32 %v8562_v24, %v3312_v27 }
 0x9ee   : > { %v3328_v30 = vadd.f32 %v8563_v26, %v3320_v29  ;;  %3564 = vmatpush.bf16.msra.mxu3 %v8393_v23 }
 0x9f0   : > { %v3330_v31 = vpack.c.bf16 %v3328_v30, %v3328_v30 }
 0x9f2   : > { %7462 = vmatmul.msk.bf16.vlgmr.msra.gmra.mxu1 %vm442_vm0, %v3330_v31 }
 0xa5f   : > { %v3361_v33 = vpop.f32.mrf.mxu0 }
 0xa60   : > { %v9702_v34 = vadd.f32 %v8564_v32, %v3361_v33 }
 0xa62   : > { %v9705_v35 = vmul.f32 0.70710677, %v9702_v34 }
 0xa64   : > { %v3397_v37 = vmul.f32 %v9705_v35, %v9705_v35 }
 0xa66   : > { %v3398_v38 = vmin.f32 %v3397_v37, 16.0 }
 0xa67   : > { %v3363_v39 = vpop.f32.mrf.mxu0 }
 0xa68   : > { %v3399_v36 = vmul.f32 2.1237322e-06, %v3398_v38  ;;  %v3410_v40 = vmul.f32 3.8918573e-05, %v3398_v38 }
 0xa6a   : > { %v3400_v42 = vadd.f32 0.00028619796, %v3399_v36  ;;  %v3411_v43 = vadd.f32 0.001143296, %v3410_v40 }
 0xa6c   : > { %v3401_v44 = vmul.f32 %v3400_v42, %v3398_v38  ;;  %v3412_v45 = vmul.f32 %v3411_v43, %v3398_v38 }
 0xa6e   : > { %v3402_v49 = vadd.f32 0.0036580483, %v3401_v44  ;;  %v3413_v50 = vadd.f32 0.014752088, %v3412_v45 }
 0xa6f   : > { %v3389_v51 = vpop.f32.mrf.mxu1 }
 0xa70   : > { %v3414_v52 = vmul.f32 %v3413_v50, %v3398_v38  ;;  %v9718_v54 = vadd.f32 %v8565_v47, %v3389_v51  ;;  %v3403_v56 = vmul.f32 %v3402_v49, %v3398_v38  ;;  %v3393_v47 = vmul.f32 0.5, %v9702_v34 }
 0xa72   : > { %v3415_v53 = vadd.f32 0.112945676, %v3414_v52  ;;  %v9724_v57 = vmul.f32 0.70710677, %v9718_v54  ;;  %v3404_v61 = vadd.f32 0.05243302, %v3403_v56 }
 0xa73   : > { %v3394_v2 = vmul.f32 0.5, %v9718_v54  ;;  %v8567_v54 = vld [vmem:[%s10611_s10 + $0x1] ss:$0 sm:$0xff] }
 0xa74   : > { %v3416_v58 = vmul.f32 %v3415_v53, %v3398_v38  ;;  %v3437_v60 = vmul.f32 %v9724_v57, %v9724_v57  ;;  %v3405_v5 = vmul.f32 %v3404_v61, %v3398_v38 }
 0xa76   : > { %v3417_v62 = vadd.f32 0.4994258, %v3416_v58  ;;  %v3438_v0 = vmin.f32 %v3437_v60, 16.0  ;;  %v3406_v13 = vadd.f32 0.18741608, %v3405_v5 }
 0xa77   : > { %v3391_v63 = vpop.f32.mrf.mxu1 }
 0xa78   : > { %v3418_v1 = vmul.f32 %v3417_v62, %v3398_v38  ;;  %v3439_v3 = vmul.f32 2.1237322e-06, %v3438_v0  ;;  %v3450_v4 = vmul.f32 3.8918573e-05, %v3438_v0  ;;  %v3407_v19 = vmul.f32 %v3406_v13, %v3398_v38 }
 0xa7a   : > { %v3419_v6 = vadd.f32 1.0, %v3418_v1  ;;  %v3440_v7 = vadd.f32 0.00028619796, %v3439_v3  ;;  %v3451_v8 = vadd.f32 0.001143296, %v3450_v4 }
 0xa7b   : > { %v3408_v26 = vadd.f32 1.1283791, %v3407_v19 }
 0xa7c   : > { %8664 = vrcp.f32 %v3419_v6  ;;  %v3441_v11 = vmul.f32 %v3440_v7, %v3438_v0  ;;  %v3452_v12 = vmul.f32 %v3451_v8, %v3438_v0  ;;  %v3431_v27 = vand.u32 2147483648, %v3419_v6 }
 0xa7d   : > { %v3429_v30 = vand.u32 2147483647, %v3419_v6  ;;  %vm3425_vm10 = vweird.f32 %v3419_v6  ;;  %v3409_v39 = vmul.f32 %v3408_v26, %v9705_v35  ;;  %v8400_v26 = vld [vmem:[%s10605_s4 + $0x318] sm:$0xff] }
 0xa7e   : > { %v3453_v14 = vadd.f32 0.014752088, %v3452_v12  ;;  %v3442_v15 = vadd.f32 0.0036580483, %v3441_v11  ;;  %v3432_v38 = vor.u32 1.1754944e-38, %v3431_v27  ;;  %v8402_v27 = vld [vmem:[%s10605_s4 + $0x328] sm:$0xff]  ;;  %3775 = vmatpush.bf16.msrb.mxu1 %v8400_v26 }
 0xa7f   : > { %vm3430_vm12 = vcmp.eq.f32.partialorder %v3429_v30, 8.507059e+37  ;;  %3800 = vmatpush.bf16.msrb.mxu2 %v8402_v27  ;;  %v8397_v30 = vld [vmem:[%s10605_s4 + $0x300] sm:$0xff]  ;;  %v8430_v26 = vld [vmem:[%s10605_s4 + $0x408] sm:$0xff]  ;;  %v8432_v27 = vld [vmem:[%s10605_s4 + $0x418] sm:$0xff] }
 0xa80   : > { %v3454_v17 = vmul.f32 %v3453_v14, %v3438_v0  ;;  %v3443_v22 = vmul.f32 %v3442_v15, %v3438_v0 }
 0xa82   : > { %v8665_v18 = vpop.eup %8664  ;;  %v3455_v21 = vadd.f32 0.112945676, %v3454_v17  ;;  %v3444_v32 = vadd.f32 0.05243302, %v3443_v22 }
 0xa83   : > { %v3421_v20 = vmul.f32 %v8665_v18, %v3419_v6  ;;  %vm3426_vm7 = vweird.f32 %v8665_v18  ;;  %v8566_v6 = vld [vmem:[%s10611_s10] ss:$0 sm:$0xff] }
 0xa84   : > { %v3456_v25 = vmul.f32 %v3455_v21, %v3438_v0  ;;  %vm3427_vm11 = vmor %vm3425_vm10, %vm3426_vm7  ;;  %v3445_v42 = vmul.f32 %v3444_v32, %v3438_v0  ;;  %v8401_v32 = vld [vmem:[%s10605_s4 + $0x320] sm:$0xff] }
 0xa85   : > { %v3422_v24 = vsub.f32 1.0, %v3421_v20  ;;  %3801 = vmatpush.bf16.msrb.mxu2 %v8401_v32  ;;  %v8431_v32 = vld [vmem:[%s10605_s4 + $0x410] sm:$0xff] }
 0xa86   : > { %v3457_v31 = vadd.f32 0.4994258, %v3456_v25  ;;  %v3446_v45 = vadd.f32 0.18741608, %v3445_v42  ;;  %v8398_v25 = vld [vmem:[%s10605_s4 + $0x308] sm:$0xff]  ;;  %v8412_v42 = vld [vmem:[%s10605_s4 + $0x378] sm:$0xff] }
 0xa87   : > { %v3423_v29 = vmul.f32 %v8665_v18, %v3422_v24  ;;  %3750 = vmatpush.bf16.msrb.mxu0 %v8398_v25  ;;  %v8427_v25 = vld [vmem:[%s10605_s4 + $0x3f0] sm:$0xff] }
 0xa88   : > { %v3458_v37 = vmul.f32 %v3457_v31, %v3438_v0  ;;  %v3447_v51 = vmul.f32 %v3446_v45, %v3438_v0  ;;  %v8399_v31 = vld [vmem:[%s10605_s4 + $0x310] sm:$0xff]  ;;  %v8405_v45 = vld [vmem:[%s10605_s4 + $0x340] sm:$0xff] }
 0xa89   : > { %v3424_v33 = vadd.f32 %v8665_v18, %v3423_v29  ;;  %v8404_v29 = vld [vmem:[%s10605_s4 + $0x338] sm:$0xff]  ;;  %3776 = vmatpush.bf16.msrb.mxu1 %v8399_v31  ;;  %v8429_v31 = vld [vmem:[%s10605_s4 + $0x400] sm:$0xff] }
 0xa8a   : > { %v3459_v40 = vadd.f32 1.0, %v3458_v37  ;;  %v3448_v53 = vadd.f32 1.1283791, %v3447_v51  ;;  %3825 = vmatpush.bf16.msrb.mxu3 %v8404_v29  ;;  %v8434_v29 = vld [vmem:[%s10605_s4 + $0x428] sm:$0xff] }
 0xa8b   : > { %v3428_v36 = vsel %vm3427_vm11, %v8665_v18, %v3424_v33  ;;  %v8403_v33 = vld [vmem:[%s10605_s4 + $0x330] sm:$0xff]  ;;  %3751 = vmatpush.bf16.msrb.mxu0 %v8397_v30  ;;  %v8436_v30 = vld [vmem:[%s10605_s4 + $0x438] sm:$0xff] }
 0xa8c   : > { %v3433_v41 = vsel %vm3430_vm12, %v3432_v38, %v3428_v36  ;;  %8666 = vrcp.f32 %v3459_v40  ;;  %v3471_v35 = vand.u32 2147483648, %v3459_v40  ;;  %v3469_v59 = vand.u32 2147483647, %v3459_v40  ;;  %v8406_v36 = vld [vmem:[%s10605_s4 + $0x348] sm:$0xff] }
 0xa8d   : > { %v3434_v43 = vmul.f32 %v3433_v41, %v3409_v39  ;;  %vm3465_vm15 = vweird.f32 %v3459_v40  ;;  %v3449_v34 = vmul.f32 %v3448_v53, %v9724_v57  ;;  %v8410_v41 = vld [vmem:[%s10605_s4 + $0x368] sm:$0xff] }
 0xa8e   : > { %v3472_v61 = vor.u32 1.1754944e-38, %v3471_v35  ;;  %vm3470_vm2 = vcmp.eq.f32.partialorder %v3469_v59, 8.507059e+37  ;;  %3826 = vmatpush.bf16.msrb.mxu3 %v8403_v33  ;;  %v8433_v33 = vld [vmem:[%s10605_s4 + $0x420] sm:$0xff] }
 0xa8f   : > { %v7463_v44 = vclamps-f32 %v3434_v43, 1.0  ;;  %3853 = vmatpush.bf16.msra.mxu0 %v8406_v36  ;;  %v8442_v36 = vld [vmem:[%s10605_s4 + $0x468] sm:$0xff] }
 0xa91   : > { %v3477_v48 = vadd.f32 1.0, %v7463_v44 }
 0xa92   : > { %v8667_v49 = vpop.eup %8666 }
 0xa93   : > { %v3479_v50 = vmul.f32 %v3477_v48, %v3393_v47  ;;  %v3461_v52 = vmul.f32 %v8667_v49, %v3459_v40  ;;  %vm3466_vm14 = vweird.f32 %v8667_v49  ;;  %v8408_v40 = vld [vmem:[%s10605_s4 + $0x358] sm:$0xff]  ;;  %v8407_v47 = vld [vmem:[%s10605_s4 + $0x350] sm:$0xff]  ;;  %v8409_v48 = vld [vmem:[%s10605_s4 + $0x360] sm:$0xff]  ;;  %3854 = vmatpush.bf16.msra.mxu0 %v8405_v45 }
 0xa94   : > { %vm3467_vm1 = vmor %vm3465_vm15, %vm3466_vm14  ;;  %3878 = vmatpush.bf16.msra.mxu1 %v8408_v40  ;;  %v8444_v40 = vld [vmem:[%s10605_s4 + $0x478] sm:$0xff] }
 0xa95   : > { %v3481_v55 = vpack.c.bf16 %v3479_v50, %v3479_v50  ;;  %v3462_v56 = vsub.f32 1.0, %v3461_v52 }
 0xa97   : > { %7481 = vmatmul.msk.bf16.vlgmr.msra.gmra.mxu2 %vm3513_vm13, %v3481_v55  ;;  %v3463_v58 = vmul.f32 %v8667_v49, %v3462_v56 }
 0xa98   : > { %3903 = vmatpush.bf16.msra.mxu2 %v8410_v41  ;;  %3879 = vmatpush.bf16.msra.mxu1 %v8407_v47  ;;  %v8437_v41 = vld [vmem:[%s10605_s4 + $0x440] sm:$0xff] }
 0xa99   : > { %v3464_v60 = vadd.f32 %v8667_v49, %v3463_v58  ;;  %v8568_v58 = vld [vmem:[%s10625_s2 + $0x5] ss:$0 sm:$0xff] }
 0xa9b   : > { %v3468_v62 = vsel %vm3467_vm1, %v8667_v49, %v3464_v60  ;;  %v8411_v49 = vld [vmem:[%s10605_s4 + $0x370] sm:$0xff]  ;;  %v8569_v60 = vld [vmem:[%s10626_s3 + $0x5] ss:$0 sm:$0xff] }
 0xa9c   : > { %v3473_v0 = vsel %vm3470_vm2, %v3472_v61, %v3468_v62  ;;  %3904 = vmatpush.bf16.msra.mxu2 %v8409_v48 }
 0xa9d   : > { %v3474_v63 = vmul.f32 %v3473_v0, %v3449_v34 }
 0xa9f   : > { %v7464_v1 = vclamps-f32 %v3474_v63, 1.0 }
 0xaa1   : > { %v3478_v3 = vadd.f32 1.0, %v7464_v1 }
 0xaa3   : > { %v3480_v4 = vmul.f32 %v3478_v3, %v3394_v2  ;;  %v8414_v2 = vld [vmem:[%s10605_s4 + $0x388] sm:$0xff]  ;;  %v8416_v3 = vld [vmem:[%s10605_s4 + $0x398] sm:$0xff] }
 0xaa5   : > { %v3482_v5 = vpack.c.bf16 %v3480_v4, %v3480_v4  ;;  %v8418_v4 = vld [vmem:[%s10605_s4 + $0x3a8] sm:$0xff] }
 0xaa7   : > { %7498 = vmatmul.msk.bf16.vlgmr.msra.gmra.mxu3 %vm3513_vm13, %v3482_v5  ;;  %v8420_v5 = vld [vmem:[%s10605_s4 + $0x3b8] sm:$0xff] }
 0xaa8   : > { %3928 = vmatpush.bf16.msra.mxu3 %v8412_v42  ;;  %v8439_v42 = vld [vmem:[%s10605_s4 + $0x450] sm:$0xff] }
 0xaac   : > { %3929 = vmatpush.bf16.msra.mxu3 %v8411_v49 }
 0xb1a   : > { %v3526_v7 = vpop.f32.mrf.mxu2 }
 0xb1b   : > { %v3527_v8 = vadd.f32 %v8566_v6, %v3526_v7 }
 0xb1d   : > { %v9753_v57 = vadd.f32 %v3527_v8, %v9649_v28  ;;  %v8413_v8 = vld [vmem:[%s10605_s4 + $0x380] sm:$0xff] }
 0xb1f   : > { %v3576_v9 = vsel %vm442_vm0, %v9753_v57, 0.0 }
 0xb20   : > { %3577 = vadd.xlane.f32.xlu2 %v3576_v9  ;;  %v8415_v9 = vld [vmem:[%s10605_s4 + $0x390] sm:$0xff] }
 0xb22   : > { %v3528_v11 = vpop.f32.mrf.mxu2 }
 0xb23   : > { %v8417_v11 = vld [vmem:[%s10605_s4 + $0x3a0] sm:$0xff] }
 0xb2a   : > { %v3566_v12 = vpop.f32.mrf.mxu3 }
 0xb2b   : > { %v3567_v13 = vadd.f32 %v8567_v54, %v3566_v12  ;;  %v8419_v54 = vld [vmem:[%s10605_s4 + $0x3b0] sm:$0xff] }
 0xb2d   : > { %v9761_v14 = vadd.f32 %v3567_v13, %v9661_v46 }
 0xb2f   : > { %v3579_v15 = vsel %vm442_vm0, %v9761_v14, 0.0 }
 0xb30   : > { %3580 = vadd.xlane.f32.xlu0 %v3579_v15 }
 0xb32   : > { %v3568_v28 = vpop.f32.mrf.mxu3 }
 0xb93   : > { %v3578_v16 = vpop.xlane.xlu2 %3577 }
 0xb94   : > { %v3582_v17 = vmul.f32 %v3578_v16, %v8976_v10 }
 0xb96   : > { %v3584_v18 = vsub.f32 %v9753_v57, %v3582_v17 }
 0xb98   : > { %v3586_v19 = vmul.f32 %v3584_v18, %v3584_v18 }
 0xb9a   : > { %v3588_v20 = vsel %vm442_vm0, %v3586_v19, 0.0  ;;  %v8422_v19 = vld [vmem:[%s10605_s4 + $0x3c8] sm:$0xff] }
 0xb9b   : > { %3589 = vadd.xlane.f32.xlu1 %v3588_v20  ;;  %v8424_v20 = vld [vmem:[%s10605_s4 + $0x3d8] sm:$0xff] }
 0xba3   : > { %v3581_v21 = vpop.xlane.xlu0 %3580 }
 0xba4   : > { %v3583_v22 = vmul.f32 %v3581_v21, %v8976_v10  ;;  %v8426_v21 = vld [vmem:[%s10605_s4 + $0x3e8] sm:$0xff] }
 0xba6   : > { %v9770_v46 = vsub.f32 %v9761_v14, %v3583_v22  ;;  %v8428_v22 = vld [vmem:[%s10605_s4 + $0x3f8] sm:$0xff] }
 0xba8   : > { %v3587_v23 = vmul.f32 %v9770_v46, %v9770_v46 }
 0xbaa   : > { %v3591_v24 = vsel %vm442_vm0, %v3587_v23, 0.0  ;;  %v8423_v23 = vld [vmem:[%s10605_s4 + $0x3d0] sm:$0xff] }
 0xbab   : > { %3592 = vadd.xlane.f32.xlu2 %v3591_v24  ;;  %v8425_v24 = vld [vmem:[%s10605_s4 + $0x3e0] sm:$0xff] }
 0xc0e   : > { %v3590_v37 = vpop.xlane.xlu1 %3589 }
 0xc0f   : > { %v3594_v38 = vmul.f32 %v3590_v37, %v8976_v10  ;;  %v8435_v37 = vld [vmem:[%s10605_s4 + $0x430] sm:$0xff] }
 0xc11   : > { %v3596_v39 = vadd.f32 1e-05, %v3594_v38  ;;  %v8438_v38 = vld [vmem:[%s10605_s4 + $0x448] sm:$0xff] }
 0xc13   : > { %8668 = vrsqrt.f32 %v3596_v39  ;;  %vm3604_vm4 = vweird.f32 %v3596_v39 }
 0xc19   : > { %v8669_v43 = vpop.eup %8668 }
 0xc1a   : > { %v3599_v44 = vmul.f32 %v8669_v43, %v3596_v39  ;;  %vm3605_vm3 = vweird.f32 %v8669_v43  ;;  %v8440_v39 = vld [vmem:[%s10605_s4 + $0x458] sm:$0xff] }
 0xc1b   : > { %vm3606_vm5 = vmor %vm3604_vm4, %vm3605_vm3 }
 0xc1c   : > { %v3600_v50 = vmul.f32 %v8669_v43, %v3599_v44  ;;  %v8443_v44 = vld [vmem:[%s10605_s4 + $0x470] sm:$0xff] }
 0xc1e   : > { %v3601_v51 = vmul.f32 0.5, %v3600_v50  ;;  %v3593_v52 = vpop.xlane.xlu2 %3592 }
 0xc1f   : > { %v3595_v56 = vmul.f32 %v3593_v52, %v8976_v10 }
 0xc20   : > { %v3602_v55 = vsub.f32 1.5, %v3601_v51 }
 0xc21   : > { %v3597_v53 = vadd.f32 1e-05, %v3595_v56 }
 0xc22   : > { %v3603_v35 = vmul.f32 %v8669_v43, %v3602_v55 }
 0xc23   : > { %8670 = vrsqrt.f32 %v3597_v53  ;;  %vm3614_vm7 = vweird.f32 %v3597_v53 }
 0xc24   : > { %v3607_v59 = vsel %vm3606_vm5, %v8669_v43, %v3603_v35  ;;  %v8441_v43 = vld [vmem:[%s10605_s4 + $0x460] sm:$0xff] }
 0xc25   : > { %v3618_v61 = vmul.f32 %v3607_v59, %v3584_v18 }
 0xc27   : > { %v3623_v34 = vmul.f32 %v8568_v58, %v3618_v61 }
 0xc29   : > { %v3628_v62 = vadd.f32 %v8569_v60, %v3623_v34  ;;  %v8671_v0 = vpop.eup %8670 }
 0xc2a   : > { %v3609_v1 = vmul.f32 %v8671_v0, %v3597_v53  ;;  %vm3615_vm6 = vweird.f32 %v8671_v0 }
 0xc2b   : > { %v9831_v63 = vpack.c.bf16 %v3628_v62, %v3628_v62  ;;  %vm3616_vm10 = vmor %vm3614_vm7, %vm3615_vm6 }
 0xc2c   : > { %v3610_v6 = vmul.f32 %v8671_v0, %v3609_v1 }
 0xc2d   : > { %7605 = vmatmul.msk.bf16.vlgmr.msrb.gmra.mxu0 %vm442_vm0, %v9831_v63  ;;  %7614 = vmatmul.msk.bf16.vlgmr.msrb.gmra.mxu1 %vm442_vm0, %v9831_v63 }
 0xc2e   : > { %7623 = vmatmul.msk.bf16.vlgmr.msrb.gmra.mxu2 %vm442_vm0, %v9831_v63  ;;  %7632 = vmatmul.msk.bf16.vlgmr.msrb.gmra.mxu3 %vm442_vm0, %v9831_v63  ;;  %v3611_v7 = vmul.f32 0.5, %v3610_v6 }
 0xc2f   : > { %3953 = vmatpush.bf16.msrb.mxu0 %v8414_v2  ;;  %3978 = vmatpush.bf16.msrb.mxu1 %v8416_v3 }
 0xc30   : > { %4003 = vmatpush.bf16.msrb.mxu2 %v8418_v4  ;;  %4028 = vmatpush.bf16.msrb.mxu3 %v8420_v5  ;;  %v3612_v12 = vsub.f32 1.5, %v3611_v7 }
 0xc32   : > { %v3613_v13 = vmul.f32 %v8671_v0, %v3612_v12 }
 0xc33   : > { %3954 = vmatpush.bf16.msrb.mxu0 %v8413_v8  ;;  %3979 = vmatpush.bf16.msrb.mxu1 %v8415_v9 }
 0xc34   : > { %4004 = vmatpush.bf16.msrb.mxu2 %v8417_v11  ;;  %4029 = vmatpush.bf16.msrb.mxu3 %v8419_v54  ;;  %v3617_v15 = vsel %vm3616_vm10, %v8671_v0, %v3613_v13 }
 0xc35   : > { %v3619_v28 = vmul.f32 %v3617_v15, %v9770_v46  ;;  %v8421_v46 = vld [vmem:[%s10605_s4 + $0x3c0] sm:$0xff] }
 0xc37   : > { %v3624_v16 = vmul.f32 %v8568_v58, %v3619_v28 }
 0xc39   : > { %v3629_v17 = vadd.f32 %v8569_v60, %v3624_v16 }
 0xc3b   : > { %v9866_v18 = vpack.c.bf16 %v3629_v17, %v3629_v17 }
 0xc3d   : > { %7641 = vmatmul.msk.bf16.vlgmr.msra.gmra.mxu0 %vm442_vm0, %v9866_v18  ;;  %7650 = vmatmul.msk.bf16.vlgmr.msra.gmra.mxu1 %vm442_vm0, %v9866_v18 }
 0xc3e   : > { %7659 = vmatmul.msk.bf16.vlgmr.msra.gmra.mxu2 %vm442_vm0, %v9866_v18  ;;  %7668 = vmatmul.msk.bf16.vlgmr.msra.gmra.mxu3 %vm442_vm0, %v9866_v18 }
 0xc3f   : > { %4053 = vmatpush.bf16.msra.mxu0 %v8422_v19  ;;  %4078 = vmatpush.bf16.msra.mxu1 %v8424_v20 }
 0xc40   : > { %4103 = vmatpush.bf16.msra.mxu2 %v8426_v21  ;;  %4128 = vmatpush.bf16.msra.mxu3 %v8428_v22 }
 0xc43   : > { %4054 = vmatpush.bf16.msra.mxu0 %v8421_v46  ;;  %4079 = vmatpush.bf16.msra.mxu1 %v8423_v23 }
 0xc44   : > { %4104 = vmatpush.bf16.msra.mxu2 %v8425_v24  ;;  %4129 = vmatpush.bf16.msra.mxu3 %v8427_v25 }
 0xc4d   : > { %7677 = vmatmul.msk.bf16.vlgmr.msrb.gmra.mxu0 %vm442_vm0, %v9831_v63  ;;  %7686 = vmatmul.msk.bf16.vlgmr.msrb.gmra.mxu1 %vm442_vm0, %v9831_v63 }
 0xc4e   : > { %7695 = vmatmul.msk.bf16.vlgmr.msrb.gmra.mxu2 %vm442_vm0, %v9831_v63  ;;  %7704 = vmatmul.msk.bf16.vlgmr.msrb.gmra.mxu3 %vm442_vm0, %v9831_v63 }
 0xc4f   : > { %4153 = vmatpush.bf16.msrb.mxu0 %v8430_v26  ;;  %4178 = vmatpush.bf16.msrb.mxu1 %v8432_v27 }
 0xc50   : > { %4203 = vmatpush.bf16.msrb.mxu2 %v8434_v29  ;;  %4228 = vmatpush.bf16.msrb.mxu3 %v8436_v30 }
 0xc53   : > { %4154 = vmatpush.bf16.msrb.mxu0 %v8429_v31  ;;  %4179 = vmatpush.bf16.msrb.mxu1 %v8431_v32 }
 0xc54   : > { %4204 = vmatpush.bf16.msrb.mxu2 %v8433_v33  ;;  %4229 = vmatpush.bf16.msrb.mxu3 %v8435_v37 }
 0xc5d   : > { %7713 = vmatmul.msk.bf16.vlgmr.msra.gmra.mxu0 %vm442_vm0, %v9866_v18  ;;  %7722 = vmatmul.msk.bf16.vlgmr.msra.gmra.mxu1 %vm442_vm0, %v9866_v18 }
 0xc5e   : > { %7731 = vmatmul.msk.bf16.vlgmr.msra.gmra.mxu2 %vm442_vm0, %v9866_v18  ;;  %7740 = vmatmul.msk.bf16.vlgmr.msra.gmra.mxu3 %vm442_vm0, %v9866_v18 }
 0xc5f   : > { %4253 = vmatpush.bf16.msra.mxu0 %v8438_v38  ;;  %4278 = vmatpush.bf16.msra.mxu1 %v8440_v39 }
 0xc60   : > { %4303 = vmatpush.bf16.msra.mxu2 %v8442_v36  ;;  %4328 = vmatpush.bf16.msra.mxu3 %v8444_v40 }
 0xc63   : > { %4254 = vmatpush.bf16.msra.mxu0 %v8437_v41  ;;  %4279 = vmatpush.bf16.msra.mxu1 %v8439_v42 }
 0xc64   : > { %4304 = vmatpush.bf16.msra.mxu2 %v8441_v43  ;;  %4329 = vmatpush.bf16.msra.mxu3 %v8443_v44 }
 0xc6d   : > { %7749 = vmatmul.msk.bf16.vlgmr.msrb.gmra.mxu0 %vm442_vm0, %v9831_v63  ;;  %7758 = vmatmul.msk.bf16.vlgmr.msrb.gmra.mxu1 %vm442_vm0, %v9831_v63 }
 0xc6e   : > { %7767 = vmatmul.msk.bf16.vlgmr.msrb.gmra.mxu2 %vm442_vm0, %v9831_v63  ;;  %7776 = vmatmul.msk.bf16.vlgmr.msrb.gmra.mxu3 %vm442_vm0, %v9831_v63 }
 0xc7d   : > { %7785 = vmatmul.msk.bf16.vlgmr.msra.gmra.mxu0 %vm442_vm0, %v9866_v18  ;;  %7794 = vmatmul.msk.bf16.vlgmr.msra.gmra.mxu1 %vm442_vm0, %v9866_v18 }
 0xc7e   : > { %7803 = vmatmul.msk.bf16.vlgmr.msra.gmra.mxu2 %vm442_vm0, %v9866_v18  ;;  %7812 = vmatmul.msk.bf16.vlgmr.msra.gmra.mxu3 %vm442_vm0, %v9866_v18 }
 0xcaa   : > { %v9980_v45 = vpop.f32.mrf.mxu0  ;;  %v9982_v47 = vpop.f32.mrf.mxu1 }
 0xcab   : > { %v4351_v30 = vpack.c.bf16 %v9980_v45, %v9980_v45  ;;  %v4352_v31 = vpack.c.bf16 %v9982_v47, %v9982_v47 }
 0xcb1   : > { %v9984_v48 = vpop.f32.mrf.mxu2  ;;  %v9986_v49 = vpop.f32.mrf.mxu3 }
 0xcb2   : > { %v3755_v50 = vpop.f32.mrf.mxu0  ;;  %v3780_v51 = vpop.f32.mrf.mxu1  ;;  %v4353_v39 = vpack.c.bf16 %v9984_v48, %v9984_v48  ;;  %v4354_v36 = vpack.c.bf16 %v9986_v49, %v9986_v49 }
 0xcb9   : > { %v3805_v52 = vpop.f32.mrf.mxu2  ;;  %v3830_v55 = vpop.f32.mrf.mxu3 }
 0xcba   : > { %v3856_v56 = vpop.f32.mrf.mxu0  ;;  %v3881_v35 = vpop.f32.mrf.mxu1 }
 0xcbb   : > { %v4347_v11 = vpack.c.bf16 %v3856_v56, %v3856_v56  ;;  %v4348_v54 = vpack.c.bf16 %v3881_v35, %v3881_v35 }
 0xcc1   : > { %v3906_v53 = vpop.f32.mrf.mxu2  ;;  %v3931_v58 = vpop.f32.mrf.mxu3 }
 0xcc2   : > { %v3858_v59 = vpop.f32.mrf.mxu0  ;;  %v3883_v60 = vpop.f32.mrf.mxu1  ;;  %v4349_v16 = vpack.c.bf16 %v3906_v53, %v3906_v53  ;;  %v4350_v17 = vpack.c.bf16 %v3931_v58, %v3931_v58 }
 0xcc9   : > { %v3908_v61 = vpop.f32.mrf.mxu2  ;;  %v3933_v34 = vpop.f32.mrf.mxu3 }
 0xcca   : > { %v3956_v62 = vpop.f32.mrf.mxu0  ;;  %v3981_v0 = vpop.f32.mrf.mxu1 }
 0xccb   : > { %v4355_v63 = vpack.c.bf16 %v3956_v62, %v3956_v62  ;;  %v4356_v1 = vpack.c.bf16 %v3981_v0, %v3981_v0 }
 0xccd   : > { %v4367_v2 = vsel %vm1234_vm8, %v4355_v63, 0  ;;  %v4386_v3 = vsel %vm1234_vm8, %v4356_v1, 0 }
 0xcce   : > { %4376 = vmatpush.bf16.xpose.msrb.mxu0 %v4367_v2  ;;  %4395 = vmatpush.bf16.xpose.msrb.mxu1 %v4386_v3 }
 0xcd1   : > { %v4006_v4 = vpop.f32.mrf.mxu2  ;;  %v4031_v5 = vpop.f32.mrf.mxu3 }
 0xcd2   : > { %v4357_v6 = vpack.c.bf16 %v4006_v4, %v4006_v4  ;;  %v4358_v7 = vpack.c.bf16 %v4031_v5, %v4031_v5  ;;  %v3958_v8 = vpop.f32.mrf.mxu0  ;;  %v3983_v9 = vpop.f32.mrf.mxu1 }
 0xcd4   : > { %v4405_v12 = vsel %vm1234_vm8, %v4357_v6, 0  ;;  %v4424_v13 = vsel %vm1234_vm8, %v4358_v7, 0 }
 0xcd5   : > { %4414 = vmatpush.bf16.xpose.msrb.mxu2 %v4405_v12  ;;  %4433 = vmatpush.bf16.xpose.msrb.mxu3 %v4424_v13 }
 0xcd6   : > { %7823 = vmatmul.msk.bf16.vlgmr.msrb.gmra.mxu0 %vm1234_vm8, %v4347_v11  ;;  %7824 = vmatmul.msk.bf16.vlgmr.msrb.gmra.mxu1 %vm1234_vm8, %v4348_v54 }
 0xcd9   : > { %v4008_v15 = vpop.f32.mrf.mxu2  ;;  %v4033_v28 = vpop.f32.mrf.mxu3 }
 0xcda   : > { %v4056_v18 = vpop.f32.mrf.mxu0  ;;  %v4081_v19 = vpop.f32.mrf.mxu1 }
 0xcdb   : > { %v4359_v20 = vpack.c.bf16 %v4056_v18, %v4056_v18  ;;  %v4360_v21 = vpack.c.bf16 %v4081_v19, %v4081_v19 }
 0xcdc   : > { %7825 = vmatmul.msk.bf16.vlgmr.msrb.gmra.mxu2 %vm1234_vm8, %v4349_v16  ;;  %7826 = vmatmul.msk.bf16.vlgmr.msrb.gmra.mxu3 %vm1234_vm8, %v4350_v17 }
 0xcdd   : > { %v4443_v22 = vsel %vm1234_vm8, %v4359_v20, 0  ;;  %v4462_v46 = vsel %vm1234_vm8, %v4360_v21, 0 }
 0xcde   : > { %4452 = vmatpush.bf16.xpose.msra.mxu0 %v4443_v22  ;;  %4471 = vmatpush.bf16.xpose.msra.mxu1 %v4462_v46 }
 0xce1   : > { %v4106_v23 = vpop.f32.mrf.mxu2  ;;  %v4131_v24 = vpop.f32.mrf.mxu3 }
 0xce2   : > { %v4361_v25 = vpack.c.bf16 %v4106_v23, %v4106_v23  ;;  %v4362_v26 = vpack.c.bf16 %v4131_v24, %v4131_v24  ;;  %v4058_v27 = vpop.f32.mrf.mxu0  ;;  %v4083_v29 = vpop.f32.mrf.mxu1 }
 0xce4   : > { %v4481_v32 = vsel %vm1234_vm8, %v4361_v25, 0  ;;  %v4500_v33 = vsel %vm1234_vm8, %v4362_v26, 0 }
 0xce5   : > { %4490 = vmatpush.bf16.xpose.msra.mxu2 %v4481_v32  ;;  %4509 = vmatpush.bf16.xpose.msra.mxu3 %v4500_v33 }
 0xce6   : > { %7827 = vmatmul.msk.bf16.vlgmr.msra.gmra.mxu0 %vm1234_vm8, %v4351_v30  ;;  %7828 = vmatmul.msk.bf16.vlgmr.msra.gmra.mxu1 %vm1234_vm8, %v4352_v31 }
 0xce9   : > { %v4108_v37 = vpop.f32.mrf.mxu2  ;;  %v4133_v38 = vpop.f32.mrf.mxu3 }
 0xcea   : > { %v4156_v40 = vpop.f32.mrf.mxu0  ;;  %v4181_v41 = vpop.f32.mrf.mxu1 }
 0xceb   : > { %v4619_v42 = vpack.c.bf16 %v4156_v40, %v4156_v40  ;;  %v4620_v43 = vpack.c.bf16 %v4181_v41, %v4181_v41 }
 0xcec   : > { %7829 = vmatmul.msk.bf16.vlgmr.msra.gmra.mxu2 %vm1234_vm8, %v4353_v39  ;;  %7830 = vmatmul.msk.bf16.vlgmr.msra.gmra.mxu3 %vm1234_vm8, %v4354_v36 }
 0xced   : > { %v4631_v44 = vsel %vm1502_vm9, %v4619_v42, 0  ;;  %v4650_v45 = vsel %vm1502_vm9, %v4620_v43, 0 }
 0xcee   : > { %4640 = vmatpush.bf16.msrb.mxu0 %v4631_v44  ;;  %4659 = vmatpush.bf16.msrb.mxu1 %v4650_v45 }
 0xcf1   : > { %v4206_v47 = vpop.f32.mrf.mxu2  ;;  %v4231_v50 = vpop.f32.mrf.mxu3 }
 0xcf2   : > { %v4621_v48 = vpack.c.bf16 %v4206_v47, %v4206_v47  ;;  %v4622_v51 = vpack.c.bf16 %v4231_v50, %v4231_v50  ;;  %v4158_v52 = vpop.f32.mrf.mxu0  ;;  %v4183_v49 = vpop.f32.mrf.mxu1 }
 0xcf4   : > { %v4669_v55 = vsel %vm1502_vm9, %v4621_v48, 0  ;;  %v4688_v56 = vsel %vm1502_vm9, %v4622_v51, 0 }
 0xcf5   : > { %4678 = vmatpush.bf16.msrb.mxu2 %v4669_v55  ;;  %4697 = vmatpush.bf16.msrb.mxu3 %v4688_v56 }
 0xcf9   : > { %v4208_v35 = vpop.f32.mrf.mxu2  ;;  %v4233_v53 = vpop.f32.mrf.mxu3 }
 0xcfa   : > { %v4256_v58 = vpop.f32.mrf.mxu0  ;;  %v4281_v59 = vpop.f32.mrf.mxu1 }
 0xcfb   : > { %v4623_v60 = vpack.c.bf16 %v4256_v58, %v4256_v58  ;;  %v4624_v61 = vpack.c.bf16 %v4281_v59, %v4281_v59 }
 0xcfd   : > { %v4707_v34 = vsel %vm1502_vm9, %v4623_v60, 0  ;;  %v4726_v62 = vsel %vm1502_vm9, %v4624_v61, 0 }
 0xcfe   : > { %4716 = vmatpush.bf16.msra.mxu0 %v4707_v34  ;;  %4735 = vmatpush.bf16.msra.mxu1 %v4726_v62 }
 0xd01   : > { %v4306_v0 = vpop.f32.mrf.mxu2  ;;  %v4331_v63 = vpop.f32.mrf.mxu3 }
 0xd02   : > { %v4625_v1 = vpack.c.bf16 %v4306_v0, %v4306_v0  ;;  %v4626_v2 = vpack.c.bf16 %v4331_v63, %v4331_v63  ;;  %v4258_v3 = vpop.f32.mrf.mxu0  ;;  %v4283_v4 = vpop.f32.mrf.mxu1 }
 0xd04   : > { %v4745_v5 = vsel %vm1502_vm9, %v4625_v1, 0  ;;  %v4764_v6 = vsel %vm1502_vm9, %v4626_v2, 0 }
 0xd05   : > { %4754 = vmatpush.bf16.msra.mxu2 %v4745_v5  ;;  %4773 = vmatpush.bf16.msra.mxu3 %v4764_v6 }
 0xd09   : > { %v4308_v7 = vpop.f32.mrf.mxu2  ;;  %v4333_v8 = vpop.f32.mrf.mxu3 }
 0xd53   : > { %v4378_v9 = vpop.f32.mrf.mxu0  ;;  %v4397_v11 = vpop.f32.mrf.mxu1 }
 0xd54   : > { %v4515_v54 = vmul.f32 0.35355338, %v4378_v9  ;;  %v4516_v46 = vmul.f32 0.35355338, %v4397_v11 }
 0xd56   : > { %v4523_v12 = vsel %vm1234_vm8, %v4515_v54, -inf  ;;  %v4526_v25 = vsel %vm1234_vm8, %v4516_v46, -inf }
 0xd57   : > { %4524 = vmax.xlane.f32.xlu2 %v4523_v12 }
 0xd5b   : > { %v4380_v13 = vpop.f32.mrf.mxu0  ;;  %v4399_v15 = vpop.f32.mrf.mxu1 }
 0xd5f   : > { %v4416_v28 = vpop.f32.mrf.mxu2  ;;  %v4435_v16 = vpop.f32.mrf.mxu3 }
 0xd60   : > { %v4517_v17 = vmul.f32 0.35355338, %v4416_v28  ;;  %v4518_v18 = vmul.f32 0.35355338, %v4435_v16 }
 0xd62   : > { %v4532_v19 = vsel %vm1234_vm8, %v4518_v18, -inf  ;;  %v4529_v20 = vsel %vm1234_vm8, %v4517_v17, -inf }
 0xd63   : > { %4533 = vmax.xlane.f32.xlu1 %v4532_v19  ;;  %4530 = vmax.xlane.f32.xlu0 %v4529_v20  ;;  %v4454_v21 = vpop.f32.mrf.mxu0  ;;  %v4473_v22 = vpop.f32.mrf.mxu1 }
 0xd64   : > { %v4519_v29 = vmul.f32 0.35355338, %v4454_v21  ;;  %v4520_v36 = vmul.f32 0.35355338, %v4473_v22 }
 0xd66   : > { %v4535_v39 = vsel %vm1234_vm8, %v4519_v29, -inf  ;;  %v4538_v42 = vsel %vm1234_vm8, %v4520_v36, -inf }
 0xd67   : > { %v4418_v23 = vpop.f32.mrf.mxu2  ;;  %v4437_v24 = vpop.f32.mrf.mxu3 }
 0xd6b   : > { %4527 = vmax.xlane.f32.xlu0 %v4526_v25  ;;  %v4456_v26 = vpop.f32.mrf.mxu0  ;;  %v4475_v27 = vpop.f32.mrf.mxu1 }
 0xd6f   : > { %v4492_v30 = vpop.f32.mrf.mxu2  ;;  %v4511_v31 = vpop.f32.mrf.mxu3 }
 0xd70   : > { %v4521_v32 = vmul.f32 0.35355338, %v4492_v30  ;;  %v4522_v33 = vmul.f32 0.35355338, %v4511_v31 }
 0xd72   : > { %v4541_v37 = vsel %vm1234_vm8, %v4521_v32, -inf  ;;  %v4544_v38 = vsel %vm1234_vm8, %v4522_v33, -inf }
 0xd73   : > { %4542 = vmax.xlane.f32.xlu1 %v4541_v37  ;;  %4545 = vmax.xlane.f32.xlu2 %v4544_v38 }
 0xd74   : > { %4536 = vmax.xlane.f32.xlu0 %v4535_v39 }
 0xd77   : > { %v4494_v40 = vpop.f32.mrf.mxu2  ;;  %v4513_v41 = vpop.f32.mrf.mxu3 }
 0xd7b   : > { %4539 = vmax.xlane.f32.xlu1 %v4538_v42 }
 0xdca   : > { %v4525_v43 = vpop.xlane.xlu2 %4524 }
 0xdcb   : > { %v4547_v44 = vsub.f32 %v4515_v54, %v4525_v43 }
 0xdcd   : > { %v4555_v45 = vmul.f32 1.442695, %v4547_v44 }
 0xdcf   : > { %8672 = vpow2.f32 %v4555_v45 }
 0xdd5   : > { %v8673_v47 = vpop.eup %8672 }
 0xdd6   : > { %v4534_v50 = vpop.xlane.xlu1 %4533  ;;  %v4531_v48 = vpop.xlane.xlu0 %4530  ;;  %v4571_v51 = vsel %vm1234_vm8, %v8673_v47, 0.0 }
 0xdd7   : > { %v4550_v52 = vsub.f32 %v4518_v18, %v4534_v50  ;;  %v4549_v49 = vsub.f32 %v4517_v17, %v4531_v48  ;;  %4572 = vadd.xlane.f32.xlu1 %v4571_v51 }
 0xdd9   : > { %v4561_v55 = vmul.f32 1.442695, %v4550_v52  ;;  %v4559_v56 = vmul.f32 1.442695, %v4549_v49 }
 0xddb   : > { %8674 = vpow2.f32 %v4561_v55 }
 0xddc   : > { %8676 = vpow2.f32 %v4559_v56 }
 0xdde   : > { %v4528_v35 = vpop.xlane.xlu0 %4527 }
 0xddf   : > { %v4548_v53 = vsub.f32 %v4516_v46, %v4528_v35  ;;  %v7813_v35 = vld [vmem:[%s10606_s5 + $0x40] sm:$0xf] }
 0xde1   : > { %v8675_v58 = vpop.eup %8674  ;;  %v4557_v59 = vmul.f32 1.442695, %v4548_v53  ;;  %v4791_v53 = vsel %vm1502_vm9, %v7813_v35, 0 }
 0xde2   : > { %v8677_v60 = vpop.eup %8676  ;;  %v4580_v61 = vsel %vm1234_vm8, %v8675_v58, 0.0 }
 0xde3   : > { %8678 = vpow2.f32 %v4557_v59  ;;  %v4577_v34 = vsel %vm1234_vm8, %v8677_v60, 0.0  ;;  %4581 = vadd.xlane.f32.xlu0 %v4580_v61  ;;  %v7816_v59 = vld [vmem:[%s10606_s5 + $0x4c] sm:$0xf] }
 0xde4   : > { %4578 = vadd.xlane.f32.xlu2 %v4577_v34  ;;  %v4848_v61 = vsel %vm1502_vm9, %v7816_v59, 0  ;;  %v7814_v34 = vld [vmem:[%s10606_s5 + $0x44] sm:$0xf] }
 0xde6   : > { %v4543_v62 = vpop.xlane.xlu1 %4542  ;;  %v4546_v0 = vpop.xlane.xlu2 %4545 }
 0xde7   : > { %v4553_v63 = vsub.f32 %v4521_v32, %v4543_v62  ;;  %v4554_v1 = vsub.f32 %v4522_v33, %v4546_v0  ;;  %v4537_v2 = vpop.xlane.xlu0 %4536  ;;  %v4810_v62 = vsel %vm1502_vm9, %v7814_v34, 0  ;;  %v7817_v0 = vld [vmem:[%s10606_s5 + $0x50] sm:$0xf] }
 0xde8   : > { %v4551_v3 = vsub.f32 %v4519_v29, %v4537_v2 }
 0xde9   : > { %v8679_v4 = vpop.eup %8678  ;;  %v4567_v5 = vmul.f32 1.442695, %v4553_v63  ;;  %v4569_v6 = vmul.f32 1.442695, %v4554_v1  ;;  %v4867_v63 = vsel %vm1502_vm9, %v7817_v0, 0 }
 0xdea   : > { %v4563_v7 = vmul.f32 1.442695, %v4551_v3  ;;  %v4574_v8 = vsel %vm1234_vm8, %v8679_v4, 0.0  ;;  %v7819_v1 = vld [vmem:[%s10606_s5 + $0x58] sm:$0xf] }
 0xdeb   : > { %8680 = vpow2.f32 %v4567_v5  ;;  %v4905_v3 = vsel %vm1502_vm9, %v7819_v1, 0  ;;  %v7820_v5 = vld [vmem:[%s10606_s5 + $0x5c] sm:$0xf] }
 0xdec   : > { %8682 = vpow2.f32 %v4569_v6  ;;  %4575 = vadd.xlane.f32.xlu2 %v4574_v8  ;;  %v4924_v6 = vsel %vm1502_vm9, %v7820_v5, 0 }
 0xded   : > { %8684 = vpow2.f32 %v4563_v7  ;;  %v7818_v7 = vld [vmem:[%s10606_s5 + $0x54] sm:$0xf] }
 0xdee   : > { %v4540_v9 = vpop.xlane.xlu1 %4539  ;;  %v4886_v8 = vsel %vm1502_vm9, %v7818_v7, 0 }
 0xdef   : > { %v4552_v11 = vsub.f32 %v4520_v36, %v4540_v9 }
 0xdf1   : > { %v8681_v54 = vpop.eup %8680  ;;  %v4565_v12 = vmul.f32 1.442695, %v4552_v11 }
 0xdf2   : > { %v8683_v13 = vpop.eup %8682  ;;  %v4589_v15 = vsel %vm1234_vm8, %v8681_v54, 0.0 }
 0xdf3   : > { %v8685_v28 = vpop.eup %8684  ;;  %8686 = vpow2.f32 %v4565_v12  ;;  %v4592_v16 = vsel %vm1234_vm8, %v8683_v13, 0.0  ;;  %4590 = vadd.xlane.f32.xlu0 %v4589_v15 }
 0xdf4   : > { %4593 = vadd.xlane.f32.xlu1 %v4592_v16  ;;  %v4583_v17 = vsel %vm1234_vm8, %v8685_v28, 0.0 }
 0xdf5   : > { %4584 = vadd.xlane.f32.xlu2 %v4583_v17 }
 0xdf9   : > { %v8687_v18 = vpop.eup %8686 }
 0xdfa   : > { %v4586_v19 = vsel %vm1234_vm8, %v8687_v18, 0.0 }
 0xdfb   : > { %4587 = vadd.xlane.f32.xlu0 %v4586_v19 }
 0xe4a   : > { %v4573_v20 = vpop.xlane.xlu1 %4572 }
 0xe4b   : > { %8688 = vrcp.f32 %v4573_v20 }
 0xe51   : > { %v8689_v21 = vpop.eup %8688 }
 0xe52   : > { %v4603_v22 = vmul.f32 %v8689_v21, %v8673_v47 }
 0xe54   : > { %v4611_v46 = vpack.c.bf16 %v4603_v22, %v4603_v22 }
 0xe56   : > { %7831 = vmatmul.msk.bf16.vlgmr.msrb.gmra.mxu0 %vm1234_vm8, %v4611_v46  ;;  %v4582_v23 = vpop.xlane.xlu0 %4581 }
 0xe57   : > { %v4579_v24 = vpop.xlane.xlu2 %4578  ;;  %8690 = vrcp.f32 %v4582_v23  ;;  %4800 = vmatpush.bf16.msrb.mxu0 %v4791_v53 }
 0xe58   : > { %8692 = vrcp.f32 %v4579_v24 }
 0xe5d   : > { %v8691_v25 = vpop.eup %8690 }
 0xe5e   : > { %v8693_v26 = vpop.eup %8692  ;;  %v4606_v27 = vmul.f32 %v8691_v25, %v8675_v58  ;;  %v7815_v58 = vld [vmem:[%s10606_s5 + $0x48] sm:$0xf] }
 0xe5f   : > { %v4605_v29 = vmul.f32 %v8693_v26, %v8677_v60  ;;  %v4576_v30 = vpop.xlane.xlu2 %4575  ;;  %v4829_v60 = vsel %vm1502_vm9, %v7815_v58, 0 }
 0xe60   : > { %v4614_v31 = vpack.c.bf16 %v4606_v27, %v4606_v27  ;;  %8694 = vrcp.f32 %v4576_v30 }
 0xe61   : > { %v4613_v32 = vpack.c.bf16 %v4605_v29, %v4605_v29 }
 0xe62   : > { %7834 = vmatmul.msk.bf16.vlgmr.msrb.gmra.mxu3 %vm1234_vm8, %v4614_v31 }
 0xe63   : > { %7833 = vmatmul.msk.bf16.vlgmr.msrb.gmra.mxu2 %vm1234_vm8, %v4613_v32  ;;  %4857 = vmatpush.bf16.msrb.mxu3 %v4848_v61 }
 0xe64   : > { %4838 = vmatpush.bf16.msrb.mxu2 %v4829_v60 }
 0xe66   : > { %v8695_v33 = vpop.eup %8694  ;;  %v4591_v37 = vpop.xlane.xlu0 %4590 }
 0xe67   : > { %v4604_v38 = vmul.f32 %v8695_v33, %v8679_v4  ;;  %v4594_v39 = vpop.xlane.xlu1 %4593  ;;  %8696 = vrcp.f32 %v4591_v37 }
 0xe68   : > { %8698 = vrcp.f32 %v4594_v39  ;;  %v4585_v36 = vpop.xlane.xlu2 %4584 }
 0xe69   : > { %v4612_v40 = vpack.c.bf16 %v4604_v38, %v4604_v38  ;;  %8700 = vrcp.f32 %v4585_v36 }
 0xe6b   : > { %7832 = vmatmul.msk.bf16.vlgmr.msrb.gmra.mxu1 %vm1234_vm8, %v4612_v40 }
 0xe6c   : > { %4819 = vmatpush.bf16.msrb.mxu1 %v4810_v62 }
 0xe6d   : > { %v8697_v41 = vpop.eup %8696 }
 0xe6e   : > { %v8699_v42 = vpop.eup %8698  ;;  %v4609_v43 = vmul.f32 %v8697_v41, %v8681_v54  ;;  %v4588_v44 = vpop.xlane.xlu0 %4587 }
 0xe6f   : > { %v8701_v45 = vpop.eup %8700  ;;  %v4610_v47 = vmul.f32 %v8699_v42, %v8683_v13  ;;  %8702 = vrcp.f32 %v4588_v44 }
 0xe70   : > { %v4607_v50 = vmul.f32 %v8701_v45, %v8685_v28  ;;  %v4617_v48 = vpack.c.bf16 %v4609_v43, %v4609_v43  ;;  %v8570_v43 = vld [vmem:[%s10607_s6 + $0x4] ss:$0 sm:$0xff] }
 0xe71   : > { %v4618_v51 = vpack.c.bf16 %v4610_v47, %v4610_v47 }
 0xe72   : > { %v4615_v52 = vpack.c.bf16 %v4607_v50, %v4607_v50 }
 0xe73   : > { %7837 = vmatmul.msk.bf16.vlgmr.msra.gmra.mxu2 %vm1234_vm8, %v4617_v48  ;;  %7838 = vmatmul.msk.bf16.vlgmr.msra.gmra.mxu3 %vm1234_vm8, %v4618_v51 }
 0xe74   : > { %7835 = vmatmul.msk.bf16.vlgmr.msra.gmra.mxu0 %vm1234_vm8, %v4615_v52  ;;  %4914 = vmatpush.bf16.msra.mxu2 %v4905_v3 }
 0xe75   : > { %v8703_v49 = vpop.eup %8702  ;;  %4876 = vmatpush.bf16.msra.mxu0 %v4867_v63  ;;  %4933 = vmatpush.bf16.msra.mxu3 %v4924_v6 }
 0xe76   : > { %v4608_v55 = vmul.f32 %v8703_v49, %v8687_v18 }
 0xe78   : > { %v4616_v56 = vpack.c.bf16 %v4608_v55, %v4608_v55 }
 0xe7b   : > { %7836 = vmatmul.msk.bf16.vlgmr.msra.gmra.mxu1 %vm1234_vm8, %v4616_v56 }
 0xe7c   : > { %4895 = vmatpush.bf16.msra.mxu1 %v4886_v8 }
 0xed3   : > { %v4642_v2 = vpop.f32.mrf.mxu0 }
 0xed4   : > { %v4779_v4 = vpack.c.bf16 %v4642_v2, %v4642_v2 }
 0xed6   : > { %7839 = vmatmul.msk.bf16.vlgmr.msrb.gmra.mxu0 %vm1234_vm8, %v4779_v4 }
 0xedb   : > { %v4644_v9 = vpop.f32.mrf.mxu0 }
 0xee5   : > { %v4699_v11 = vpop.f32.mrf.mxu3 }
 0xee6   : > { %v4680_v54 = vpop.f32.mrf.mxu2  ;;  %v4782_v12 = vpack.c.bf16 %v4699_v11, %v4699_v11 }
 0xee7   : > { %v4781_v13 = vpack.c.bf16 %v4680_v54, %v4680_v54 }
 0xee8   : > { %v4661_v15 = vpop.f32.mrf.mxu1  ;;  %7842 = vmatmul.msk.bf16.vlgmr.msrb.gmra.mxu3 %vm1234_vm8, %v4782_v12 }
 0xee9   : > { %v4780_v28 = vpack.c.bf16 %v4661_v15, %v4661_v15  ;;  %7841 = vmatmul.msk.bf16.vlgmr.msrb.gmra.mxu2 %vm1234_vm8, %v4781_v13 }
 0xeeb   : > { %7840 = vmatmul.msk.bf16.vlgmr.msrb.gmra.mxu1 %vm1234_vm8, %v4780_v28 }
 0xeed   : > { %v4701_v16 = vpop.f32.mrf.mxu3 }
 0xeee   : > { %v4682_v17 = vpop.f32.mrf.mxu2  ;;  %v8446_v16 = vld [vmem:[%s10605_s4 + $0x488] sm:$0xff] }
 0xeef   : > { %v8448_v17 = vld [vmem:[%s10605_s4 + $0x498] sm:$0xff]  ;;  %5149 = vmatpush.bf16.msrb.mxu0 %v8446_v16  ;;  %v8471_v16 = vld [vmem:[%s10605_s4 + $0x550] sm:$0xff] }
 0xef0   : > { %v4663_v18 = vpop.f32.mrf.mxu1  ;;  %5174 = vmatpush.bf16.msrb.mxu1 %v8448_v17  ;;  %v8473_v17 = vld [vmem:[%s10605_s4 + $0x560] sm:$0xff] }
 0xef1   : > { %v4718_v19 = vpop.f32.mrf.mxu0  ;;  %v8450_v18 = vld [vmem:[%s10605_s4 + $0x4a8] sm:$0xff] }
 0xef2   : > { %v4783_v20 = vpack.c.bf16 %v4718_v19, %v4718_v19  ;;  %v8452_v19 = vld [vmem:[%s10605_s4 + $0x4b8] sm:$0xff]  ;;  %5199 = vmatpush.bf16.msrb.mxu2 %v8450_v18  ;;  %v8475_v18 = vld [vmem:[%s10605_s4 + $0x570] sm:$0xff] }
 0xef3   : > { %5224 = vmatpush.bf16.msrb.mxu3 %v8452_v19  ;;  %v8478_v19 = vld [vmem:[%s10605_s4 + $0x588] sm:$0xff] }
 0xef4   : > { %7843 = vmatmul.msk.bf16.vlgmr.msra.gmra.mxu0 %vm1234_vm8, %v4783_v20  ;;  %v8445_v20 = vld [vmem:[%s10605_s4 + $0x480] sm:$0xff] }
 0xef5   : > { %5150 = vmatpush.bf16.msrb.mxu0 %v8445_v20  ;;  %v8480_v20 = vld [vmem:[%s10605_s4 + $0x598] sm:$0xff] }
 0xef6   : > { %v4756_v21 = vpop.f32.mrf.mxu2  ;;  %v4775_v22 = vpop.f32.mrf.mxu3 }
 0xef7   : > { %v4785_v46 = vpack.c.bf16 %v4756_v21, %v4756_v21  ;;  %v4786_v23 = vpack.c.bf16 %v4775_v22, %v4775_v22  ;;  %v8447_v21 = vld [vmem:[%s10605_s4 + $0x490] sm:$0xff]  ;;  %v8449_v22 = vld [vmem:[%s10605_s4 + $0x4a0] sm:$0xff] }
 0xef8   : > { %v4737_v24 = vpop.f32.mrf.mxu1  ;;  %5175 = vmatpush.bf16.msrb.mxu1 %v8447_v21  ;;  %5200 = vmatpush.bf16.msrb.mxu2 %v8449_v22  ;;  %v8482_v21 = vld [vmem:[%s10605_s4 + $0x5a8] sm:$0xff]  ;;  %v8484_v22 = vld [vmem:[%s10605_s4 + $0x5b8] sm:$0xff] }
 0xef9   : > { %v4720_v25 = vpop.f32.mrf.mxu0  ;;  %v4784_v26 = vpack.c.bf16 %v4737_v24, %v4737_v24  ;;  %7845 = vmatmul.msk.bf16.vlgmr.msra.gmra.mxu2 %vm1234_vm8, %v4785_v46  ;;  %7846 = vmatmul.msk.bf16.vlgmr.msra.gmra.mxu3 %vm1234_vm8, %v4786_v23  ;;  %v8451_v46 = vld [vmem:[%s10605_s4 + $0x4b0] sm:$0xff] }
 0xefa   : > { %5225 = vmatpush.bf16.msrb.mxu3 %v8451_v46  ;;  %v8477_v46 = vld [vmem:[%s10605_s4 + $0x580] sm:$0xff] }
 0xefb   : > { %7844 = vmatmul.msk.bf16.vlgmr.msra.gmra.mxu1 %vm1234_vm8, %v4784_v26  ;;  %v8454_v26 = vld [vmem:[%s10605_s4 + $0x4c8] sm:$0xff] }
 0xefc   : > { %5252 = vmatpush.bf16.msra.mxu0 %v8454_v26  ;;  %v8486_v26 = vld [vmem:[%s10605_s4 + $0x5c8] sm:$0xff] }
 0xefe   : > { %v4758_v27 = vpop.f32.mrf.mxu2  ;;  %v4777_v29 = vpop.f32.mrf.mxu3 }
 0xeff   : > { %v8456_v27 = vld [vmem:[%s10605_s4 + $0x4d8] sm:$0xff]  ;;  %v8458_v29 = vld [vmem:[%s10605_s4 + $0x4e8] sm:$0xff] }
 0xf00   : > { %v4739_v30 = vpop.f32.mrf.mxu1  ;;  %5277 = vmatpush.bf16.msra.mxu1 %v8456_v27  ;;  %5302 = vmatpush.bf16.msra.mxu2 %v8458_v29  ;;  %v8488_v27 = vld [vmem:[%s10605_s4 + $0x5d8] sm:$0xff]  ;;  %v8490_v29 = vld [vmem:[%s10605_s4 + $0x5e8] sm:$0xff] }
 0xf01   : > { %v8460_v30 = vld [vmem:[%s10605_s4 + $0x4f8] sm:$0xff] }
 0xf02   : > { %5327 = vmatpush.bf16.msra.mxu3 %v8460_v30  ;;  %v8492_v30 = vld [vmem:[%s10605_s4 + $0x5f8] sm:$0xff] }
 0xf53   : > { %v4802_v31 = vpop.f32.mrf.mxu0 }
 0xf54   : > { %v4939_v38 = vsel %vm442_vm0, %v4802_v31, 0.0 }
 0xf5b   : > { %v4804_v32 = vpop.f32.mrf.mxu0 }
 0xf5c   : > { %v8453_v32 = vld [vmem:[%s10605_s4 + $0x4c0] sm:$0xff] }
 0xf5d   : > { %5253 = vmatpush.bf16.msra.mxu0 %v8453_v32  ;;  %v8487_v32 = vld [vmem:[%s10605_s4 + $0x5d0] sm:$0xff] }
 0xf68   : > { %v4821_v33 = vpop.f32.mrf.mxu1 }
 0xf69   : > { %v4940_v37 = vsel %vm442_vm0, %v4821_v33, 0.0  ;;  %v8455_v33 = vld [vmem:[%s10605_s4 + $0x4d0] sm:$0xff] }
 0xf6a   : > { %v4941_v36 = vadd.f32 %v4940_v37, %v4939_v38  ;;  %v8457_v37 = vld [vmem:[%s10605_s4 + $0x4e0] sm:$0xff]  ;;  %5278 = vmatpush.bf16.msra.mxu1 %v8455_v33 }
 0xf6b   : > { %v4859_v39 = vpop.f32.mrf.mxu3  ;;  %5303 = vmatpush.bf16.msra.mxu2 %v8457_v37  ;;  %v8489_v33 = vld [vmem:[%s10605_s4 + $0x5e0] sm:$0xff]  ;;  %v8491_v37 = vld [vmem:[%s10605_s4 + $0x5f0] sm:$0xff] }
 0xf6c   : > { %v4840_v40 = vpop.f32.mrf.mxu2  ;;  %v4944_v44 = vsel %vm442_vm0, %v4859_v39, 0.0  ;;  %v8459_v39 = vld [vmem:[%s10605_s4 + $0x4f0] sm:$0xff] }
 0xf6d   : > { %v4942_v41 = vsel %vm442_vm0, %v4840_v40, 0.0  ;;  %5328 = vmatpush.bf16.msra.mxu3 %v8459_v39 }
 0xf6e   : > { %v4943_v42 = vadd.f32 %v4942_v41, %v4941_v36 }
 0xf70   : > { %v4945_v45 = vadd.f32 %v4944_v44, %v4943_v42  ;;  %v4823_v47 = vpop.f32.mrf.mxu1 }
 0xf71   : > { %v4878_v50 = vpop.f32.mrf.mxu0  ;;  %v8572_v47 = vld [vmem:[%s10625_s2 + $0x6] ss:$0 sm:$0xff] }
 0xf72   : > { %v4959_v48 = vadd.f32 %v8570_v43, %v4945_v45  ;;  %v4946_v58 = vsel %vm442_vm0, %v4878_v50, 0.0 }
 0xf73   : > { %v4861_v51 = vpop.f32.mrf.mxu3 }
 0xf74   : > { %v4842_v52 = vpop.f32.mrf.mxu2  ;;  %v10092_v49 = vadd.f32 %v4959_v48, %v9753_v57  ;;  %v8571_v57 = vld [vmem:[%s10607_s6 + $0x5] ss:$0 sm:$0xff]  ;;  %v8573_v48 = vld [vmem:[%s10626_s3 + $0x6] ss:$0 sm:$0xff] }
 0xf76   : > { %v4969_v55 = vsel %vm442_vm0, %v10092_v49, 0.0 }
 0xf77   : > { %4970 = vadd.xlane.f32.xlu1 %v4969_v55 }
 0xf78   : > { %v4897_v56 = vpop.f32.mrf.mxu1 }
 0xf79   : > { %v4880_v35 = vpop.f32.mrf.mxu0  ;;  %v4947_v53 = vsel %vm442_vm0, %v4897_v56, 0.0 }
 0xf7a   : > { %v4948_v59 = vadd.f32 %v4947_v53, %v4946_v58  ;;  %v8462_v58 = vld [vmem:[%s10605_s4 + $0x508] sm:$0xff] }
 0xf7c   : > { %v4916_v60 = vpop.f32.mrf.mxu2  ;;  %v4935_v61 = vpop.f32.mrf.mxu3 }
 0xf7d   : > { %v4949_v34 = vsel %vm442_vm0, %v4916_v60, 0.0  ;;  %v4951_v0 = vsel %vm442_vm0, %v4935_v61, 0.0  ;;  %v8466_v61 = vld [vmem:[%s10605_s4 + $0x528] sm:$0xff] }
 0xf7e   : > { %v4950_v62 = vadd.f32 %v4949_v34, %v4948_v59  ;;  %v8464_v59 = vld [vmem:[%s10605_s4 + $0x518] sm:$0xff] }
 0xf7f   : > { %v8468_v34 = vld [vmem:[%s10605_s4 + $0x538] sm:$0xff] }
 0xf80   : > { %v4952_v63 = vadd.f32 %v4951_v0, %v4950_v62  ;;  %v4899_v1 = vpop.f32.mrf.mxu1  ;;  %v8463_v0 = vld [vmem:[%s10605_s4 + $0x510] sm:$0xff] }
 0xf81   : > { %v8465_v1 = vld [vmem:[%s10605_s4 + $0x520] sm:$0xff] }
 0xf82   : > { %v4960_v2 = vadd.f32 %v8571_v57, %v4952_v63  ;;  %v8461_v57 = vld [vmem:[%s10605_s4 + $0x500] sm:$0xff] }
 0xf84   : > { %v4918_v3 = vpop.f32.mrf.mxu2  ;;  %v4937_v4 = vpop.f32.mrf.mxu3  ;;  %v10104_v5 = vadd.f32 %v4960_v2, %v9761_v14  ;;  %v8467_v2 = vld [vmem:[%s10605_s4 + $0x530] sm:$0xff] }
 0xf85   : > { %v8574_v4 = vld [vmem:[%s10625_s2 + $0x7] ss:$0 sm:$0xff] }
 0xf86   : > { %v4972_v6 = vsel %vm442_vm0, %v10104_v5, 0.0 }
 0xf87   : > { %4973 = vadd.xlane.f32.xlu2 %v4972_v6 }
 0xfea   : > { %v4971_v7 = vpop.xlane.xlu1 %4970 }
 0xfeb   : > { %v4975_v8 = vmul.f32 %v4971_v7, %v8976_v10  ;;  %v8575_v7 = vld [vmem:[%s10626_s3 + $0x7] ss:$0 sm:$0xff] }
 0xfed   : > { %v4977_v9 = vsub.f32 %v10092_v49, %v4975_v8 }
 0xfef   : > { %v4979_v11 = vmul.f32 %v4977_v9, %v4977_v9 }
 0xff1   : > { %v4981_v54 = vsel %vm442_vm0, %v4979_v11, 0.0 }
 0xff2   : > { %4982 = vadd.xlane.f32.xlu0 %v4981_v54 }
 0xffa   : > { %v4974_v12 = vpop.xlane.xlu2 %4973 }
 0xffb   : > { %v4976_v13 = vmul.f32 %v4974_v12, %v8976_v10  ;;  %v8470_v12 = vld [vmem:[%s10605_s4 + $0x548] sm:$0xff] }
 0xffd   : > { %v10113_v15 = vsub.f32 %v10104_v5, %v4976_v13  ;;  %v8472_v13 = vld [vmem:[%s10605_s4 + $0x558] sm:$0xff] }
 0xfff   : > { %v4980_v14 = vmul.f32 %v10113_v15, %v10113_v15 }
0x1001   : > { %v4984_v28 = vsel %vm442_vm0, %v4980_v14, 0.0  ;;  %v8474_v14 = vld [vmem:[%s10605_s4 + $0x568] sm:$0xff] }
0x1002   : > { %4985 = vadd.xlane.f32.xlu1 %v4984_v28  ;;  %v8469_v28 = vld [vmem:[%s10605_s4 + $0x540] sm:$0xff] }
0x1065   : > { %v4983_v23 = vpop.xlane.xlu0 %4982 }
0x1066   : > { %v4987_v24 = vmul.f32 %v4983_v23, %v8976_v10  ;;  %v8479_v23 = vld [vmem:[%s10605_s4 + $0x590] sm:$0xff] }
0x1068   : > { %v4989_v25 = vadd.f32 1e-05, %v4987_v24  ;;  %v8481_v24 = vld [vmem:[%s10605_s4 + $0x5a0] sm:$0xff] }
0x106a   : > { %8704 = vrsqrt.f32 %v4989_v25  ;;  %vm4997_vm12 = vweird.f32 %v4989_v25 }
0x1070   : > { %v8705_v31 = vpop.eup %8704 }
0x1071   : > { %v4992_v38 = vmul.f32 %v8705_v31, %v4989_v25  ;;  %vm4998_vm11 = vweird.f32 %v8705_v31  ;;  %v8483_v25 = vld [vmem:[%s10605_s4 + $0x5b0] sm:$0xff] }
0x1072   : > { %vm4999_vm14 = vmor %vm4997_vm12, %vm4998_vm11 }
0x1073   : > { %v4993_v36 = vmul.f32 %v8705_v31, %v4992_v38 }
0x1075   : > { %v4994_v40 = vmul.f32 0.5, %v4993_v36  ;;  %v4986_v41 = vpop.xlane.xlu1 %4985 }
0x1076   : > { %v4988_v42 = vmul.f32 %v4986_v41, %v8976_v10 }
0x1077   : > { %v4995_v43 = vsub.f32 1.5, %v4994_v40 }
0x1078   : > { %v4990_v44 = vadd.f32 1e-05, %v4988_v42 }
0x1079   : > { %v4996_v45 = vmul.f32 %v8705_v31, %v4995_v43 }
0x107a   : > { %8706 = vrsqrt.f32 %v4990_v44  ;;  %vm5007_vm1 = vweird.f32 %v4990_v44 }
0x107b   : > { %v5000_v50 = vsel %vm4999_vm14, %v8705_v31, %v4996_v45  ;;  %v8485_v31 = vld [vmem:[%s10605_s4 + $0x5c0] sm:$0xff] }
0x107c   : > { %v5011_v51 = vmul.f32 %v5000_v50, %v4977_v9 }
0x107e   : > { %v5019_v52 = vmul.f32 %v8572_v47, %v5011_v51 }
0x1080   : > { %v8707_v55 = vpop.eup %8706  ;;  %v5027_v56 = vadd.f32 %v8573_v48, %v5019_v52 }
0x1081   : > { %v5002_v35 = vmul.f32 %v8707_v55, %v4990_v44  ;;  %vm5008_vm15 = vweird.f32 %v8707_v55 }
0x1082   : > { %v10174_v53 = vpack.c.bf16 %v5027_v56, %v5027_v56  ;;  %vm5009_vm2 = vmor %vm5007_vm1, %vm5008_vm15 }
0x1083   : > { %v5003_v60 = vmul.f32 %v8707_v55, %v5002_v35 }
0x1084   : > { %7955 = vmatmul.msk.bf16.vlgmr.msrb.gmra.mxu0 %vm442_vm0, %v10174_v53  ;;  %7964 = vmatmul.msk.bf16.vlgmr.msrb.gmra.mxu1 %vm442_vm0, %v10174_v53 }
0x1085   : > { %v5004_v62 = vmul.f32 0.5, %v5003_v60  ;;  %7973 = vmatmul.msk.bf16.vlgmr.msrb.gmra.mxu2 %vm442_vm0, %v10174_v53  ;;  %7982 = vmatmul.msk.bf16.vlgmr.msrb.gmra.mxu3 %vm442_vm0, %v10174_v53 }
0x1086   : > { %5352 = vmatpush.bf16.msrb.mxu0 %v8462_v58  ;;  %5377 = vmatpush.bf16.msrb.mxu1 %v8464_v59 }
0x1087   : > { %v5005_v63 = vsub.f32 1.5, %v5004_v62  ;;  %5402 = vmatpush.bf16.msrb.mxu2 %v8466_v61  ;;  %5427 = vmatpush.bf16.msrb.mxu3 %v8468_v34 }
0x1089   : > { %v5006_v3 = vmul.f32 %v8707_v55, %v5005_v63 }
0x108a   : > { %5353 = vmatpush.bf16.msrb.mxu0 %v8461_v57  ;;  %5378 = vmatpush.bf16.msrb.mxu1 %v8463_v0 }
0x108b   : > { %v5010_v6 = vsel %vm5009_vm2, %v8707_v55, %v5006_v3  ;;  %5403 = vmatpush.bf16.msrb.mxu2 %v8465_v1  ;;  %5428 = vmatpush.bf16.msrb.mxu3 %v8467_v2 }
0x108c   : > { %v5012_v8 = vmul.f32 %v5010_v6, %v10113_v15  ;;  %v8476_v15 = vld [vmem:[%s10605_s4 + $0x578] sm:$0xff] }
0x108e   : > { %v5020_v9 = vmul.f32 %v8574_v4, %v5012_v8 }
0x1090   : > { %v5028_v11 = vadd.f32 %v8575_v7, %v5020_v9 }
0x1092   : > { %v10215_v54 = vpack.c.bf16 %v5028_v11, %v5028_v11 }
0x1094   : > { %7991 = vmatmul.msk.bf16.vlgmr.msra.gmra.mxu0 %vm442_vm0, %v10215_v54  ;;  %8000 = vmatmul.msk.bf16.vlgmr.msra.gmra.mxu1 %vm442_vm0, %v10215_v54 }
0x1095   : > { %8009 = vmatmul.msk.bf16.vlgmr.msra.gmra.mxu2 %vm442_vm0, %v10215_v54  ;;  %8018 = vmatmul.msk.bf16.vlgmr.msra.gmra.mxu3 %vm442_vm0, %v10215_v54 }
0x1096   : > { %5452 = vmatpush.bf16.msra.mxu0 %v8470_v12  ;;  %5477 = vmatpush.bf16.msra.mxu1 %v8472_v13 }
0x1097   : > { %5502 = vmatpush.bf16.msra.mxu2 %v8474_v14  ;;  %5527 = vmatpush.bf16.msra.mxu3 %v8476_v15 }
0x109a   : > { %5453 = vmatpush.bf16.msra.mxu0 %v8469_v28  ;;  %5478 = vmatpush.bf16.msra.mxu1 %v8471_v16 }
0x109b   : > { %5503 = vmatpush.bf16.msra.mxu2 %v8473_v17  ;;  %5528 = vmatpush.bf16.msra.mxu3 %v8475_v18 }
0x10a4   : > { %8027 = vmatmul.msk.bf16.vlgmr.msrb.gmra.mxu0 %vm442_vm0, %v10174_v53  ;;  %8036 = vmatmul.msk.bf16.vlgmr.msrb.gmra.mxu1 %vm442_vm0, %v10174_v53 }
0x10a5   : > { %8045 = vmatmul.msk.bf16.vlgmr.msrb.gmra.mxu2 %vm442_vm0, %v10174_v53  ;;  %8054 = vmatmul.msk.bf16.vlgmr.msrb.gmra.mxu3 %vm442_vm0, %v10174_v53 }
0x10a6   : > { %5552 = vmatpush.bf16.msrb.mxu0 %v8478_v19  ;;  %5577 = vmatpush.bf16.msrb.mxu1 %v8480_v20 }
0x10a7   : > { %5602 = vmatpush.bf16.msrb.mxu2 %v8482_v21  ;;  %5627 = vmatpush.bf16.msrb.mxu3 %v8484_v22 }
0x10aa   : > { %5553 = vmatpush.bf16.msrb.mxu0 %v8477_v46  ;;  %5578 = vmatpush.bf16.msrb.mxu1 %v8479_v23 }
0x10ab   : > { %5603 = vmatpush.bf16.msrb.mxu2 %v8481_v24  ;;  %5628 = vmatpush.bf16.msrb.mxu3 %v8483_v25 }
0x10b4   : > { %8063 = vmatmul.msk.bf16.vlgmr.msra.gmra.mxu0 %vm442_vm0, %v10215_v54  ;;  %8072 = vmatmul.msk.bf16.vlgmr.msra.gmra.mxu1 %vm442_vm0, %v10215_v54 }
0x10b5   : > { %8081 = vmatmul.msk.bf16.vlgmr.msra.gmra.mxu2 %vm442_vm0, %v10215_v54  ;;  %8090 = vmatmul.msk.bf16.vlgmr.msra.gmra.mxu3 %vm442_vm0, %v10215_v54 }
0x10b6   : > { %5652 = vmatpush.bf16.msra.mxu0 %v8486_v26  ;;  %5677 = vmatpush.bf16.msra.mxu1 %v8488_v27 }
0x10b7   : > { %5702 = vmatpush.bf16.msra.mxu2 %v8490_v29  ;;  %5727 = vmatpush.bf16.msra.mxu3 %v8492_v30 }
0x10ba   : > { %5653 = vmatpush.bf16.msra.mxu0 %v8485_v31  ;;  %5678 = vmatpush.bf16.msra.mxu1 %v8487_v32 }
0x10bb   : > { %5703 = vmatpush.bf16.msra.mxu2 %v8489_v33  ;;  %5728 = vmatpush.bf16.msra.mxu3 %v8491_v37 }
0x10c4   : > { %8099 = vmatmul.msk.bf16.vlgmr.msrb.gmra.mxu0 %vm442_vm0, %v10174_v53  ;;  %8108 = vmatmul.msk.bf16.vlgmr.msrb.gmra.mxu1 %vm442_vm0, %v10174_v53 }
0x10c5   : > { %8117 = vmatmul.msk.bf16.vlgmr.msrb.gmra.mxu2 %vm442_vm0, %v10174_v53  ;;  %8126 = vmatmul.msk.bf16.vlgmr.msrb.gmra.mxu3 %vm442_vm0, %v10174_v53 }
0x10d4   : > { %8135 = vmatmul.msk.bf16.vlgmr.msra.gmra.mxu0 %vm442_vm0, %v10215_v54  ;;  %8144 = vmatmul.msk.bf16.vlgmr.msra.gmra.mxu1 %vm442_vm0, %v10215_v54 }
0x10d5   : > { %8153 = vmatmul.msk.bf16.vlgmr.msra.gmra.mxu2 %vm442_vm0, %v10215_v54  ;;  %8162 = vmatmul.msk.bf16.vlgmr.msra.gmra.mxu3 %vm442_vm0, %v10215_v54 }
0x1101   : > { %v5152_v38 = vpop.f32.mrf.mxu0  ;;  %v5177_v39 = vpop.f32.mrf.mxu1 }
0x1102   : > { %v5746_v2 = vpack.c.bf16 %v5152_v38, %v5152_v38  ;;  %v5747_v3 = vpack.c.bf16 %v5177_v39, %v5177_v39 }
0x1108   : > { %v5202_v36 = vpop.f32.mrf.mxu2  ;;  %v5227_v40 = vpop.f32.mrf.mxu3 }
0x1109   : > { %v5154_v41 = vpop.f32.mrf.mxu0  ;;  %v5179_v42 = vpop.f32.mrf.mxu1  ;;  %v5748_v9 = vpack.c.bf16 %v5202_v36, %v5202_v36  ;;  %v5749_v11 = vpack.c.bf16 %v5227_v40, %v5227_v40 }
0x1110   : > { %v5204_v43 = vpop.f32.mrf.mxu2  ;;  %v5229_v44 = vpop.f32.mrf.mxu3 }
0x1111   : > { %v5255_v45 = vpop.f32.mrf.mxu0  ;;  %v5280_v47 = vpop.f32.mrf.mxu1 }
0x1112   : > { %v5750_v22 = vpack.c.bf16 %v5255_v45, %v5255_v45  ;;  %v5751_v46 = vpack.c.bf16 %v5280_v47, %v5280_v47 }
0x1118   : > { %v10329_v50 = vpop.f32.mrf.mxu2  ;;  %v10331_v48 = vpop.f32.mrf.mxu3 }
0x1119   : > { %v5257_v51 = vpop.f32.mrf.mxu0  ;;  %v5282_v52 = vpop.f32.mrf.mxu1  ;;  %v5752_v27 = vpack.c.bf16 %v10329_v50, %v10329_v50  ;;  %v5753_v29 = vpack.c.bf16 %v10331_v48, %v10331_v48 }
0x1120   : > { %v5307_v55 = vpop.f32.mrf.mxu2  ;;  %v5332_v56 = vpop.f32.mrf.mxu3 }
0x1121   : > { %v5355_v35 = vpop.f32.mrf.mxu0  ;;  %v5380_v53 = vpop.f32.mrf.mxu1 }
0x1122   : > { %v5754_v58 = vpack.c.bf16 %v5355_v35, %v5355_v35  ;;  %v5755_v59 = vpack.c.bf16 %v5380_v53, %v5380_v53 }
0x1124   : > { %v5766_v60 = vsel %vm1234_vm8, %v5754_v58, 0  ;;  %v5785_v61 = vsel %vm1234_vm8, %v5755_v59, 0 }
0x1125   : > { %5775 = vmatpush.bf16.xpose.msrb.mxu0 %v5766_v60  ;;  %5794 = vmatpush.bf16.xpose.msrb.mxu1 %v5785_v61 }
0x1128   : > { %v5405_v34 = vpop.f32.mrf.mxu2  ;;  %v5430_v62 = vpop.f32.mrf.mxu3 }
0x1129   : > { %v5756_v57 = vpack.c.bf16 %v5405_v34, %v5405_v34  ;;  %v5757_v0 = vpack.c.bf16 %v5430_v62, %v5430_v62  ;;  %v5357_v63 = vpop.f32.mrf.mxu0  ;;  %v5382_v1 = vpop.f32.mrf.mxu1 }
0x112b   : > { %v5804_v4 = vsel %vm1234_vm8, %v5756_v57, 0  ;;  %v5823_v6 = vsel %vm1234_vm8, %v5757_v0, 0 }
0x112c   : > { %5813 = vmatpush.bf16.xpose.msrb.mxu2 %v5804_v4  ;;  %5832 = vmatpush.bf16.xpose.msrb.mxu3 %v5823_v6 }
0x112d   : > { %8173 = vmatmul.msk.bf16.vlgmr.msrb.gmra.mxu0 %vm1234_vm8, %v5746_v2  ;;  %8174 = vmatmul.msk.bf16.vlgmr.msrb.gmra.mxu1 %vm1234_vm8, %v5747_v3 }
0x1130   : > { %v5407_v7 = vpop.f32.mrf.mxu2  ;;  %v5432_v8 = vpop.f32.mrf.mxu3 }
0x1131   : > { %v5455_v54 = vpop.f32.mrf.mxu0  ;;  %v5480_v12 = vpop.f32.mrf.mxu1 }
0x1132   : > { %v5758_v13 = vpack.c.bf16 %v5455_v54, %v5455_v54  ;;  %v5759_v14 = vpack.c.bf16 %v5480_v12, %v5480_v12 }
0x1133   : > { %8175 = vmatmul.msk.bf16.vlgmr.msrb.gmra.mxu2 %vm1234_vm8, %v5748_v9  ;;  %8176 = vmatmul.msk.bf16.vlgmr.msrb.gmra.mxu3 %vm1234_vm8, %v5749_v11 }
0x1134   : > { %v5842_v15 = vsel %vm1234_vm8, %v5758_v13, 0  ;;  %v5861_v28 = vsel %vm1234_vm8, %v5759_v14, 0 }
0x1135   : > { %5851 = vmatpush.bf16.xpose.msra.mxu0 %v5842_v15  ;;  %5870 = vmatpush.bf16.xpose.msra.mxu1 %v5861_v28 }
0x1138   : > { %v5505_v16 = vpop.f32.mrf.mxu2  ;;  %v5530_v17 = vpop.f32.mrf.mxu3 }
0x1139   : > { %v5760_v18 = vpack.c.bf16 %v5505_v16, %v5505_v16  ;;  %v5761_v19 = vpack.c.bf16 %v5530_v17, %v5530_v17  ;;  %v5457_v20 = vpop.f32.mrf.mxu0  ;;  %v5482_v21 = vpop.f32.mrf.mxu1 }
0x113b   : > { %v5880_v23 = vsel %vm1234_vm8, %v5760_v18, 0  ;;  %v5899_v24 = vsel %vm1234_vm8, %v5761_v19, 0 }
0x113c   : > { %5889 = vmatpush.bf16.xpose.msra.mxu2 %v5880_v23  ;;  %5908 = vmatpush.bf16.xpose.msra.mxu3 %v5899_v24 }
0x113d   : > { %8177 = vmatmul.msk.bf16.vlgmr.msra.gmra.mxu0 %vm1234_vm8, %v5750_v22  ;;  %8178 = vmatmul.msk.bf16.vlgmr.msra.gmra.mxu1 %vm1234_vm8, %v5751_v46 }
0x1140   : > { %v5507_v25 = vpop.f32.mrf.mxu2  ;;  %v5532_v26 = vpop.f32.mrf.mxu3 }
0x1141   : > { %v5555_v30 = vpop.f32.mrf.mxu0  ;;  %v5580_v31 = vpop.f32.mrf.mxu1 }
0x1142   : > { %v6018_v32 = vpack.c.bf16 %v5555_v30, %v5555_v30  ;;  %v6019_v33 = vpack.c.bf16 %v5580_v31, %v5580_v31 }
0x1143   : > { %8179 = vmatmul.msk.bf16.vlgmr.msra.gmra.mxu2 %vm1234_vm8, %v5752_v27  ;;  %8180 = vmatmul.msk.bf16.vlgmr.msra.gmra.mxu3 %vm1234_vm8, %v5753_v29 }
0x1144   : > { %v6030_v37 = vsel %vm1502_vm9, %v6018_v32, 0  ;;  %v6049_v38 = vsel %vm1502_vm9, %v6019_v33, 0 }
0x1145   : > { %6039 = vmatpush.bf16.msrb.mxu0 %v6030_v37  ;;  %6058 = vmatpush.bf16.msrb.mxu1 %v6049_v38 }
0x1148   : > { %v5605_v39 = vpop.f32.mrf.mxu2  ;;  %v5630_v36 = vpop.f32.mrf.mxu3 }
0x1149   : > { %v6020_v40 = vpack.c.bf16 %v5605_v39, %v5605_v39  ;;  %v6021_v41 = vpack.c.bf16 %v5630_v36, %v5630_v36  ;;  %v5557_v42 = vpop.f32.mrf.mxu0  ;;  %v5582_v43 = vpop.f32.mrf.mxu1 }
0x114b   : > { %v6068_v44 = vsel %vm1502_vm9, %v6020_v40, 0  ;;  %v6087_v45 = vsel %vm1502_vm9, %v6021_v41, 0 }
0x114c   : > { %6077 = vmatpush.bf16.msrb.mxu2 %v6068_v44  ;;  %6096 = vmatpush.bf16.msrb.mxu3 %v6087_v45 }
0x1150   : > { %v5607_v47 = vpop.f32.mrf.mxu2  ;;  %v5632_v50 = vpop.f32.mrf.mxu3 }
0x1151   : > { %v5655_v48 = vpop.f32.mrf.mxu0  ;;  %v5680_v51 = vpop.f32.mrf.mxu1 }
0x1152   : > { %v6022_v52 = vpack.c.bf16 %v5655_v48, %v5655_v48  ;;  %v6023_v55 = vpack.c.bf16 %v5680_v51, %v5680_v51 }
0x1154   : > { %v6106_v56 = vsel %vm1502_vm9, %v6022_v52, 0  ;;  %v6125_v35 = vsel %vm1502_vm9, %v6023_v55, 0 }
0x1155   : > { %6115 = vmatpush.bf16.msra.mxu0 %v6106_v56  ;;  %6134 = vmatpush.bf16.msra.mxu1 %v6125_v35 }
0x1158   : > { %v5705_v53 = vpop.f32.mrf.mxu2  ;;  %v5730_v58 = vpop.f32.mrf.mxu3 }
0x1159   : > { %v6024_v59 = vpack.c.bf16 %v5705_v53, %v5705_v53  ;;  %v6025_v60 = vpack.c.bf16 %v5730_v58, %v5730_v58  ;;  %v5657_v61 = vpop.f32.mrf.mxu0  ;;  %v5682_v34 = vpop.f32.mrf.mxu1 }
0x115b   : > { %v6144_v62 = vsel %vm1502_vm9, %v6024_v59, 0  ;;  %v6163_v57 = vsel %vm1502_vm9, %v6025_v60, 0 }
0x115c   : > { %6153 = vmatpush.bf16.msra.mxu2 %v6144_v62  ;;  %6172 = vmatpush.bf16.msra.mxu3 %v6163_v57 }
0x1160   : > { %v5707_v0 = vpop.f32.mrf.mxu2  ;;  %v5732_v63 = vpop.f32.mrf.mxu3 }
0x11aa   : > { %v5777_v1 = vpop.f32.mrf.mxu0  ;;  %v5796_v2 = vpop.f32.mrf.mxu1 }
0x11ab   : > { %v5914_v3 = vmul.f32 0.35355338, %v5777_v1  ;;  %v5915_v28 = vmul.f32 0.35355338, %v5796_v2 }
0x11ad   : > { %v5922_v4 = vsel %vm1234_vm8, %v5914_v3, -inf  ;;  %v5925_v18 = vsel %vm1234_vm8, %v5915_v28, -inf }
0x11ae   : > { %5923 = vmax.xlane.f32.xlu1 %v5922_v4 }
0x11b2   : > { %v5779_v6 = vpop.f32.mrf.mxu0  ;;  %v5798_v7 = vpop.f32.mrf.mxu1 }
0x11b6   : > { %v5815_v8 = vpop.f32.mrf.mxu2  ;;  %v5834_v9 = vpop.f32.mrf.mxu3 }
0x11b7   : > { %v5916_v11 = vmul.f32 0.35355338, %v5815_v8  ;;  %v5917_v54 = vmul.f32 0.35355338, %v5834_v9 }
0x11b9   : > { %v5931_v12 = vsel %vm1234_vm8, %v5917_v54, -inf  ;;  %v5928_v13 = vsel %vm1234_vm8, %v5916_v11, -inf }
0x11ba   : > { %5932 = vmax.xlane.f32.xlu0 %v5931_v12  ;;  %5929 = vmax.xlane.f32.xlu2 %v5928_v13  ;;  %v5853_v14 = vpop.f32.mrf.mxu0  ;;  %v5872_v15 = vpop.f32.mrf.mxu1 }
0x11bb   : > { %v5918_v21 = vmul.f32 0.35355338, %v5853_v14  ;;  %v5919_v29 = vmul.f32 0.35355338, %v5872_v15 }
0x11bd   : > { %v5934_v27 = vsel %vm1234_vm8, %v5918_v21, -inf  ;;  %v5937_v32 = vsel %vm1234_vm8, %v5919_v29, -inf }
0x11be   : > { %v5817_v16 = vpop.f32.mrf.mxu2  ;;  %v5836_v17 = vpop.f32.mrf.mxu3 }
0x11c2   : > { %5926 = vmax.xlane.f32.xlu2 %v5925_v18  ;;  %v5855_v19 = vpop.f32.mrf.mxu0  ;;  %v5874_v20 = vpop.f32.mrf.mxu1 }
0x11c6   : > { %v5891_v22 = vpop.f32.mrf.mxu2  ;;  %v5910_v46 = vpop.f32.mrf.mxu3 }
0x11c7   : > { %v5920_v23 = vmul.f32 0.35355338, %v5891_v22  ;;  %v5921_v24 = vmul.f32 0.35355338, %v5910_v46 }
0x11c9   : > { %v5940_v25 = vsel %vm1234_vm8, %v5920_v23, -inf  ;;  %v5943_v26 = vsel %vm1234_vm8, %v5921_v24, -inf }
0x11ca   : > { %5941 = vmax.xlane.f32.xlu0 %v5940_v25  ;;  %5944 = vmax.xlane.f32.xlu1 %v5943_v26 }
0x11cb   : > { %5935 = vmax.xlane.f32.xlu2 %v5934_v27 }
0x11ce   : > { %v5893_v30 = vpop.f32.mrf.mxu2  ;;  %v5912_v31 = vpop.f32.mrf.mxu3 }
0x11d2   : > { %5938 = vmax.xlane.f32.xlu0 %v5937_v32 }
0x1221   : > { %v5924_v33 = vpop.xlane.xlu1 %5923 }
0x1222   : > { %v5946_v37 = vsub.f32 %v5914_v3, %v5924_v33 }
0x1224   : > { %v5954_v38 = vmul.f32 1.442695, %v5946_v37 }
0x1226   : > { %8708 = vpow2.f32 %v5954_v38 }
0x122c   : > { %v8709_v39 = vpop.eup %8708 }
0x122d   : > { %v5933_v36 = vpop.xlane.xlu0 %5932  ;;  %v5930_v40 = vpop.xlane.xlu2 %5929  ;;  %v5970_v41 = vsel %vm1234_vm8, %v8709_v39, 0.0 }
0x122e   : > { %v5949_v42 = vsub.f32 %v5917_v54, %v5933_v36  ;;  %v5948_v43 = vsub.f32 %v5916_v11, %v5930_v40  ;;  %5971 = vadd.xlane.f32.xlu0 %v5970_v41 }
0x1230   : > { %v5960_v44 = vmul.f32 1.442695, %v5949_v42  ;;  %v5958_v45 = vmul.f32 1.442695, %v5948_v43 }
0x1232   : > { %8710 = vpow2.f32 %v5960_v44 }
0x1233   : > { %8712 = vpow2.f32 %v5958_v45 }
0x1235   : > { %v5927_v47 = vpop.xlane.xlu2 %5926 }
0x1236   : > { %v5947_v50 = vsub.f32 %v5915_v28, %v5927_v47  ;;  %v8163_v47 = vld [vmem:[%s10606_s5 + $0x60] sm:$0xf] }
0x1238   : > { %v8711_v48 = vpop.eup %8710  ;;  %v5956_v51 = vmul.f32 1.442695, %v5947_v50  ;;  %v6190_v50 = vsel %vm1502_vm9, %v8163_v47, 0 }
0x1239   : > { %v8713_v52 = vpop.eup %8712  ;;  %v5979_v55 = vsel %vm1234_vm8, %v8711_v48, 0.0 }
0x123a   : > { %8714 = vpow2.f32 %v5956_v51  ;;  %v5976_v56 = vsel %vm1234_vm8, %v8713_v52, 0.0  ;;  %5980 = vadd.xlane.f32.xlu2 %v5979_v55  ;;  %v8166_v51 = vld [vmem:[%s10606_s5 + $0x6c] sm:$0xf] }
0x123b   : > { %5977 = vadd.xlane.f32.xlu1 %v5976_v56  ;;  %v6247_v55 = vsel %vm1502_vm9, %v8166_v51, 0  ;;  %v8164_v56 = vld [vmem:[%s10606_s5 + $0x64] sm:$0xf] }
0x123d   : > { %v5942_v35 = vpop.xlane.xlu0 %5941  ;;  %v5945_v53 = vpop.xlane.xlu1 %5944 }
0x123e   : > { %v5952_v58 = vsub.f32 %v5920_v23, %v5942_v35  ;;  %v5953_v59 = vsub.f32 %v5921_v24, %v5945_v53  ;;  %v5936_v60 = vpop.xlane.xlu2 %5935  ;;  %v6209_v35 = vsel %vm1502_vm9, %v8164_v56, 0  ;;  %v8167_v53 = vld [vmem:[%s10606_s5 + $0x70] sm:$0xf] }
0x123f   : > { %v5950_v61 = vsub.f32 %v5918_v21, %v5936_v60 }
0x1240   : > { %v8715_v34 = vpop.eup %8714  ;;  %v5966_v62 = vmul.f32 1.442695, %v5952_v58  ;;  %v5968_v57 = vmul.f32 1.442695, %v5953_v59  ;;  %v6266_v58 = vsel %vm1502_vm9, %v8167_v53, 0 }
0x1241   : > { %v5962_v0 = vmul.f32 1.442695, %v5950_v61  ;;  %v5973_v63 = vsel %vm1234_vm8, %v8715_v34, 0.0  ;;  %v8169_v59 = vld [vmem:[%s10606_s5 + $0x78] sm:$0xf] }
0x1242   : > { %8716 = vpow2.f32 %v5966_v62  ;;  %v6304_v61 = vsel %vm1502_vm9, %v8169_v59, 0  ;;  %v8170_v62 = vld [vmem:[%s10606_s5 + $0x7c] sm:$0xf] }
0x1243   : > { %8718 = vpow2.f32 %v5968_v57  ;;  %5974 = vadd.xlane.f32.xlu1 %v5973_v63  ;;  %v6323_v57 = vsel %vm1502_vm9, %v8170_v62, 0 }
0x1244   : > { %8720 = vpow2.f32 %v5962_v0  ;;  %v8168_v0 = vld [vmem:[%s10606_s5 + $0x74] sm:$0xf] }
0x1245   : > { %v5939_v1 = vpop.xlane.xlu0 %5938  ;;  %v6285_v63 = vsel %vm1502_vm9, %v8168_v0, 0 }
0x1246   : > { %v5951_v2 = vsub.f32 %v5919_v29, %v5939_v1 }
0x1248   : > { %v8717_v3 = vpop.eup %8716  ;;  %v5964_v4 = vmul.f32 1.442695, %v5951_v2 }
0x1249   : > { %v8719_v6 = vpop.eup %8718  ;;  %v5988_v7 = vsel %vm1234_vm8, %v8717_v3, 0.0 }
0x124a   : > { %v8721_v8 = vpop.eup %8720  ;;  %8722 = vpow2.f32 %v5964_v4  ;;  %v5991_v9 = vsel %vm1234_vm8, %v8719_v6, 0.0  ;;  %5989 = vadd.xlane.f32.xlu2 %v5988_v7 }
0x124b   : > { %5992 = vadd.xlane.f32.xlu0 %v5991_v9  ;;  %v5982_v11 = vsel %vm1234_vm8, %v8721_v8, 0.0 }
0x124c   : > { %5983 = vadd.xlane.f32.xlu1 %v5982_v11 }
0x1250   : > { %v8723_v54 = vpop.eup %8722 }
0x1251   : > { %v5985_v12 = vsel %vm1234_vm8, %v8723_v54, 0.0 }
0x1252   : > { %5986 = vadd.xlane.f32.xlu2 %v5985_v12 }
0x12a1   : > { %v5972_v13 = vpop.xlane.xlu0 %5971 }
0x12a2   : > { %8724 = vrcp.f32 %v5972_v13 }
0x12a8   : > { %v8725_v14 = vpop.eup %8724 }
0x12a9   : > { %v6002_v15 = vmul.f32 %v8725_v14, %v8709_v39 }
0x12ab   : > { %v6010_v28 = vpack.c.bf16 %v6002_v15, %v6002_v15 }
0x12ad   : > { %8181 = vmatmul.msk.bf16.vlgmr.msrb.gmra.mxu0 %vm1234_vm8, %v6010_v28  ;;  %v5981_v16 = vpop.xlane.xlu2 %5980 }
0x12ae   : > { %v5978_v17 = vpop.xlane.xlu1 %5977  ;;  %8726 = vrcp.f32 %v5981_v16  ;;  %6199 = vmatpush.bf16.msrb.mxu0 %v6190_v50 }
0x12af   : > { %8728 = vrcp.f32 %v5978_v17 }
0x12b4   : > { %v8727_v18 = vpop.eup %8726 }
0x12b5   : > { %v8729_v19 = vpop.eup %8728  ;;  %v6005_v20 = vmul.f32 %v8727_v18, %v8711_v48  ;;  %v8165_v48 = vld [vmem:[%s10606_s5 + $0x68] sm:$0xf] }
0x12b6   : > { %v6004_v21 = vmul.f32 %v8729_v19, %v8713_v52  ;;  %v5975_v22 = vpop.xlane.xlu1 %5974  ;;  %v6228_v52 = vsel %vm1502_vm9, %v8165_v48, 0 }
0x12b7   : > { %v6013_v46 = vpack.c.bf16 %v6005_v20, %v6005_v20  ;;  %8730 = vrcp.f32 %v5975_v22 }
0x12b8   : > { %v6012_v23 = vpack.c.bf16 %v6004_v21, %v6004_v21 }
0x12b9   : > { %8184 = vmatmul.msk.bf16.vlgmr.msrb.gmra.mxu3 %vm1234_vm8, %v6013_v46 }
0x12ba   : > { %8183 = vmatmul.msk.bf16.vlgmr.msrb.gmra.mxu2 %vm1234_vm8, %v6012_v23  ;;  %6256 = vmatpush.bf16.msrb.mxu3 %v6247_v55 }
0x12bb   : > { %6237 = vmatpush.bf16.msrb.mxu2 %v6228_v52 }
0x12bd   : > { %v8731_v24 = vpop.eup %8730  ;;  %v5990_v25 = vpop.xlane.xlu2 %5989 }
0x12be   : > { %v6003_v26 = vmul.f32 %v8731_v24, %v8715_v34  ;;  %v5993_v27 = vpop.xlane.xlu0 %5992  ;;  %8732 = vrcp.f32 %v5990_v25 }
0x12bf   : > { %8734 = vrcp.f32 %v5993_v27  ;;  %v5984_v29 = vpop.xlane.xlu1 %5983 }
0x12c0   : > { %v6011_v30 = vpack.c.bf16 %v6003_v26, %v6003_v26  ;;  %8736 = vrcp.f32 %v5984_v29 }
0x12c2   : > { %8182 = vmatmul.msk.bf16.vlgmr.msrb.gmra.mxu1 %vm1234_vm8, %v6011_v30 }
0x12c3   : > { %6218 = vmatpush.bf16.msrb.mxu1 %v6209_v35 }
0x12c4   : > { %v8733_v31 = vpop.eup %8732 }
0x12c5   : > { %v8735_v32 = vpop.eup %8734  ;;  %v6008_v33 = vmul.f32 %v8733_v31, %v8717_v3  ;;  %v5987_v37 = vpop.xlane.xlu2 %5986 }
0x12c6   : > { %v8737_v38 = vpop.eup %8736  ;;  %v6009_v39 = vmul.f32 %v8735_v32, %v8719_v6  ;;  %8738 = vrcp.f32 %v5987_v37 }
0x12c7   : > { %v6006_v36 = vmul.f32 %v8737_v38, %v8721_v8  ;;  %v6016_v40 = vpack.c.bf16 %v6008_v33, %v6008_v33  ;;  %v8576_v33 = vld [vmem:[%s10607_s6 + $0x6] ss:$0 sm:$0xff] }
0x12c8   : > { %v6017_v41 = vpack.c.bf16 %v6009_v39, %v6009_v39 }
0x12c9   : > { %v6014_v42 = vpack.c.bf16 %v6006_v36, %v6006_v36 }
0x12ca   : > { %8187 = vmatmul.msk.bf16.vlgmr.msra.gmra.mxu2 %vm1234_vm8, %v6016_v40  ;;  %8188 = vmatmul.msk.bf16.vlgmr.msra.gmra.mxu3 %vm1234_vm8, %v6017_v41 }
0x12cb   : > { %8185 = vmatmul.msk.bf16.vlgmr.msra.gmra.mxu0 %vm1234_vm8, %v6014_v42  ;;  %6313 = vmatpush.bf16.msra.mxu2 %v6304_v61 }
0x12cc   : > { %v8739_v43 = vpop.eup %8738  ;;  %6275 = vmatpush.bf16.msra.mxu0 %v6266_v58  ;;  %6332 = vmatpush.bf16.msra.mxu3 %v6323_v57 }
0x12cd   : > { %v6007_v44 = vmul.f32 %v8739_v43, %v8723_v54 }
0x12cf   : > { %v6015_v45 = vpack.c.bf16 %v6007_v44, %v6007_v44 }
0x12d2   : > { %8186 = vmatmul.msk.bf16.vlgmr.msra.gmra.mxu1 %vm1234_vm8, %v6015_v45 }
0x12d3   : > { %6294 = vmatpush.bf16.msra.mxu1 %v6285_v63 }
0x132a   : > { %v6041_v60 = vpop.f32.mrf.mxu0 }
0x132b   : > { %v6178_v34 = vpack.c.bf16 %v6041_v60, %v6041_v60 }
0x132d   : > { %8189 = vmatmul.msk.bf16.vlgmr.msrb.gmra.mxu0 %vm1234_vm8, %v6178_v34 }
0x1332   : > { %v6043_v1 = vpop.f32.mrf.mxu0 }
0x133c   : > { %v6098_v2 = vpop.f32.mrf.mxu3 }
0x133d   : > { %v6079_v3 = vpop.f32.mrf.mxu2  ;;  %v6181_v4 = vpack.c.bf16 %v6098_v2, %v6098_v2 }
0x133e   : > { %v6180_v6 = vpack.c.bf16 %v6079_v3, %v6079_v3 }
0x133f   : > { %v6060_v7 = vpop.f32.mrf.mxu1  ;;  %8192 = vmatmul.msk.bf16.vlgmr.msrb.gmra.mxu3 %vm1234_vm8, %v6181_v4 }
0x1340   : > { %v6179_v8 = vpack.c.bf16 %v6060_v7, %v6060_v7  ;;  %8191 = vmatmul.msk.bf16.vlgmr.msrb.gmra.mxu2 %vm1234_vm8, %v6180_v6 }
0x1342   : > { %8190 = vmatmul.msk.bf16.vlgmr.msrb.gmra.mxu1 %vm1234_vm8, %v6179_v8 }
0x1344   : > { %v6100_v9 = vpop.f32.mrf.mxu3 }
0x1345   : > { %v6081_v11 = vpop.f32.mrf.mxu2  ;;  %v8494_v9 = vld [vmem:[%s10608_s7 + $0x28] sm:$0xff] }
0x1346   : > { %6489 = vmatpush.bf16.msrb.mxu0 %v8494_v9  ;;  %v8493_v11 = vld [vmem:[%s10608_s7 + $0x20] sm:$0xff] }
0x1347   : > { %v6062_v54 = vpop.f32.mrf.mxu1  ;;  %v8497_v9 = vld [vmem:[%s10610_s9 + $0x40] sm:$0xff] }
0x1348   : > { %v6117_v12 = vpop.f32.mrf.mxu0 }
0x1349   : > { %v6182_v13 = vpack.c.bf16 %v6117_v12, %v6117_v12 }
0x134a   : > { %6490 = vmatpush.bf16.msrb.mxu0 %v8493_v11 }
0x134b   : > { %8193 = vmatmul.msk.bf16.vlgmr.msra.gmra.mxu0 %vm1234_vm8, %v6182_v13 }
0x134d   : > { %v6155_v14 = vpop.f32.mrf.mxu2  ;;  %v6174_v15 = vpop.f32.mrf.mxu3 }
0x134e   : > { %v6184_v28 = vpack.c.bf16 %v6155_v14, %v6155_v14  ;;  %v6185_v16 = vpack.c.bf16 %v6174_v15, %v6174_v15  ;;  %v8496_v14 = vld [vmem:[%s10608_s7 + $0x38] sm:$0xff] }
0x134f   : > { %v6136_v17 = vpop.f32.mrf.mxu1  ;;  %6517 = vmatpush.bf16.msrb.mxu1 %v8496_v14 }
0x1350   : > { %v6119_v18 = vpop.f32.mrf.mxu0  ;;  %v6183_v19 = vpack.c.bf16 %v6136_v17, %v6136_v17  ;;  %8195 = vmatmul.msk.bf16.vlgmr.msra.gmra.mxu2 %vm1234_vm8, %v6184_v28  ;;  %8196 = vmatmul.msk.bf16.vlgmr.msra.gmra.mxu3 %vm1234_vm8, %v6185_v16  ;;  %v8495_v28 = vld [vmem:[%s10608_s7 + $0x30] sm:$0xff] }
0x1352   : > { %8194 = vmatmul.msk.bf16.vlgmr.msra.gmra.mxu1 %vm1234_vm8, %v6183_v19 }
0x1353   : > { %6518 = vmatpush.bf16.msrb.mxu1 %v8495_v28  ;;  %v8504_v28 = vld [vmem:[%s10610_s9 + $0x78] sm:$0xff] }
0x1354   : > { %6691 = vmatpush.bf16.msrb.mxu3 %v8504_v28 }
0x1355   : > { %v6157_v20 = vpop.f32.mrf.mxu2  ;;  %v6176_v21 = vpop.f32.mrf.mxu3 }
0x1357   : > { %v6138_v22 = vpop.f32.mrf.mxu1 }
0x13aa   : > { %v6201_v46 = vpop.f32.mrf.mxu0 }
0x13ab   : > { %v6338_v26 = vsel %vm442_vm0, %v6201_v46, 0.0 }
0x13b2   : > { %v6203_v23 = vpop.f32.mrf.mxu0 }
0x13b3   : > { %v8578_v23 = vld [vmem:[%s10625_s2 + $0x8] ss:$0 sm:$0xff] }
0x13bf   : > { %v6220_v24 = vpop.f32.mrf.mxu1 }
0x13c0   : > { %v6339_v25 = vsel %vm442_vm0, %v6220_v24, 0.0 }
0x13c1   : > { %v6340_v29 = vadd.f32 %v6339_v25, %v6338_v26  ;;  %v8579_v25 = vld [vmem:[%s10626_s3 + $0x8] ss:$0 sm:$0xff] }
0x13c2   : > { %v6258_v27 = vpop.f32.mrf.mxu3 }
0x13c3   : > { %v6239_v30 = vpop.f32.mrf.mxu2  ;;  %v6343_v37 = vsel %vm442_vm0, %v6258_v27, 0.0 }
0x13c4   : > { %v6341_v31 = vsel %vm442_vm0, %v6239_v30, 0.0 }
0x13c5   : > { %v6342_v32 = vadd.f32 %v6341_v31, %v6340_v29 }
0x13c7   : > { %v6344_v38 = vadd.f32 %v6343_v37, %v6342_v32  ;;  %v6222_v39 = vpop.f32.mrf.mxu1 }
0x13c8   : > { %v6277_v36 = vpop.f32.mrf.mxu0  ;;  %v8580_v39 = vld [vmem:[%s10625_s2 + $0x9] ss:$0 sm:$0xff] }
0x13c9   : > { %v6358_v40 = vadd.f32 %v8576_v33, %v6344_v38  ;;  %v6345_v48 = vsel %vm442_vm0, %v6277_v36, 0.0 }
0x13ca   : > { %v6260_v41 = vpop.f32.mrf.mxu3 }
0x13cb   : > { %v6241_v42 = vpop.f32.mrf.mxu2  ;;  %v10433_v43 = vadd.f32 %v6358_v40, %v10092_v49  ;;  %v8577_v49 = vld [vmem:[%s10607_s6 + $0x7] ss:$0 sm:$0xff]  ;;  %v8581_v40 = vld [vmem:[%s10626_s3 + $0x9] ss:$0 sm:$0xff] }
0x13cd   : > { %v6400_v44 = vsel %vm442_vm0, %v10433_v43, 0.0 }
0x13ce   : > { %6401 = vadd.xlane.f32.xlu0 %v6400_v44 }
0x13cf   : > { %v6296_v45 = vpop.f32.mrf.mxu1 }
0x13d0   : > { %v6279_v47 = vpop.f32.mrf.mxu0  ;;  %v6346_v50 = vsel %vm442_vm0, %v6296_v45, 0.0 }
0x13d1   : > { %v6347_v51 = vadd.f32 %v6346_v50, %v6345_v48  ;;  %v8582_v47 = vld [vmem:[%s10609_s8 + $0x2] ss:$0 sm:$0xff] }
0x13d3   : > { %v6315_v52 = vpop.f32.mrf.mxu2  ;;  %v6334_v55 = vpop.f32.mrf.mxu3 }
0x13d4   : > { %v6348_v56 = vsel %vm442_vm0, %v6315_v52, 0.0  ;;  %v6350_v53 = vsel %vm442_vm0, %v6334_v55, 0.0 }
0x13d5   : > { %v6349_v35 = vadd.f32 %v6348_v56, %v6347_v51 }
0x13d7   : > { %v6351_v58 = vadd.f32 %v6350_v53, %v6349_v35  ;;  %v6298_v59 = vpop.f32.mrf.mxu1  ;;  %v8500_v53 = vld [vmem:[%s10610_s9 + $0x58] sm:$0xff] }
0x13d8   : > { %6651 = vmatpush.bf16.msrb.mxu2 %v8500_v53 }
0x13d9   : > { %v6359_v60 = vadd.f32 %v8577_v49, %v6351_v58 }
0x13db   : > { %v6317_v61 = vpop.f32.mrf.mxu2  ;;  %v6336_v34 = vpop.f32.mrf.mxu3  ;;  %v10445_v62 = vadd.f32 %v6359_v60, %v10104_v5 }
0x13dc   : > { %v8583_v34 = vld [vmem:[%s10609_s8 + $0x3] ss:$0 sm:$0xff] }
0x13dd   : > { %v6403_v57 = vsel %vm442_vm0, %v10445_v62, 0.0 }
0x13de   : > { %6404 = vadd.xlane.f32.xlu1 %v6403_v57  ;;  %v8499_v57 = vld [vmem:[%s10610_s9 + $0x50] sm:$0xff] }
0x13df   : > { %6652 = vmatpush.bf16.msrb.mxu2 %v8499_v57 }
0x1441   : > { %v6402_v0 = vpop.xlane.xlu0 %6401 }
0x1442   : > { %v6406_v63 = vmul.f32 %v6402_v0, %v8976_v10 }
0x1444   : > { %v6408_v1 = vsub.f32 %v10433_v43, %v6406_v63 }
0x1446   : > { %v6410_v2 = vmul.f32 %v6408_v1, %v6408_v1 }
0x1448   : > { %v6412_v3 = vsel %vm442_vm0, %v6410_v2, 0.0 }
0x1449   : > { %6413 = vadd.xlane.f32.xlu2 %v6412_v3 }
0x1451   : > { %v6405_v4 = vpop.xlane.xlu1 %6404 }
0x1452   : > { %v6407_v6 = vmul.f32 %v6405_v4, %v8976_v10  ;;  %v8498_v4 = vld [vmem:[%s10610_s9 + $0x48] sm:$0xff] }
0x1453   : > { %6653 = vmatpush.bf16.msrb.mxu2 %v8498_v4 }
0x1454   : > { %v6409_v7 = vsub.f32 %v10445_v62, %v6407_v6 }
0x1456   : > { %v6411_v5 = vmul.f32 %v6409_v7, %v6409_v7 }
0x1457   : > { %6654 = vmatpush.bf16.msrb.mxu2 %v8497_v9 }
0x1458   : > { %v6415_v8 = vsel %vm442_vm0, %v6411_v5, 0.0 }
0x1459   : > { %6416 = vadd.xlane.f32.xlu0 %v6415_v8 }
0x14bc   : > { %v6414_v54 = vpop.xlane.xlu2 %6413 }
0x14bd   : > { %v6418_v12 = vmul.f32 %v6414_v54, %v8976_v10 }
0x14bf   : > { %v6420_v13 = vadd.f32 1e-05, %v6418_v12 }
0x14c1   : > { %8740 = vrsqrt.f32 %v6420_v13  ;;  %vm6428_vm9 = vweird.f32 %v6420_v13 }
0x14c7   : > { %v8741_v15 = vpop.eup %8740 }
0x14c8   : > { %v6423_v16 = vmul.f32 %v8741_v15, %v6420_v13  ;;  %vm6429_vm8 = vweird.f32 %v8741_v15 }
0x14c9   : > { %vm6430_vm3 = vmor %vm6428_vm9, %vm6429_vm8 }
0x14ca   : > { %v6424_v17 = vmul.f32 %v8741_v15, %v6423_v16 }
0x14cc   : > { %v6425_v18 = vmul.f32 0.5, %v6424_v17  ;;  %v6417_v19 = vpop.xlane.xlu0 %6416 }
0x14cd   : > { %v6419_v20 = vmul.f32 %v6417_v19, %v8976_v10 }
0x14ce   : > { %v6426_v21 = vsub.f32 1.5, %v6425_v18 }
0x14cf   : > { %v6421_v22 = vadd.f32 1e-05, %v6419_v20 }
0x14d0   : > { %v6427_v46 = vmul.f32 %v8741_v15, %v6426_v21 }
0x14d1   : > { %8742 = vrsqrt.f32 %v6421_v22  ;;  %vm6438_vm5 = vweird.f32 %v6421_v22 }
0x14d2   : > { %v6431_v24 = vsel %vm6430_vm3, %v8741_v15, %v6427_v46 }
0x14d3   : > { %v6442_v26 = vmul.f32 %v6431_v24, %v6408_v1 }
0x14d5   : > { %v6450_v27 = vmul.f32 %v8578_v23, %v6442_v26 }
0x14d7   : > { %v8743_v29 = vpop.eup %8742  ;;  %v6458_v10 = vadd.f32 %v8579_v25, %v6450_v27  ;;  %v8502_v27 = vld [vmem:[%s10610_s9 + $0x68] sm:$0xff] }
0x14d8   : > { %v6433_v30 = vmul.f32 %v8743_v29, %v6421_v22  ;;  %vm6439_vm4 = vweird.f32 %v8743_v29  ;;  %v8503_v22 = vld [vmem:[%s10610_s9 + $0x70] sm:$0xff] }
0x14d9   : > { %v6460_v31 = vpack.c.bf16 %v6458_v10, %v6458_v10  ;;  %vm6440_vm6 = vmor %vm6438_vm5, %vm6439_vm4  ;;  %6692 = vmatpush.bf16.msrb.mxu3 %v8503_v22 }
0x14da   : > { %v6434_v32 = vmul.f32 %v8743_v29, %v6433_v30 }
0x14db   : > { %8237 = vmatmul.msk.bf16.vlgmr.msrb.gmra.mxu0 %vm442_vm0, %v6460_v31 }
0x14dc   : > { %v6435_v33 = vmul.f32 0.5, %v6434_v32 }
0x14dd   : > { %6693 = vmatpush.bf16.msrb.mxu3 %v8502_v27 }
0x14de   : > { %v6436_v37 = vsub.f32 1.5, %v6435_v33 }
0x14e0   : > { %v6437_v38 = vmul.f32 %v8743_v29, %v6436_v37  ;;  %v8501_v37 = vld [vmem:[%s10610_s9 + $0x60] sm:$0xff] }
0x14e1   : > { %6694 = vmatpush.bf16.msrb.mxu3 %v8501_v37 }
0x14e2   : > { %v6441_v36 = vsel %vm6440_vm6, %v8743_v29, %v6437_v38 }
0x14e3   : > { %v6443_v41 = vmul.f32 %v6441_v36, %v6409_v7 }
0x14e5   : > { %v6451_v42 = vmul.f32 %v8580_v39, %v6443_v41 }
0x14e7   : > { %v6459_v44 = vadd.f32 %v8581_v40, %v6451_v42 }
0x14e9   : > { %v6461_v45 = vpack.c.bf16 %v6459_v44, %v6459_v44 }
0x14eb   : > { %8246 = vmatmul.msk.bf16.vlgmr.msrb.gmra.mxu1 %vm442_vm0, %v6461_v45 }
0x1558   : > { %v6492_v50 = vpop.f32.mrf.mxu0 }
0x1559   : > { %v10486_v48 = vadd.f32 %v8582_v47, %v6492_v50 }
0x155b   : > { %v10489_v51 = vmul.f32 0.70710677, %v10486_v48 }
0x155d   : > { %v6528_v52 = vmul.f32 %v10489_v51, %v10489_v51 }
0x155f   : > { %v6529_v55 = vmin.f32 %v6528_v52, 16.0 }
0x1560   : > { %v6494_v56 = vpop.f32.mrf.mxu0 }
0x1561   : > { %v6530_v35 = vmul.f32 2.1237322e-06, %v6529_v55  ;;  %v6541_v49 = vmul.f32 3.8918573e-05, %v6529_v55 }
0x1563   : > { %v6531_v58 = vadd.f32 0.00028619796, %v6530_v35  ;;  %v6542_v59 = vadd.f32 0.001143296, %v6541_v49 }
0x1565   : > { %v6532_v60 = vmul.f32 %v6531_v58, %v6529_v55  ;;  %v6543_v61 = vmul.f32 %v6542_v59, %v6529_v55 }
0x1567   : > { %v6533_v0 = vadd.f32 0.0036580483, %v6532_v60  ;;  %v6544_v63 = vadd.f32 0.014752088, %v6543_v61  ;;  %v6524_v61 = vmul.f32 0.5, %v10486_v48 }
0x1568   : > { %v6520_v1 = vpop.f32.mrf.mxu1 }
0x1569   : > { %v6545_v2 = vmul.f32 %v6544_v63, %v6529_v55  ;;  %v10502_v3 = vadd.f32 %v8583_v34, %v6520_v1  ;;  %v6534_v6 = vmul.f32 %v6533_v0, %v6529_v55 }
0x156b   : > { %v6546_v7 = vadd.f32 0.112945676, %v6545_v2  ;;  %v10508_v5 = vmul.f32 0.70710677, %v10502_v3  ;;  %v6535_v54 = vadd.f32 0.05243302, %v6534_v6 }
0x156d   : > { %v6547_v8 = vmul.f32 %v6546_v7, %v6529_v55  ;;  %v6568_v11 = vmul.f32 %v10508_v5, %v10508_v5  ;;  %v6536_v18 = vmul.f32 %v6535_v54, %v6529_v55 }
0x156f   : > { %v6548_v12 = vadd.f32 0.4994258, %v6547_v8  ;;  %v6569_v13 = vmin.f32 %v6568_v11, 16.0  ;;  %v6537_v24 = vadd.f32 0.18741608, %v6536_v18 }
0x1570   : > { %v6522_v14 = vpop.f32.mrf.mxu1 }
0x1571   : > { %v6549_v15 = vmul.f32 %v6548_v12, %v6529_v55  ;;  %v6570_v16 = vmul.f32 2.1237322e-06, %v6569_v13  ;;  %v6581_v17 = vmul.f32 3.8918573e-05, %v6569_v13  ;;  %v6538_v30 = vmul.f32 %v6537_v24, %v6529_v55 }
0x1573   : > { %v6550_v19 = vadd.f32 1.0, %v6549_v15  ;;  %v6571_v20 = vadd.f32 0.00028619796, %v6570_v16  ;;  %v6582_v21 = vadd.f32 0.001143296, %v6581_v17  ;;  %v6525_v15 = vmul.f32 0.5, %v10502_v3 }
0x1574   : > { %v6539_v36 = vadd.f32 1.1283791, %v6538_v30 }
0x1575   : > { %8744 = vrcp.f32 %v6550_v19  ;;  %v6572_v46 = vmul.f32 %v6571_v20, %v6569_v13  ;;  %v6583_v23 = vmul.f32 %v6582_v21, %v6569_v13  ;;  %v6562_v40 = vand.u32 2147483648, %v6550_v19 }
0x1576   : > { %v6560_v42 = vand.u32 2147483647, %v6550_v19  ;;  %vm6556_vm10 = vweird.f32 %v6550_v19  ;;  %v6540_v55 = vmul.f32 %v6539_v36, %v10489_v51 }
0x1577   : > { %v6584_v25 = vadd.f32 0.014752088, %v6583_v23  ;;  %v6573_v26 = vadd.f32 0.0036580483, %v6572_v46  ;;  %v6563_v52 = vor.u32 1.1754944e-38, %v6562_v40 }
0x1578   : > { %vm6561_vm12 = vcmp.eq.f32.partialorder %v6560_v42, 8.507059e+37 }
0x1579   : > { %v6585_v29 = vmul.f32 %v6584_v25, %v6569_v13  ;;  %v6574_v33 = vmul.f32 %v6573_v26, %v6569_v13 }
0x157b   : > { %v8745_v10 = vpop.eup %8744  ;;  %v6586_v32 = vadd.f32 0.112945676, %v6585_v29  ;;  %v6575_v45 = vadd.f32 0.05243302, %v6574_v33 }
0x157c   : > { %v6552_v31 = vmul.f32 %v8745_v10, %v6550_v19  ;;  %vm6557_vm7 = vweird.f32 %v8745_v10 }
0x157d   : > { %v6587_v39 = vmul.f32 %v6586_v32, %v6569_v13  ;;  %vm6558_vm11 = vmor %vm6556_vm10, %vm6557_vm7  ;;  %v6576_v53 = vmul.f32 %v6575_v45, %v6569_v13 }
0x157e   : > { %v6553_v38 = vsub.f32 1.0, %v6552_v31 }
0x157f   : > { %v6588_v44 = vadd.f32 0.4994258, %v6587_v39  ;;  %v6577_v60 = vadd.f32 0.18741608, %v6576_v53 }
0x1580   : > { %v6554_v41 = vmul.f32 %v8745_v10, %v6553_v38 }
0x1581   : > { %v6589_v50 = vmul.f32 %v6588_v44, %v6569_v13  ;;  %v6578_v63 = vmul.f32 %v6577_v60, %v6569_v13 }
0x1582   : > { %v6555_v47 = vadd.f32 %v8745_v10, %v6554_v41 }
0x1583   : > { %v6590_v35 = vadd.f32 1.0, %v6589_v50  ;;  %v6579_v51 = vadd.f32 1.1283791, %v6578_v63 }
0x1584   : > { %v6559_v56 = vsel %vm6558_vm11, %v8745_v10, %v6555_v47 }
0x1585   : > { %v6564_v49 = vsel %vm6561_vm12, %v6563_v52, %v6559_v56  ;;  %8746 = vrcp.f32 %v6590_v35  ;;  %v6602_v6 = vand.u32 2147483648, %v6590_v35  ;;  %v6600_v8 = vand.u32 2147483647, %v6590_v35 }
0x1586   : > { %v6565_v58 = vmul.f32 %v6564_v49, %v6540_v55  ;;  %vm6596_vm15 = vweird.f32 %v6590_v35  ;;  %v6580_v11 = vmul.f32 %v6579_v51, %v10508_v5  ;;  %v8584_v5 = vld [vmem:[%s10611_s10 + $0x2] ss:$0 sm:$0xff] }
0x1587   : > { %v6603_v48 = vor.u32 1.1754944e-38, %v6602_v6  ;;  %vm6601_vm2 = vcmp.eq.f32.partialorder %v6600_v8, 8.507059e+37 }
0x1588   : > { %v8247_v59 = vclamps-f32 %v6565_v58, 1.0 }
0x158a   : > { %v6608_v34 = vadd.f32 1.0, %v8247_v59 }
0x158b   : > { %v8747_v57 = vpop.eup %8746 }
0x158c   : > { %v6610_v0 = vmul.f32 %v6608_v34, %v6524_v61  ;;  %v6592_v1 = vmul.f32 %v8747_v57, %v6590_v35  ;;  %vm6597_vm14 = vweird.f32 %v8747_v57 }
0x158d   : > { %vm6598_vm1 = vmor %vm6596_vm15, %vm6597_vm14 }
0x158e   : > { %v6612_v2 = vpack.c.bf16 %v6610_v0, %v6610_v0  ;;  %v6593_v4 = vsub.f32 1.0, %v6592_v1 }
0x1590   : > { %8265 = vmatmul.msk.bf16.vlgmr.msrb.gmra.mxu2 %vm3513_vm13, %v6612_v2  ;;  %v6594_v7 = vmul.f32 %v8747_v57, %v6593_v4 }
0x1592   : > { %v6595_v9 = vadd.f32 %v8747_v57, %v6594_v7 }
0x1594   : > { %v6599_v54 = vsel %vm6598_vm1, %v8747_v57, %v6595_v9 }
0x1595   : > { %v6604_v12 = vsel %vm6601_vm2, %v6603_v48, %v6599_v54 }
0x1596   : > { %v6605_v13 = vmul.f32 %v6604_v12, %v6580_v11 }
0x1598   : > { %v8248_v14 = vclamps-f32 %v6605_v13, 1.0 }
0x159a   : > { %v6609_v28 = vadd.f32 1.0, %v8248_v14 }
0x159c   : > { %v6611_v16 = vmul.f32 %v6609_v28, %v6525_v15 }
0x159e   : > { %v6613_v17 = vpack.c.bf16 %v6611_v16, %v6611_v16 }
0x15a0   : > { %8282 = vmatmul.msk.bf16.vlgmr.msrb.gmra.mxu3 %vm3513_vm13, %v6613_v17 }
0x1613   : > { %v6656_v3 = vpop.f32.mrf.mxu2 }
0x1614   : > { %v6657_v18 = vadd.f32 %v8584_v5, %v6656_v3 }
0x1616   : > { %v6700_v19 = vadd.f32 %v6657_v18, %v10433_v43 }
0x1618   : > { %6702 = vst.msk [vmem:[%s421_s0] sm:$0xff] %vm442_vm0, %v6700_v19 }
0x1619   : > { %8777 = shalt.err (!%p8774_p3)
}
0x161a   : > { %8505 = dma.vmem_to_hbm [thread:$0]  (%p8950_p5), %s6723_s1, 128, %s6725_s19, %s6705_s30   ;;  %v8585_v20 = vld [vmem:[%s10611_s10 + $0x3] ss:$0 sm:$0xff] }
0x161b   : > { %v6658_v43 = vpop.f32.mrf.mxu2  ;;  %s10627_s17 = sshll.u32 %s8933_s25, 3  ;;  %s10628_s29 = sshll.u32 %s10534_s28, 3 }
0x161c   : > { %s6734_s26 = scalar_lea.hbm %s10613_s12, %s10627_s17  ;;  %s428_s15 = scalar_lea.vmem [#allocation4], %s10628_s29 }
0x161d   : > { %s6736_s16 = sshll.u32 %s428_s15, 4  ;;  %s6738_s20 = sshll.u32 %s6734_s26, 4  ;;  %s6737_s16 = int_to_ptr.vmem [resolvable:$true] %s6736_s16  ;;  %s6739_s20 = int_to_ptr.hbm [resolvable:$true] %s6738_s20 }
0x161e   : > { %s6710_s2 = scalar_lea.sflag [#allocation5], %s10534_s28  ;;  %s8792_s1 = sshra.s32 %s6739_s20, 4  ;;  %s8793_s1 = int_to_ptr.hbm [resolvable:$true] %s8792_s1 }
0x161f   : > { %s8794_s25 = scalar_lea.hbm %s8793_s1, 8  ;;  %s8798_s30 = scalar_lea.hbm %s10613_s12, 16 }
0x1620   : > { %p8795_p4 = scmp.ne.s32.totalorder %s8793_s1, %s8794_s25  ;;  %p8799_p9 = scmp.lt.s32.totalorder %s8793_s1, %s10613_s12 }
0x1621   : > { %p8800_p10 = scmp.lt.s32.totalorder %s8798_s30, %s8794_s25 }
0x1622   : > { %p8796_p7 = pnand %p8795_p4, %p8950_p5 }
0x1623   : > { %v6696_v21 = vpop.f32.mrf.mxu3  ;;  %p8801_p11 = por %p8800_p10, %p8799_p9 }
0x1624   : > { %v6697_v22 = vadd.f32 %v8585_v20, %v6696_v21  ;;  %p8797_p8 = pneg %p8796_p7 }
0x1626   : > { %v6701_v46 = vadd.f32 %v6697_v22, %v10445_v62  ;;  %p8802_p12 = pnand %p8801_p11, %p8797_p8 }
0x1628   : > { %6703 = vst.msk [vmem:[%s428_s15] sm:$0xff] %vm442_vm0, %v6701_v46 }
0x1629   : > { %8805 = shalt.err (!%p8802_p12)
}
0x162a   : > { %8506 = dma.vmem_to_hbm [thread:$0]  (%p8950_p5), %s6737_s16, 128, %s6739_s20, %s6710_s2  }
0x162b   : > { %v6698_v62 = vpop.f32.mrf.mxu3 }
0x162c PF: > { %p8516_p13 = scmp.ge.s32.totalorder %s8844_s24, 2  ;;  %s6750_s28 = sand.u32 1, %s8832_s21  }
0x162d   : > { %s6751_s18 = scalar_lea.sflag [#allocation3], %s6750_s28 }
0x162e   : > { %p8510_p0 = pnand %p8516_p13, %p8954_p6 }
0x1630   : > { %p8511_p1 = pneg %p8510_p0 }
0x1632   : > { %8823 = dma.done.wait (%p8511_p1), %s6751_s18, 128  }
0x1633   : > { %8825 = vsyncadd (%p8511_p1), %s6751_s18, 4294967168  ;;  %s6761_s26 = scalar_lea.sflag [#allocation5], %s6750_s28 }
0x1634   : > { %8827 = dma.done.wait (%p8511_p1), %s6761_s26, 128  }
0x1635   : > { %8829 = vsyncadd (%p8511_p1), %s6761_s26, 4294967168  ;;  %s10629_s13 = sld [smem:[#allocation8_spill]]  ;;  %p26_p5 = scmp.ge.s32.totalorder %s8937_s27, 4  }
0x1636   : > { %s10630_s21 = smov %s8836_s22  ;;  %s10631_s22 = smov %s8840_s23 }
0x1637   : > { %s10633_s24 = smov %s8937_s27  ;;  %28 = sbr.rel (!%p26_p5) target bundleno = 10 (0xa), region = 142 }
0x163b   : > { %s10632_s23 = smov %s10629_s13 }
0x163c   :  { %6767 = vsyncpa [#allocation3], 1 }
0x163d   :  { %6769 = vsyncpa [#allocation3 + $0x1], 1 }
0x163e   :  { %6770 = vsyncpa [#allocation5], 1 }
0x163f   :  { %6772 = vsyncpa [#allocation5 + $0x1], 1 }

</bundles_post_ra>
